<compile_context>
chip_gen: v7x
topology: tpu7x:2x2x1
jax: 0.10.0
libtpu: 0.0.40
codegen_flags: <defaults>
</compile_context>

<pallas_src>
import jax
import jax.numpy as jnp
from jax import lax
from jax.experimental import pallas as pl
from jax.experimental.pallas import tpu as pltpu


def _zero_halo(ref, H, W, C):
    """Zero only the 1-pixel border of a (H+2, W+2, C) padded scratch."""
    dt = ref.dtype
    ref[0:1, :, :] = jnp.zeros((1, W + 2, C), dt)
    ref[H + 1:H + 2, :, :] = jnp.zeros((1, W + 2, C), dt)
    ref[1:H + 1, 0:1, :] = jnp.zeros((H, 1, C), dt)
    ref[1:H + 1, W + 1:W + 2, :] = jnp.zeros((H, 1, C), dt)


def _conv3x3(src_ref, w_ref, H, W, C):
    """3x3 'same' conv over a zero-padded (H+2, W+2, C) bf16 scratch.

    dw-outer / dh-inner: one sublane-shifted materialization per column tap,
    reused across the three row taps. Each tap is one (H*W, C) x (C, C) MXU
    matmul accumulating in f32.
    """
    acc = jnp.zeros((H * W, C), jnp.float32)
    for dw in range(3):                                  # unrolled at trace time
        xw = src_ref[:, dw:dw + W, :]                    # (H+2, W, C) bf16
        for dh in range(3):
            patch = xw[dh:dh + H].reshape(H * W, C)      # cheap outer-dim slice
            acc = acc + jnp.dot(patch, w_ref[dh * 3 + dw],
                                preferred_element_type=jnp.float32)
    return acc                                           # f32 (H*W, C)


def _resblock_kernel(x_ref, w1_ref, b1_ref, w2_ref, b2_ref, o_ref,
                     xpad_ref, mid_ref):
    # x_ref   : (1, H, W, C) f32   unpadded input / identity
    # w*_ref  : (9, C, C)    bf16  3x3 taps flattened along dim 0 (HWIO order)
    # b*_ref  : (1, C)       f32
    # o_ref   : (1, H, W, C) f32
    # xpad_ref, mid_ref : (H+2, W+2, C) bf16 zero-padded scratches
    H, W, C = o_ref.shape[1], o_ref.shape[2], o_ref.shape[3]

    x = x_ref[0]                                         # (H, W, C) f32

    # Stage input into the zero-padded bf16 scratch (halo-only zeroing).
    _zero_halo(xpad_ref, H, W, C)
    xpad_ref[1:H + 1, 1:W + 1, :] = x.astype(jnp.bfloat16)

    # ---- conv1 + bias + ReLU -> padded bf16 scratch for conv2 ----
    h1 = jnp.maximum(_conv3x3(xpad_ref, w1_ref, H, W, C) + b1_ref[...], 0.0)
    _zero_halo(mid_ref, H, W, C)
    mid_ref[1:H + 1, 1:W + 1, :] = h1.reshape(H, W, C).astype(jnp.bfloat16)

    # ---- conv2 + bias + residual add (all f32) ----
    h2 = _conv3x3(mid_ref, w2_ref, H, W, C) + b2_ref[...]
    o_ref[0] = (h2.reshape(H, W, C) + x).astype(o_ref.dtype)


@jax.jit
def residual_block_nobn(x_nchw, w1_hwio, b1, w2_hwio, b2):
    """x_nchw: (B, C, H, W); w*_hwio: (3, 3, C, C); b*: (C,). Returns NCHW."""
    B, C, H, W = x_nchw.shape
    x = jnp.transpose(x_nchw, (0, 2, 3, 1)).astype(jnp.float32)     # NHWC f32

    w1k = w1_hwio.astype(jnp.bfloat16).reshape(9, C, C)
    w2k = w2_hwio.astype(jnp.bfloat16).reshape(9, C, C)
    b1k = b1.astype(jnp.float32).reshape(1, C)
    b2k = b2.astype(jnp.float32).reshape(1, C)

    out_nhwc = pl.pallas_call(
        _resblock_kernel,
        out_shape=jax.ShapeDtypeStruct((B, H, W, C), jnp.float32),
        grid_spec=pltpu.PrefetchScalarGridSpec(
            num_scalar_prefetch=0,
            grid=(B,),
            in_specs=[
                pl.BlockSpec((1, H, W, C), lambda b: (b, 0, 0, 0)),
                pl.BlockSpec((9, C, C), lambda b: (0, 0, 0)),
                pl.BlockSpec((1, C), lambda b: (0, 0)),
                pl.BlockSpec((9, C, C), lambda b: (0, 0, 0)),
                pl.BlockSpec((1, C), lambda b: (0, 0)),
            ],
            out_specs=pl.BlockSpec((1, H, W, C), lambda b: (b, 0, 0, 0)),
            scratch_shapes=[
                pltpu.VMEM((H + 2, W + 2, C), jnp.bfloat16),   # padded input
                pltpu.VMEM((H + 2, W + 2, C), jnp.bfloat16),   # padded conv1 out
            ],
        ),
        compiler_params=pltpu.CompilerParams(
            dimension_semantics=("parallel",)),                # v7x: 2 TCs split batch
    )(x, w1k, b1k, w2k, b2k)

    return jnp.transpose(out_nhwc, (0, 3, 1, 2))               # back to NCHW


def _reference(x_nchw, w1_hwio, b1, w2_hwio, b2):
    """Pure-JAX reference using lax.conv (same semantics as PyTorch Conv2d pad=1)."""
    dn = ("NCHW", "OIHW", "NCHW")
    w1_oihw = jnp.transpose(w1_hwio, (3, 2, 0, 1))
    w2_oihw = jnp.transpose(w2_hwio, (3, 2, 0, 1))
    y = lax.conv_general_dilated(x_nchw, w1_oihw, (1, 1), "SAME",
                                 dimension_numbers=dn) + b1[None, :, None, None]
    y = jnp.maximum(y, 0.0)
    y = lax.conv_general_dilated(y, w2_oihw, (1, 1), "SAME",
                                 dimension_numbers=dn) + b2[None, :, None, None]
    return x_nchw + y


if __name__ == "__main__":
    B, C, H, W = 2, 64, 16, 16                 # nf=64 (module default), small spatial

    key = jax.random.PRNGKey(0)
    kx, k1, k2, kb1, kb2 = jax.random.split(key, 5)

    # kaiming_normal_(a=0, mode='fan_in'): std = sqrt(2 / fan_in), fan_in = C*3*3;
    # then scaled by 0.1 (initialize_weights).  Biases are zero-initialized by the
    # module; small random biases are used here to exercise the bias path
    # (forward semantics are identical).
    fan_in = C * 3 * 3
    std = (2.0 / fan_in) ** 0.5
    w1 = jax.random.normal(k1, (3, 3, C, C), jnp.float32) * std * 0.1   # HWIO
    w2 = jax.random.normal(k2, (3, 3, C, C), jnp.float32) * std * 0.1   # HWIO
    b1 = jax.random.normal(kb1, (C,), jnp.float32) * 0.01
    b2 = jax.random.normal(kb2, (C,), jnp.float32) * 0.01

    x = jax.random.normal(kx, (B, C, H, W), jnp.float32)                # NCHW input

    out = residual_block_nobn(x, w1, b1, w2, b2)
    out = jax.block_until_ready(out)

    ref = _reference(x, w1, b1, w2, b2)
    assert out.shape == x.shape
    # bf16 matmul operands with f32 accumulation; identity add is exact f32.
    assert jnp.max(jnp.abs(out - ref)) < 2e-3, "mismatch vs JAX conv reference"

    print("KERNEL_OK")
</pallas_src>

<mosaic_0001>
module attributes {stable_mosaic.version = 11 : i64} {
  func.func @_resblock_kernel(%arg0: i32, %arg1: memref<1x16x16x64xf32, #tpu.memory_space<vmem>>, %arg2: memref<9x64x64xbf16, #tpu.memory_space<vmem>>, %arg3: memref<1x64xf32, #tpu.memory_space<vmem>>, %arg4: memref<9x64x64xbf16, #tpu.memory_space<vmem>>, %arg5: memref<1x64xf32, #tpu.memory_space<vmem>>, %arg6: memref<1x16x16x64xf32, #tpu.memory_space<vmem>>, %arg7: memref<18x18x64xbf16, #tpu.memory_space<vmem>>, %arg8: memref<18x18x64xbf16, #tpu.memory_space<vmem>>) attributes {dimension_semantics = [#tpu.dimension_semantics<parallel>], iteration_bounds = array<i64: 2>, scalar_prefetch = 0 : i64, scratch_operands = 2 : i64, tpu.core_type = #tpu.core_type<tc>, window_params = [{transform_indices = @transform_0, window_bounds = array<i64: 1, 16, 16, 64>}, {pipeline_mode = #tpu.pipeline_mode<synchronous>, transform_indices = @transform_1, window_bounds = array<i64: 9, 64, 64>}, {pipeline_mode = #tpu.pipeline_mode<synchronous>, transform_indices = @transform_2, window_bounds = array<i64: 1, 64>}, {pipeline_mode = #tpu.pipeline_mode<synchronous>, transform_indices = @transform_3, window_bounds = array<i64: 9, 64, 64>}, {pipeline_mode = #tpu.pipeline_mode<synchronous>, transform_indices = @transform_4, window_bounds = array<i64: 1, 64>}, {transform_indices = @transform_5, window_bounds = array<i64: 1, 16, 16, 64>}]} {
    %c0 = arith.constant 0 : index
    %c0_0 = arith.constant 0 : index
    %c0_1 = arith.constant 0 : index
    %c0_2 = arith.constant 0 : index
    %0 = vector.load %arg1[%c0, %c0_0, %c0_1, %c0_2] : memref<1x16x16x64xf32, #tpu.memory_space<vmem>>, vector<1x16x16x64xf32>
    %1 = vector.shape_cast %0 : vector<1x16x16x64xf32> to vector<16x16x64xf32>
    %cst = arith.constant 0.000000e+00 : bf16
    %2 = vector.broadcast %cst : bf16 to vector<1x18x64xbf16>
    %c0_3 = arith.constant 0 : index
    %c0_4 = arith.constant 0 : index
    %c0_5 = arith.constant 0 : index
    %3 = vector.load %arg7[%c0_3, %c0_4, %c0_5] : memref<18x18x64xbf16, #tpu.memory_space<vmem>>, vector<1x18x64xbf16>
    tpu.vector_store %arg7[%c0_3, %c0_4, %c0_5], %2 {strides = array<i32>} : memref<18x18x64xbf16, #tpu.memory_space<vmem>>, vector<1x18x64xbf16>,
    %cst_6 = arith.constant 0.000000e+00 : bf16
    %4 = vector.broadcast %cst_6 : bf16 to vector<1x18x64xbf16>
    %c17 = arith.constant 17 : index
    %c0_7 = arith.constant 0 : index
    %c0_8 = arith.constant 0 : index
    %5 = vector.load %arg7[%c17, %c0_7, %c0_8] : memref<18x18x64xbf16, #tpu.memory_space<vmem>>, vector<1x18x64xbf16>
    tpu.vector_store %arg7[%c17, %c0_7, %c0_8], %4 {strides = array<i32>} : memref<18x18x64xbf16, #tpu.memory_space<vmem>>, vector<1x18x64xbf16>,
    %cst_9 = arith.constant 0.000000e+00 : bf16
    %6 = vector.broadcast %cst_9 : bf16 to vector<16x1x64xbf16>
    %c1 = arith.constant 1 : index
    %c0_10 = arith.constant 0 : index
    %c0_11 = arith.constant 0 : index
    %7 = vector.load %arg7[%c1, %c0_10, %c0_11] : memref<18x18x64xbf16, #tpu.memory_space<vmem>>, vector<16x1x64xbf16>
    tpu.vector_store %arg7[%c1, %c0_10, %c0_11], %6 {strides = array<i32>} : memref<18x18x64xbf16, #tpu.memory_space<vmem>>, vector<16x1x64xbf16>,
    %cst_12 = arith.constant 0.000000e+00 : bf16
    %8 = vector.broadcast %cst_12 : bf16 to vector<16x1x64xbf16>
    %c1_13 = arith.constant 1 : index
    %c17_14 = arith.constant 17 : index
    %c0_15 = arith.constant 0 : index
    %9 = vector.load %arg7[%c1_13, %c17_14, %c0_15] : memref<18x18x64xbf16, #tpu.memory_space<vmem>>, vector<16x1x64xbf16>
    tpu.vector_store %arg7[%c1_13, %c17_14, %c0_15], %8 {strides = array<i32>} : memref<18x18x64xbf16, #tpu.memory_space<vmem>>, vector<16x1x64xbf16>,
    %10 = arith.truncf %1 : vector<16x16x64xf32> to vector<16x16x64xbf16>
    %c1_16 = arith.constant 1 : index
    %c1_17 = arith.constant 1 : index
    %c0_18 = arith.constant 0 : index
    %11 = vector.load %arg7[%c1_16, %c1_17, %c0_18] : memref<18x18x64xbf16, #tpu.memory_space<vmem>>, vector<16x16x64xbf16>
    tpu.vector_store %arg7[%c1_16, %c1_17, %c0_18], %10 {strides = array<i32>} : memref<18x18x64xbf16, #tpu.memory_space<vmem>>, vector<16x16x64xbf16>,
    %cst_19 = arith.constant 0.000000e+00 : f32
    %12 = vector.broadcast %cst_19 : f32 to vector<256x64xf32>
    %c0_20 = arith.constant 0 : index
    %c0_21 = arith.constant 0 : index
    %c0_22 = arith.constant 0 : index
    %13 = vector.load %arg7[%c0_20, %c0_21, %c0_22] : memref<18x18x64xbf16, #tpu.memory_space<vmem>>, vector<18x16x64xbf16>
    %14 = vector.extract_strided_slice %13 {offsets = [0, 0, 0], sizes = [16, 16, 64], strides = [1, 1, 1]} : vector<18x16x64xbf16> to vector<16x16x64xbf16>
    %15 = vector.shape_cast %14 : vector<16x16x64xbf16> to vector<256x64xbf16>
    %c0_23 = arith.constant 0 : index
    %c0_24 = arith.constant 0 : index
    %c0_25 = arith.constant 0 : index
    %16 = vector.load %arg2[%c0_23, %c0_24, %c0_25] : memref<9x64x64xbf16, #tpu.memory_space<vmem>>, vector<1x64x64xbf16>
    %17 = vector.shape_cast %16 : vector<1x64x64xbf16> to vector<64x64xbf16>
    %cst_26 = arith.constant dense<0.000000e+00> : vector<256x64xf32>
    %18 = tpu.matmul %15, %17, %cst_26 {dimension_numbers = #tpu.dot_dimension_numbers<[1], [0], [0], [1], [0, 0, 1, 1], [], []>} : vector<256x64xbf16>, vector<64x64xbf16>, vector<256x64xf32> -> vector<256x64xf32>
    %19 = arith.addf %12, %18 : vector<256x64xf32>
    %20 = vector.extract_strided_slice %13 {offsets = [1, 0, 0], sizes = [16, 16, 64], strides = [1, 1, 1]} : vector<18x16x64xbf16> to vector<16x16x64xbf16>
    %21 = vector.shape_cast %20 : vector<16x16x64xbf16> to vector<256x64xbf16>
    %c3 = arith.constant 3 : index
    %c0_27 = arith.constant 0 : index
    %c0_28 = arith.constant 0 : index
    %22 = vector.load %arg2[%c3, %c0_27, %c0_28] : memref<9x64x64xbf16, #tpu.memory_space<vmem>>, vector<1x64x64xbf16>
    %23 = vector.shape_cast %22 : vector<1x64x64xbf16> to vector<64x64xbf16>
    %cst_29 = arith.constant dense<0.000000e+00> : vector<256x64xf32>
    %24 = tpu.matmul %21, %23, %cst_29 {dimension_numbers = #tpu.dot_dimension_numbers<[1], [0], [0], [1], [0, 0, 1, 1], [], []>} : vector<256x64xbf16>, vector<64x64xbf16>, vector<256x64xf32> -> vector<256x64xf32>
    %25 = arith.addf %19, %24 : vector<256x64xf32>
    %26 = vector.extract_strided_slice %13 {offsets = [2, 0, 0], sizes = [16, 16, 64], strides = [1, 1, 1]} : vector<18x16x64xbf16> to vector<16x16x64xbf16>
    %27 = vector.shape_cast %26 : vector<16x16x64xbf16> to vector<256x64xbf16>
    %c6 = arith.constant 6 : index
    %c0_30 = arith.constant 0 : index
    %c0_31 = arith.constant 0 : index
    %28 = vector.load %arg2[%c6, %c0_30, %c0_31] : memref<9x64x64xbf16, #tpu.memory_space<vmem>>, vector<1x64x64xbf16>
    %29 = vector.shape_cast %28 : vector<1x64x64xbf16> to vector<64x64xbf16>
    %cst_32 = arith.constant dense<0.000000e+00> : vector<256x64xf32>
    %30 = tpu.matmul %27, %29, %cst_32 {dimension_numbers = #tpu.dot_dimension_numbers<[1], [0], [0], [1], [0, 0, 1, 1], [], []>} : vector<256x64xbf16>, vector<64x64xbf16>, vector<256x64xf32> -> vector<256x64xf32>
    %31 = arith.addf %25, %30 : vector<256x64xf32>
    %c0_33 = arith.constant 0 : index
    %c1_34 = arith.constant 1 : index
    %c0_35 = arith.constant 0 : index
    %32 = vector.load %arg7[%c0_33, %c1_34, %c0_35] : memref<18x18x64xbf16, #tpu.memory_space<vmem>>, vector<18x16x64xbf16>
    %33 = vector.extract_strided_slice %32 {offsets = [0, 0, 0], sizes = [16, 16, 64], strides = [1, 1, 1]} : vector<18x16x64xbf16> to vector<16x16x64xbf16>
    %34 = vector.shape_cast %33 : vector<16x16x64xbf16> to vector<256x64xbf16>
    %c1_36 = arith.constant 1 : index
    %c0_37 = arith.constant 0 : index
    %c0_38 = arith.constant 0 : index
    %35 = vector.load %arg2[%c1_36, %c0_37, %c0_38] : memref<9x64x64xbf16, #tpu.memory_space<vmem>>, vector<1x64x64xbf16>
    %36 = vector.shape_cast %35 : vector<1x64x64xbf16> to vector<64x64xbf16>
    %cst_39 = arith.constant dense<0.000000e+00> : vector<256x64xf32>
    %37 = tpu.matmul %34, %36, %cst_39 {dimension_numbers = #tpu.dot_dimension_numbers<[1], [0], [0], [1], [0, 0, 1, 1], [], []>} : vector<256x64xbf16>, vector<64x64xbf16>, vector<256x64xf32> -> vector<256x64xf32>
    %38 = arith.addf %31, %37 : vector<256x64xf32>
    %39 = vector.extract_strided_slice %32 {offsets = [1, 0, 0], sizes = [16, 16, 64], strides = [1, 1, 1]} : vector<18x16x64xbf16> to vector<16x16x64xbf16>
    %40 = vector.shape_cast %39 : vector<16x16x64xbf16> to vector<256x64xbf16>
    %c4 = arith.constant 4 : index
    %c0_40 = arith.constant 0 : index
    %c0_41 = arith.constant 0 : index
    %41 = vector.load %arg2[%c4, %c0_40, %c0_41] : memref<9x64x64xbf16, #tpu.memory_space<vmem>>, vector<1x64x64xbf16>
    %42 = vector.shape_cast %41 : vector<1x64x64xbf16> to vector<64x64xbf16>
    %cst_42 = arith.constant dense<0.000000e+00> : vector<256x64xf32>
    %43 = tpu.matmul %40, %42, %cst_42 {dimension_numbers = #tpu.dot_dimension_numbers<[1], [0], [0], [1], [0, 0, 1, 1], [], []>} : vector<256x64xbf16>, vector<64x64xbf16>, vector<256x64xf32> -> vector<256x64xf32>
    %44 = arith.addf %38, %43 : vector<256x64xf32>
    %45 = vector.extract_strided_slice %32 {offsets = [2, 0, 0], sizes = [16, 16, 64], strides = [1, 1, 1]} : vector<18x16x64xbf16> to vector<16x16x64xbf16>
    %46 = vector.shape_cast %45 : vector<16x16x64xbf16> to vector<256x64xbf16>
    %c7 = arith.constant 7 : index
    %c0_43 = arith.constant 0 : index
    %c0_44 = arith.constant 0 : index
    %47 = vector.load %arg2[%c7, %c0_43, %c0_44] : memref<9x64x64xbf16, #tpu.memory_space<vmem>>, vector<1x64x64xbf16>
    %48 = vector.shape_cast %47 : vector<1x64x64xbf16> to vector<64x64xbf16>
    %cst_45 = arith.constant dense<0.000000e+00> : vector<256x64xf32>
    %49 = tpu.matmul %46, %48, %cst_45 {dimension_numbers = #tpu.dot_dimension_numbers<[1], [0], [0], [1], [0, 0, 1, 1], [], []>} : vector<256x64xbf16>, vector<64x64xbf16>, vector<256x64xf32> -> vector<256x64xf32>
    %50 = arith.addf %44, %49 : vector<256x64xf32>
    %c0_46 = arith.constant 0 : index
    %c2 = arith.constant 2 : index
    %c0_47 = arith.constant 0 : index
    %51 = vector.load %arg7[%c0_46, %c2, %c0_47] : memref<18x18x64xbf16, #tpu.memory_space<vmem>>, vector<18x16x64xbf16>
    %52 = vector.extract_strided_slice %51 {offsets = [0, 0, 0], sizes = [16, 16, 64], strides = [1, 1, 1]} : vector<18x16x64xbf16> to vector<16x16x64xbf16>
    %53 = vector.shape_cast %52 : vector<16x16x64xbf16> to vector<256x64xbf16>
    %c2_48 = arith.constant 2 : index
    %c0_49 = arith.constant 0 : index
    %c0_50 = arith.constant 0 : index
    %54 = vector.load %arg2[%c2_48, %c0_49, %c0_50] : memref<9x64x64xbf16, #tpu.memory_space<vmem>>, vector<1x64x64xbf16>
    %55 = vector.shape_cast %54 : vector<1x64x64xbf16> to vector<64x64xbf16>
    %cst_51 = arith.constant dense<0.000000e+00> : vector<256x64xf32>
    %56 = tpu.matmul %53, %55, %cst_51 {dimension_numbers = #tpu.dot_dimension_numbers<[1], [0], [0], [1], [0, 0, 1, 1], [], []>} : vector<256x64xbf16>, vector<64x64xbf16>, vector<256x64xf32> -> vector<256x64xf32>
    %57 = arith.addf %50, %56 : vector<256x64xf32>
    %58 = vector.extract_strided_slice %51 {offsets = [1, 0, 0], sizes = [16, 16, 64], strides = [1, 1, 1]} : vector<18x16x64xbf16> to vector<16x16x64xbf16>
    %59 = vector.shape_cast %58 : vector<16x16x64xbf16> to vector<256x64xbf16>
    %c5 = arith.constant 5 : index
    %c0_52 = arith.constant 0 : index
    %c0_53 = arith.constant 0 : index
    %60 = vector.load %arg2[%c5, %c0_52, %c0_53] : memref<9x64x64xbf16, #tpu.memory_space<vmem>>, vector<1x64x64xbf16>
    %61 = vector.shape_cast %60 : vector<1x64x64xbf16> to vector<64x64xbf16>
    %cst_54 = arith.constant dense<0.000000e+00> : vector<256x64xf32>
    %62 = tpu.matmul %59, %61, %cst_54 {dimension_numbers = #tpu.dot_dimension_numbers<[1], [0], [0], [1], [0, 0, 1, 1], [], []>} : vector<256x64xbf16>, vector<64x64xbf16>, vector<256x64xf32> -> vector<256x64xf32>
    %63 = arith.addf %57, %62 : vector<256x64xf32>
    %64 = vector.extract_strided_slice %51 {offsets = [2, 0, 0], sizes = [16, 16, 64], strides = [1, 1, 1]} : vector<18x16x64xbf16> to vector<16x16x64xbf16>
    %65 = vector.shape_cast %64 : vector<16x16x64xbf16> to vector<256x64xbf16>
    %c8 = arith.constant 8 : index
    %c0_55 = arith.constant 0 : index
    %c0_56 = arith.constant 0 : index
    %66 = vector.load %arg2[%c8, %c0_55, %c0_56] : memref<9x64x64xbf16, #tpu.memory_space<vmem>>, vector<1x64x64xbf16>
    %67 = vector.shape_cast %66 : vector<1x64x64xbf16> to vector<64x64xbf16>
    %cst_57 = arith.constant dense<0.000000e+00> : vector<256x64xf32>
    %68 = tpu.matmul %65, %67, %cst_57 {dimension_numbers = #tpu.dot_dimension_numbers<[1], [0], [0], [1], [0, 0, 1, 1], [], []>} : vector<256x64xbf16>, vector<64x64xbf16>, vector<256x64xf32> -> vector<256x64xf32>
    %69 = arith.addf %63, %68 : vector<256x64xf32>
    %c0_58 = arith.constant 0 : index
    %c0_59 = arith.constant 0 : index
    %70 = vector.load %arg3[%c0_58, %c0_59] : memref<1x64xf32, #tpu.memory_space<vmem>>, vector<1x64xf32>
    %71 = vector.broadcast %70 : vector<1x64xf32> to vector<256x64xf32>
    %72 = arith.addf %69, %71 : vector<256x64xf32>
    %cst_60 = arith.constant 0.000000e+00 : f32
    %73 = vector.broadcast %cst_60 : f32 to vector<256x64xf32>
    %74 = arith.maximumf %72, %73 : vector<256x64xf32>
    %cst_61 = arith.constant 0.000000e+00 : bf16
    %75 = vector.broadcast %cst_61 : bf16 to vector<1x18x64xbf16>
    %c0_62 = arith.constant 0 : index
    %c0_63 = arith.constant 0 : index
    %c0_64 = arith.constant 0 : index
    %76 = vector.load %arg8[%c0_62, %c0_63, %c0_64] : memref<18x18x64xbf16, #tpu.memory_space<vmem>>, vector<1x18x64xbf16>
    tpu.vector_store %arg8[%c0_62, %c0_63, %c0_64], %75 {strides = array<i32>} : memref<18x18x64xbf16, #tpu.memory_space<vmem>>, vector<1x18x64xbf16>,
    %cst_65 = arith.constant 0.000000e+00 : bf16
    %77 = vector.broadcast %cst_65 : bf16 to vector<1x18x64xbf16>
    %c17_66 = arith.constant 17 : index
    %c0_67 = arith.constant 0 : index
    %c0_68 = arith.constant 0 : index
    %78 = vector.load %arg8[%c17_66, %c0_67, %c0_68] : memref<18x18x64xbf16, #tpu.memory_space<vmem>>, vector<1x18x64xbf16>
    tpu.vector_store %arg8[%c17_66, %c0_67, %c0_68], %77 {strides = array<i32>} : memref<18x18x64xbf16, #tpu.memory_space<vmem>>, vector<1x18x64xbf16>,
    %cst_69 = arith.constant 0.000000e+00 : bf16
    %79 = vector.broadcast %cst_69 : bf16 to vector<16x1x64xbf16>
    %c1_70 = arith.constant 1 : index
    %c0_71 = arith.constant 0 : index
    %c0_72 = arith.constant 0 : index
    %80 = vector.load %arg8[%c1_70, %c0_71, %c0_72] : memref<18x18x64xbf16, #tpu.memory_space<vmem>>, vector<16x1x64xbf16>
    tpu.vector_store %arg8[%c1_70, %c0_71, %c0_72], %79 {strides = array<i32>} : memref<18x18x64xbf16, #tpu.memory_space<vmem>>, vector<16x1x64xbf16>,
    %cst_73 = arith.constant 0.000000e+00 : bf16
    %81 = vector.broadcast %cst_73 : bf16 to vector<16x1x64xbf16>
    %c1_74 = arith.constant 1 : index
    %c17_75 = arith.constant 17 : index
    %c0_76 = arith.constant 0 : index
    %82 = vector.load %arg8[%c1_74, %c17_75, %c0_76] : memref<18x18x64xbf16, #tpu.memory_space<vmem>>, vector<16x1x64xbf16>
    tpu.vector_store %arg8[%c1_74, %c17_75, %c0_76], %81 {strides = array<i32>} : memref<18x18x64xbf16, #tpu.memory_space<vmem>>, vector<16x1x64xbf16>,
    %83 = vector.shape_cast %74 : vector<256x64xf32> to vector<16x16x64xf32>
    %84 = arith.truncf %83 : vector<16x16x64xf32> to vector<16x16x64xbf16>
    %c1_77 = arith.constant 1 : index
    %c1_78 = arith.constant 1 : index
    %c0_79 = arith.constant 0 : index
    %85 = vector.load %arg8[%c1_77, %c1_78, %c0_79] : memref<18x18x64xbf16, #tpu.memory_space<vmem>>, vector<16x16x64xbf16>
    tpu.vector_store %arg8[%c1_77, %c1_78, %c0_79], %84 {strides = array<i32>} : memref<18x18x64xbf16, #tpu.memory_space<vmem>>, vector<16x16x64xbf16>,
    %cst_80 = arith.constant 0.000000e+00 : f32
    %86 = vector.broadcast %cst_80 : f32 to vector<256x64xf32>
    %c0_81 = arith.constant 0 : index
    %c0_82 = arith.constant 0 : index
    %c0_83 = arith.constant 0 : index
    %87 = vector.load %arg8[%c0_81, %c0_82, %c0_83] : memref<18x18x64xbf16, #tpu.memory_space<vmem>>, vector<18x16x64xbf16>
    %88 = vector.extract_strided_slice %87 {offsets = [0, 0, 0], sizes = [16, 16, 64], strides = [1, 1, 1]} : vector<18x16x64xbf16> to vector<16x16x64xbf16>
    %89 = vector.shape_cast %88 : vector<16x16x64xbf16> to vector<256x64xbf16>
    %c0_84 = arith.constant 0 : index
    %c0_85 = arith.constant 0 : index
    %c0_86 = arith.constant 0 : index
    %90 = vector.load %arg4[%c0_84, %c0_85, %c0_86] : memref<9x64x64xbf16, #tpu.memory_space<vmem>>, vector<1x64x64xbf16>
    %91 = vector.shape_cast %90 : vector<1x64x64xbf16> to vector<64x64xbf16>
    %cst_87 = arith.constant dense<0.000000e+00> : vector<256x64xf32>
    %92 = tpu.matmul %89, %91, %cst_87 {dimension_numbers = #tpu.dot_dimension_numbers<[1], [0], [0], [1], [0, 0, 1, 1], [], []>} : vector<256x64xbf16>, vector<64x64xbf16>, vector<256x64xf32> -> vector<256x64xf32>
    %93 = arith.addf %86, %92 : vector<256x64xf32>
    %94 = vector.extract_strided_slice %87 {offsets = [1, 0, 0], sizes = [16, 16, 64], strides = [1, 1, 1]} : vector<18x16x64xbf16> to vector<16x16x64xbf16>
    %95 = vector.shape_cast %94 : vector<16x16x64xbf16> to vector<256x64xbf16>
    %c3_88 = arith.constant 3 : index
    %c0_89 = arith.constant 0 : index
    %c0_90 = arith.constant 0 : index
    %96 = vector.load %arg4[%c3_88, %c0_89, %c0_90] : memref<9x64x64xbf16, #tpu.memory_space<vmem>>, vector<1x64x64xbf16>
    %97 = vector.shape_cast %96 : vector<1x64x64xbf16> to vector<64x64xbf16>
    %cst_91 = arith.constant dense<0.000000e+00> : vector<256x64xf32>
    %98 = tpu.matmul %95, %97, %cst_91 {dimension_numbers = #tpu.dot_dimension_numbers<[1], [0], [0], [1], [0, 0, 1, 1], [], []>} : vector<256x64xbf16>, vector<64x64xbf16>, vector<256x64xf32> -> vector<256x64xf32>
    %99 = arith.addf %93, %98 : vector<256x64xf32>
    %100 = vector.extract_strided_slice %87 {offsets = [2, 0, 0], sizes = [16, 16, 64], strides = [1, 1, 1]} : vector<18x16x64xbf16> to vector<16x16x64xbf16>
    %101 = vector.shape_cast %100 : vector<16x16x64xbf16> to vector<256x64xbf16>
    %c6_92 = arith.constant 6 : index
    %c0_93 = arith.constant 0 : index
    %c0_94 = arith.constant 0 : index
    %102 = vector.load %arg4[%c6_92, %c0_93, %c0_94] : memref<9x64x64xbf16, #tpu.memory_space<vmem>>, vector<1x64x64xbf16>
    %103 = vector.shape_cast %102 : vector<1x64x64xbf16> to vector<64x64xbf16>
    %cst_95 = arith.constant dense<0.000000e+00> : vector<256x64xf32>
    %104 = tpu.matmul %101, %103, %cst_95 {dimension_numbers = #tpu.dot_dimension_numbers<[1], [0], [0], [1], [0, 0, 1, 1], [], []>} : vector<256x64xbf16>, vector<64x64xbf16>, vector<256x64xf32> -> vector<256x64xf32>
    %105 = arith.addf %99, %104 : vector<256x64xf32>
    %c0_96 = arith.constant 0 : index
    %c1_97 = arith.constant 1 : index
    %c0_98 = arith.constant 0 : index
    %106 = vector.load %arg8[%c0_96, %c1_97, %c0_98] : memref<18x18x64xbf16, #tpu.memory_space<vmem>>, vector<18x16x64xbf16>
    %107 = vector.extract_strided_slice %106 {offsets = [0, 0, 0], sizes = [16, 16, 64], strides = [1, 1, 1]} : vector<18x16x64xbf16> to vector<16x16x64xbf16>
    %108 = vector.shape_cast %107 : vector<16x16x64xbf16> to vector<256x64xbf16>
    %c1_99 = arith.constant 1 : index
    %c0_100 = arith.constant 0 : index
    %c0_101 = arith.constant 0 : index
    %109 = vector.load %arg4[%c1_99, %c0_100, %c0_101] : memref<9x64x64xbf16, #tpu.memory_space<vmem>>, vector<1x64x64xbf16>
    %110 = vector.shape_cast %109 : vector<1x64x64xbf16> to vector<64x64xbf16>
    %cst_102 = arith.constant dense<0.000000e+00> : vector<256x64xf32>
    %111 = tpu.matmul %108, %110, %cst_102 {dimension_numbers = #tpu.dot_dimension_numbers<[1], [0], [0], [1], [0, 0, 1, 1], [], []>} : vector<256x64xbf16>, vector<64x64xbf16>, vector<256x64xf32> -> vector<256x64xf32>
    %112 = arith.addf %105, %111 : vector<256x64xf32>
    %113 = vector.extract_strided_slice %106 {offsets = [1, 0, 0], sizes = [16, 16, 64], strides = [1, 1, 1]} : vector<18x16x64xbf16> to vector<16x16x64xbf16>
    %114 = vector.shape_cast %113 : vector<16x16x64xbf16> to vector<256x64xbf16>
    %c4_103 = arith.constant 4 : index
    %c0_104 = arith.constant 0 : index
    %c0_105 = arith.constant 0 : index
    %115 = vector.load %arg4[%c4_103, %c0_104, %c0_105] : memref<9x64x64xbf16, #tpu.memory_space<vmem>>, vector<1x64x64xbf16>
    %116 = vector.shape_cast %115 : vector<1x64x64xbf16> to vector<64x64xbf16>
    %cst_106 = arith.constant dense<0.000000e+00> : vector<256x64xf32>
    %117 = tpu.matmul %114, %116, %cst_106 {dimension_numbers = #tpu.dot_dimension_numbers<[1], [0], [0], [1], [0, 0, 1, 1], [], []>} : vector<256x64xbf16>, vector<64x64xbf16>, vector<256x64xf32> -> vector<256x64xf32>
    %118 = arith.addf %112, %117 : vector<256x64xf32>
    %119 = vector.extract_strided_slice %106 {offsets = [2, 0, 0], sizes = [16, 16, 64], strides = [1, 1, 1]} : vector<18x16x64xbf16> to vector<16x16x64xbf16>
    %120 = vector.shape_cast %119 : vector<16x16x64xbf16> to vector<256x64xbf16>
    %c7_107 = arith.constant 7 : index
    %c0_108 = arith.constant 0 : index
    %c0_109 = arith.constant 0 : index
    %121 = vector.load %arg4[%c7_107, %c0_108, %c0_109] : memref<9x64x64xbf16, #tpu.memory_space<vmem>>, vector<1x64x64xbf16>
    %122 = vector.shape_cast %121 : vector<1x64x64xbf16> to vector<64x64xbf16>
    %cst_110 = arith.constant dense<0.000000e+00> : vector<256x64xf32>
    %123 = tpu.matmul %120, %122, %cst_110 {dimension_numbers = #tpu.dot_dimension_numbers<[1], [0], [0], [1], [0, 0, 1, 1], [], []>} : vector<256x64xbf16>, vector<64x64xbf16>, vector<256x64xf32> -> vector<256x64xf32>
    %124 = arith.addf %118, %123 : vector<256x64xf32>
    %c0_111 = arith.constant 0 : index
    %c2_112 = arith.constant 2 : index
    %c0_113 = arith.constant 0 : index
    %125 = vector.load %arg8[%c0_111, %c2_112, %c0_113] : memref<18x18x64xbf16, #tpu.memory_space<vmem>>, vector<18x16x64xbf16>
    %126 = vector.extract_strided_slice %125 {offsets = [0, 0, 0], sizes = [16, 16, 64], strides = [1, 1, 1]} : vector<18x16x64xbf16> to vector<16x16x64xbf16>
    %127 = vector.shape_cast %126 : vector<16x16x64xbf16> to vector<256x64xbf16>
    %c2_114 = arith.constant 2 : index
    %c0_115 = arith.constant 0 : index
    %c0_116 = arith.constant 0 : index
    %128 = vector.load %arg4[%c2_114, %c0_115, %c0_116] : memref<9x64x64xbf16, #tpu.memory_space<vmem>>, vector<1x64x64xbf16>
    %129 = vector.shape_cast %128 : vector<1x64x64xbf16> to vector<64x64xbf16>
    %cst_117 = arith.constant dense<0.000000e+00> : vector<256x64xf32>
    %130 = tpu.matmul %127, %129, %cst_117 {dimension_numbers = #tpu.dot_dimension_numbers<[1], [0], [0], [1], [0, 0, 1, 1], [], []>} : vector<256x64xbf16>, vector<64x64xbf16>, vector<256x64xf32> -> vector<256x64xf32>
    %131 = arith.addf %124, %130 : vector<256x64xf32>
    %132 = vector.extract_strided_slice %125 {offsets = [1, 0, 0], sizes = [16, 16, 64], strides = [1, 1, 1]} : vector<18x16x64xbf16> to vector<16x16x64xbf16>
    %133 = vector.shape_cast %132 : vector<16x16x64xbf16> to vector<256x64xbf16>
    %c5_118 = arith.constant 5 : index
    %c0_119 = arith.constant 0 : index
    %c0_120 = arith.constant 0 : index
    %134 = vector.load %arg4[%c5_118, %c0_119, %c0_120] : memref<9x64x64xbf16, #tpu.memory_space<vmem>>, vector<1x64x64xbf16>
    %135 = vector.shape_cast %134 : vector<1x64x64xbf16> to vector<64x64xbf16>
    %cst_121 = arith.constant dense<0.000000e+00> : vector<256x64xf32>
    %136 = tpu.matmul %133, %135, %cst_121 {dimension_numbers = #tpu.dot_dimension_numbers<[1], [0], [0], [1], [0, 0, 1, 1], [], []>} : vector<256x64xbf16>, vector<64x64xbf16>, vector<256x64xf32> -> vector<256x64xf32>
    %137 = arith.addf %131, %136 : vector<256x64xf32>
    %138 = vector.extract_strided_slice %125 {offsets = [2, 0, 0], sizes = [16, 16, 64], strides = [1, 1, 1]} : vector<18x16x64xbf16> to vector<16x16x64xbf16>
    %139 = vector.shape_cast %138 : vector<16x16x64xbf16> to vector<256x64xbf16>
    %c8_122 = arith.constant 8 : index
    %c0_123 = arith.constant 0 : index
    %c0_124 = arith.constant 0 : index
    %140 = vector.load %arg4[%c8_122, %c0_123, %c0_124] : memref<9x64x64xbf16, #tpu.memory_space<vmem>>, vector<1x64x64xbf16>
    %141 = vector.shape_cast %140 : vector<1x64x64xbf16> to vector<64x64xbf16>
    %cst_125 = arith.constant dense<0.000000e+00> : vector<256x64xf32>
    %142 = tpu.matmul %139, %141, %cst_125 {dimension_numbers = #tpu.dot_dimension_numbers<[1], [0], [0], [1], [0, 0, 1, 1], [], []>} : vector<256x64xbf16>, vector<64x64xbf16>, vector<256x64xf32> -> vector<256x64xf32>
    %143 = arith.addf %137, %142 : vector<256x64xf32>
    %c0_126 = arith.constant 0 : index
    %c0_127 = arith.constant 0 : index
    %144 = vector.load %arg5[%c0_126, %c0_127] : memref<1x64xf32, #tpu.memory_space<vmem>>, vector<1x64xf32>
    %145 = vector.broadcast %144 : vector<1x64xf32> to vector<256x64xf32>
    %146 = arith.addf %143, %145 : vector<256x64xf32>
    %147 = vector.shape_cast %146 : vector<256x64xf32> to vector<16x16x64xf32>
    %148 = arith.addf %147, %1 : vector<16x16x64xf32>
    %c0_128 = arith.constant 0 : index
    %c0_129 = arith.constant 0 : index
    %c0_130 = arith.constant 0 : index
    %c0_131 = arith.constant 0 : index
    %149 = vector.load %arg6[%c0_128, %c0_129, %c0_130, %c0_131] : memref<1x16x16x64xf32, #tpu.memory_space<vmem>>, vector<1x16x16x64xf32>
    %150 = vector.shape_cast %149 : vector<1x16x16x64xf32> to vector<16x16x64xf32>
    %151 = vector.shape_cast %148 : vector<16x16x64xf32> to vector<1x16x16x64xf32>
    tpu.vector_store %arg6[%c0_128, %c0_129, %c0_130, %c0_131], %151 {strides = array<i32>} : memref<1x16x16x64xf32, #tpu.memory_space<vmem>>, vector<1x16x16x64xf32>,
    return
  }
  func.func @transform_0(%arg0: i32) -> (i32, i32, i32, i32) {
    %c0_i32 = arith.constant 0 : i32
    %c0_i32_0 = arith.constant 0 : i32
    %c0_i32_1 = arith.constant 0 : i32
    %c0_i32_2 = arith.constant 0 : i32
    return %arg0, %c0_i32, %c0_i32_0, %c0_i32_1 : i32, i32, i32, i32
  }
  func.func @transform_1(%arg0: i32) -> (i32, i32, i32) {
    %c0_i32 = arith.constant 0 : i32
    %c0_i32_0 = arith.constant 0 : i32
    %c0_i32_1 = arith.constant 0 : i32
    %c0_i32_2 = arith.constant 0 : i32
    return %c0_i32, %c0_i32_0, %c0_i32_1 : i32, i32, i32
  }
  func.func @transform_2(%arg0: i32) -> (i32, i32) {
    %c0_i32 = arith.constant 0 : i32
    %c0_i32_0 = arith.constant 0 : i32
    %c0_i32_1 = arith.constant 0 : i32
    return %c0_i32, %c0_i32_0 : i32, i32
  }
  func.func @transform_3(%arg0: i32) -> (i32, i32, i32) {
    %c0_i32 = arith.constant 0 : i32
    %c0_i32_0 = arith.constant 0 : i32
    %c0_i32_1 = arith.constant 0 : i32
    %c0_i32_2 = arith.constant 0 : i32
    return %c0_i32, %c0_i32_0, %c0_i32_1 : i32, i32, i32
  }
  func.func @transform_4(%arg0: i32) -> (i32, i32) {
    %c0_i32 = arith.constant 0 : i32
    %c0_i32_0 = arith.constant 0 : i32
    %c0_i32_1 = arith.constant 0 : i32
    return %c0_i32, %c0_i32_0 : i32, i32
  }
  func.func @transform_5(%arg0: i32) -> (i32, i32, i32, i32) {
    %c0_i32 = arith.constant 0 : i32
    %c0_i32_0 = arith.constant 0 : i32
    %c0_i32_1 = arith.constant 0 : i32
    %c0_i32_2 = arith.constant 0 : i32
    return %arg0, %c0_i32, %c0_i32_0, %c0_i32_1 : i32, i32, i32, i32
  }
}

</mosaic_0001>

<bundles_post_ra>
// kernel: residual_block_nobn.1
= control target key start
LH: loop header
LB: loop body
LE: loop exit
PB: predicated region body
PF: predicated region fallthrough
CT: control target
= control target key end

     0   :  { %10 = vsyncpa [#allocation5], 0  ;;  %s13046_s0 = inlined_call_operand.vmem [shape: f32[2,16,16,64], index: 0, kind: input, shape index: {}]   ;;  %s13047_s1 = inlined_call_operand.vmem [shape: bf16[9,64,64], index: 1, kind: input, shape index: {}]   ;;  %s13048_s2 = inlined_call_operand.vmem [shape: f32[1,64], index: 2, kind: input, shape index: {}]   ;;  %s13049_s3 = inlined_call_operand.vmem [shape: bf16[9,64,64], index: 3, kind: input, shape index: {}]   ;;  %s13050_s4 = inlined_call_operand.vmem [shape: f32[1,64], index: 4, kind: input, shape index: {}]   ;;  %s13051_s5 = inlined_call_operand.hbm [shape: f32[2,16,16,64], index: 5, kind: output, shape index: {}]  }
   0x1   :  { %12 = vsyncpa [#allocation5 + $0x1], 0  ;;  %s10534_s18 = smov 0   ;;  %s10536_s19 = smov 0  }
   0x2   :  { %s10538_s20 = smov 0   ;;  %s10540_s21 = smov 0  }
   0x3 LB: > { %s10555_s22 = sadd.s32 4294967295, %s10498_s21   ;;  %s7886_s23 = sadd.s32 4294967294, %s10498_s21   ;;  %s10498_s21 = sphi %s10540_s21, %s13185_s21   ;;  %s10494_s20 = sphi %s10538_s20, %s13184_s20   ;;  %s10490_s19 = sphi %s10536_s19, %s13183_s19   ;;  %s10486_s18 = sphi %s10534_s18, %s13182_s18  }
   0x4   : > { %s10559_s24 = sadd.s32 1, %s10498_s21   ;;  %s135_s25 = sadd.s32 1, %s10494_s20 }
   0x5   : > { %s132_s26 = ssub.s32 %s10498_s21, %s10559_s24  ;;  %p145_p0 = scmp.ne.s32.totalorder %s10494_s20, %s10490_s19 }
   0x6   : > { %p133_p1 = scmp.eq.s32.totalorder %s132_s26, 0  ;;  %p146_p2 = scmp.eq.s32.totalorder %s10555_s22, 1 }
   0x7   : > { %p151_p3 = scmp.ne.s32.totalorder %s10490_s19, %s10486_s18  ;;  %p152_p4 = scmp.eq.s32.totalorder %s7886_s23, 1 }
   0x8   : > { %s10570_s27 = scalar_select %p133_p1, %s10494_s20, %s135_s25  }
   0x9   : > { %p10572_p5 = por %p146_p2, %p145_p0  ;;  %p10576_p6 = por %p152_p4, %p151_p3 }
   0xa   : > { %p7889_p7 = scmp.ge.s32.totalorder %s10498_s21, 1  ;;  %p190_p8 = scmp.lt.s32.totalorder %s10498_s21, 3 }
   0xc   : > { %p191_p9 = pnand %p7889_p7, %p190_p8 }
   0xe   : > { %194 = sbr.rel (%p191_p9) target bundleno = 1616 (0x650), region = 40 }
  0x15   : > { %v10296_v0 = vld [vmem:[%s13047_s1 + $0x60] sm:$0xff]   ;;  %p218_p10 = scmp.lt.s32.totalorder %s10555_s22, 1  ;;  %v10297_v1 = vld [vmem:[%s13047_s1 + $0x68] sm:$0xff]   ;;  %vm259_vm0 = vcmask 516096   ;;  %v10298_v2 = vld [vmem:[%s13047_s1 + $0x70] sm:$0xff]   ;;  %v13096_v4 = vmov 0 }
  0x16   : > { %9022 = vmatprep.subr.bf16.mxu0 %v10296_v0  ;;  %vm267_vm1 = vsmask.f32 256  ;;  %v269_v3 = vld [vmem:[#allocation2 + $0xc] sm:$0x1]  ;;  %vm317_vm3 = vsmask.f32 7938 }
  0x17   : > { %s219_s9 = scalar_select %p218_p10, %s10555_s22, 1  ;;  %9023 = vmatpush3.bf16.msra.mxu0 %v10296_v0  ;;  %vm10600_vm2 = vmand %vm259_vm0, %vm267_vm1  ;;  %v319_v5 = vld [vmem:[#allocation2 + $0x14] sm:$0x1]  ;;  %vm256_vm4 = vcmask 519168   ;;  %v13099_v9 = vmov 0  ;;  %v10500_v13 = vmov 0  }
  0x18   : > { %9024 = vmatprep.subr.bf16.mxu0 %v10297_v1  ;;  %v13097_v4 = vsel %vm10600_vm2, 4294967295, %v13096_v4  ;;  %v270_v8 = vsel %vm10600_vm2, 0, %v269_v3  ;;  %vm10610_vm5 = vmand %vm259_vm0, %vm317_vm3  ;;  %257 = vst.msk [vmem:[#allocation2] sm:$0xf] %vm256_vm4, %v10500_v13  ;;  %v10299_v14 = vld [vmem:[%s13047_s1 + $0x78] sm:$0xff]   ;;  %v13102_v27 = vmov 0 }
  0x19   : > { %s8596_s12 = sshll.u32 %s219_s9, 8  ;;  %13098 = vst [vmem:[#allocation7_spill] sm:$0xff] %v13097_v4  ;;  %v13100_v9 = vsel %vm10610_vm5, 4294967295, %v13099_v9  ;;  %271 = vst [vmem:[#allocation2 + $0xc] sm:$0x1] %v270_v8  ;;  %v320_v10 = vsel %vm10610_vm5, 0, %v319_v5 }
  0x1a   : > { %s10596_s15 = scalar_lea.vmem %s13046_s0, %s8596_s12  ;;  %13101 = vst [vmem:[#allocation8_spill] sm:$0xff] %v13100_v9  ;;  %258 = vst.msk [vmem:[#allocation2 + $0x4] sm:$0xf] %vm256_vm4, %v10500_v13  ;;  %vm463_vm6 = vsmask.f32 4368  ;;  %v10642_v30 = vld [vmem:[%s13047_s1] sm:$0xff]  }
  0x1b   : > { %v224_v6 = vld [vmem:[%s10596_s15] sm:$0xff]  ;;  %v225_v7 = vld [vmem:[%s10596_s15 + $0x8] sm:$0xff]  ;;  %9025 = vmatpush3.bf16.msra.mxu0 %v10297_v1  ;;  %260 = vst.msk [vmem:[#allocation2 + $0x8] sm:$0x1] %vm259_vm0, %v10500_v13  ;;  %264 = vst.msk [vmem:[#allocation2 + $0xd4] sm:$0x1] %vm259_vm0, %v10500_v13 }
  0x1c   : > { %v8597_v11 = vpack.c.bf16 %v224_v6, %v224_v6  ;;  %v8598_v12 = vpack.c.bf16 %v225_v7, %v225_v7  ;;  %262 = vst.msk [vmem:[#allocation2 + $0xcc] sm:$0xf] %vm256_vm4, %v10500_v13  ;;  %263 = vst.msk [vmem:[#allocation2 + $0xd0] sm:$0xf] %vm256_vm4, %v10500_v13  ;;  %9026 = vmatprep.subr.bf16.mxu0 %v10298_v2  ;;  %v226_v15 = vld [vmem:[%s10596_s15 + $0x10] sm:$0xff]  ;;  %v227_v20 = vld [vmem:[%s10596_s15 + $0x18] sm:$0xff] }
  0x1d   : > { %4026 = vst.msk [vmem:[#allocation3] sm:$0xf] %vm256_vm4, %v10500_v13  ;;  %4027 = vst.msk [vmem:[#allocation3 + $0x4] sm:$0xf] %vm256_vm4, %v10500_v13  ;;  %v228_v21 = vld [vmem:[%s10596_s15 + $0x20] sm:$0xff]  ;;  %v8599_v23 = vpack.c.bf16 %v226_v15, %v226_v15  ;;  %v8600_v24 = vpack.c.bf16 %v227_v20, %v227_v20  ;;  %v229_v32 = vld [vmem:[%s10596_s15 + $0x28] sm:$0xff] }
  0x1e   : > { %4028 = vst.msk [vmem:[#allocation3 + $0x8] sm:$0x1] %vm259_vm0, %v10500_v13  ;;  %4032 = vst.msk [vmem:[#allocation3 + $0xd4] sm:$0x1] %vm259_vm0, %v10500_v13  ;;  %v466_v16 = vshrl.u32 %v8597_v11, 16  ;;  %v469_v17 = vshll.u32 %v8597_v11, 16  ;;  %v8601_v26 = vpack.c.bf16 %v228_v21, %v228_v21  ;;  %v8602_v49 = vpack.c.bf16 %v229_v32, %v229_v32 }
  0x1f   : > { %4030 = vst.msk [vmem:[#allocation3 + $0xcc] sm:$0xf] %vm256_vm4, %v10500_v13  ;;  %4031 = vst.msk [vmem:[#allocation3 + $0xd0] sm:$0xf] %vm256_vm4, %v10500_v13  ;;  %v474_v18 = vshrl.u32 %v8598_v12, 16  ;;  %v477_v19 = vshll.u32 %v8598_v12, 16  ;;  %9027 = vmatpush3.bf16.msra.mxu0 %v10298_v2 }
  0x20   : > { %321 = vst [vmem:[#allocation2 + $0x14] sm:$0x1] %v320_v10  ;;  %v272_v22 = vld [vmem:[#allocation2 + $0x18] sm:$0x1]  ;;  %v275_v25 = vld [vmem:[#allocation2 + $0x24] sm:$0x1]  ;;  %vm10635_vm7 = vmor %vm267_vm1, %vm463_vm6  ;;  %9028 = vmatprep.subr.bf16.mxu0 %v10299_v14 }
  0x21   : > { %v13103_v27 = vsel %vm10635_vm7, 4294967295, %v13102_v27  ;;  %v468_v28 = vrot.slane %v466_v16, 7  ;;  %v476_v29 = vrot.slane %v474_v18, 7  ;;  %v273_v31 = vsel %vm10600_vm2, 0, %v272_v22  ;;  %vm10651_vm8 = vmand %vm256_vm4, %vm317_vm3  ;;  %v278_v39 = vld [vmem:[#allocation2 + $0x30] sm:$0x1] }
  0x22   : > { %13104 = vst [vmem:[#allocation9_spill] sm:$0xff] %v13103_v27  ;;  %v276_v33 = vsel %vm10600_vm2, 0, %v275_v25  ;;  %v13105_v34 = vmov 0  ;;  %274 = vst [vmem:[#allocation2 + $0x18] sm:$0x1] %v273_v31  ;;  %v483_v35 = vshrl.u32 %v8599_v23, 16 }
  0x23   : > { %v13106_v34 = vsel %vm10651_vm8, 4294967295, %v13105_v34  ;;  %v486_v36 = vshll.u32 %v8599_v23, 16  ;;  %v491_v37 = vshrl.u32 %v8600_v24, 16  ;;  %v494_v38 = vshll.u32 %v8600_v24, 16  ;;  %277 = vst [vmem:[#allocation2 + $0x24] sm:$0x1] %v276_v33  ;;  %9029 = vmatpush3.bf16.msra.mxu0 %v10299_v14 }
  0x24   : > { %13107 = vst [vmem:[#allocation10_spill] sm:$0xff] %v13106_v34  ;;  %v471_v40 = vor.u32 %v469_v17, %v468_v28  ;;  %v472_v41 = vrot.slane %v468_v28, 4  ;;  %v479_v42 = vor.u32 %v477_v19, %v476_v29  ;;  %v481_v43 = vrot.slane %v476_v29, 4  ;;  %v230_v44 = vld [vmem:[%s10596_s15 + $0x30] sm:$0xff]  ;;  %v281_v45 = vld [vmem:[#allocation2 + $0x3c] sm:$0x1]  ;;  %9062 = vmatprep.subr.bf16.mxu0 %v10642_v30 }
  0x25   : > { %v787_v46 = vld [vmem:[#allocation2 + $0xc] sm:$0xf]  ;;  %v485_v47 = vrot.slane %v483_v35, 7  ;;  %v10656_v48 = vrot.slane %v491_v37, 7  ;;  %v500_v50 = vshrl.u32 %v8601_v26, 16  ;;  %v231_v51 = vld [vmem:[%s10596_s15 + $0x38] sm:$0xff]  ;;  %v8603_v2 = vpack.c.bf16 %v230_v44, %v230_v44 }
  0x26   : > { %v480_v52 = vsel %vm10635_vm7, %v472_v41, %v479_v42  ;;  %v788_v53 = vsel %vm10651_vm8, %v471_v40, %v787_v46  ;;  %v503_v55 = vshll.u32 %v8601_v26, 16  ;;  %v279_v56 = vsel %vm10600_vm2, 0, %v278_v39  ;;  %v232_v61 = vld [vmem:[%s10596_s15 + $0x40] sm:$0xff]  ;;  %v233_v5 = vld [vmem:[%s10596_s15 + $0x48] sm:$0xff]  ;;  %v234_v18 = vld [vmem:[%s10596_s15 + $0x50] sm:$0xff]  ;;  %s215_s30 = sand.u32 1, %s10490_s19  }
  0x27   : > { %v791_v54 = vld [vmem:[#allocation2 + $0x14] sm:$0x1]  ;;  %789 = vst [vmem:[#allocation2 + $0xc] sm:$0xf] %v788_v53  ;;  %790 = vst.msk [vmem:[#allocation2 + $0x10] sm:$0xf] %vm256_vm4, %v480_v52  ;;  %v488_v58 = vor.u32 %v486_v36, %v485_v47  ;;  %v496_v60 = vor.u32 %v494_v38, %v10656_v48  ;;  %v8604_v3 = vpack.c.bf16 %v231_v51, %v231_v51 }
  0x28   : > { %v792_v57 = vsel %vm10600_vm2, %v481_v43, %v791_v54  ;;  %v489_v59 = vrot.slane %v485_v47, 4  ;;  %280 = vst [vmem:[#allocation2 + $0x30] sm:$0x1] %v279_v56  ;;  %v502_v62 = vrot.slane %v500_v50, 7  ;;  %v508_v63 = vshrl.u32 %v8602_v49, 16  ;;  %v235_v19 = vld [vmem:[%s10596_s15 + $0x58] sm:$0xff] }
  0x29   : > { %793 = vst [vmem:[#allocation2 + $0x14] sm:$0x1] %v792_v57  ;;  %v511_v0 = vshll.u32 %v8602_v49, 16  ;;  %v282_v6 = vsel %vm10600_vm2, 0, %v281_v45  ;;  %v794_v7 = vld [vmem:[#allocation2 + $0x18] sm:$0xf]  ;;  %v8605_v13 = vpack.c.bf16 %v232_v61, %v232_v61  ;;  %v8606_v25 = vpack.c.bf16 %v233_v5, %v233_v5 }
  0x2a   : > { %v497_v1 = vsel %vm10635_vm7, %v489_v59, %v496_v60  ;;  %v505_v8 = vor.u32 %v503_v55, %v502_v62  ;;  %v506_v10 = vrot.slane %v502_v62, 4  ;;  %v10677_v11 = vrot.slane %v508_v63, 7  ;;  %v801_v12 = vld [vmem:[#allocation2 + $0x24] sm:$0xf]  ;;  %283 = vst [vmem:[#allocation2 + $0x3c] sm:$0x1] %v282_v6 }
  0x2b   : > { %797 = vst.msk [vmem:[#allocation2 + $0x1c] sm:$0xf] %vm256_vm4, %v497_v1  ;;  %v795_v14 = vsel %vm10651_vm8, %v488_v58, %v794_v7  ;;  %v517_v15 = vshrl.u32 %v8603_v2, 16  ;;  %v520_v16 = vshll.u32 %v8603_v2, 16  ;;  %v525_v17 = vshrl.u32 %v8604_v3, 16  ;;  %v236_v41 = vld [vmem:[%s10596_s15 + $0x60] sm:$0xff] }
  0x2c   : > { %vm1056_vm9 = vcmask 523264   ;;  %796 = vst [vmem:[#allocation2 + $0x18] sm:$0xf] %v795_v14  ;;  %v513_v20 = vor.u32 %v511_v0, %v10677_v11  ;;  %v802_v21 = vsel %vm10651_vm8, %v505_v8, %v801_v12  ;;  %v528_v22 = vshll.u32 %v8604_v3, 16  ;;  %v284_v28 = vld [vmem:[#allocation2 + $0x48] sm:$0x1] }
  0x2d   : > { %803 = vst [vmem:[#allocation2 + $0x24] sm:$0xf] %v802_v21  ;;  %v519_v23 = vrot.slane %v517_v15, 7  ;;  %v10686_v24 = vrot.slane %v525_v17, 7  ;;  %v534_v26 = vshrl.u32 %v8605_v13, 16  ;;  %v537_v32 = vshll.u32 %v8605_v13, 16 }
  0x2e   : > { %v10688_v29 = vld [vmem:[#allocation2 + $0xc] sm:$0xff]   ;;  %v514_v31 = vsel %vm10635_vm7, %v506_v10, %v513_v20  ;;  %v8607_v33 = vpack.c.bf16 %v234_v18, %v234_v18  ;;  %v8608_v35 = vpack.c.bf16 %v235_v19, %v235_v19  ;;  %v287_v36 = vld [vmem:[#allocation2 + $0x54] sm:$0x1]  ;;  %v542_v43 = vshrl.u32 %v8606_v25, 16  ;;  %v290_v2 = vld [vmem:[#allocation2 + $0x60] sm:$0x1] }
  0x2f   : > { %804 = vst.msk [vmem:[#allocation2 + $0x28] sm:$0xf] %vm256_vm4, %v514_v31  ;;  %v522_v37 = vor.u32 %v520_v16, %v519_v23  ;;  %v523_v38 = vrot.slane %v519_v23, 4  ;;  %v530_v39 = vor.u32 %v528_v22, %v10686_v24  ;;  %v808_v40 = vld [vmem:[#allocation2 + $0x30] sm:$0xf]  ;;  %9030 = vmatprep.mubr.msk.bf16.mxu0 %vm1056_vm9, %v10688_v29  ;;  %v536_v42 = vrot.slane %v534_v26, 7 }
  0x30   : > { %v545_v44 = vshll.u32 %v8606_v25, 16  ;;  %v285_v45 = vsel %vm10600_vm2, 0, %v284_v28  ;;  %v551_v50 = vshrl.u32 %v8607_v33, 16  ;;  %v554_v51 = vshll.u32 %v8607_v33, 16  ;;  %v10306_v55 = vld [vmem:[%s13047_s1 + $0x8] sm:$0xff]   ;;  %v238_v8 = vld [vmem:[%s10596_s15 + $0x70] sm:$0xff] }
  0x31   : > { %v531_v46 = vsel %vm10635_vm7, %v523_v38, %v530_v39  ;;  %v809_v47 = vsel %vm10651_vm8, %v522_v37, %v808_v40  ;;  %v815_v49 = vld [vmem:[#allocation2 + $0x3c] sm:$0xf]  ;;  %286 = vst [vmem:[#allocation2 + $0x48] sm:$0x1] %v285_v45  ;;  %v539_v52 = vor.u32 %v537_v32, %v536_v42  ;;  %v540_v53 = vrot.slane %v536_v42, 4  ;;  %v237_v57 = vld [vmem:[%s10596_s15 + $0x68] sm:$0xff] }
  0x32   : > { %810 = vst [vmem:[#allocation2 + $0x30] sm:$0xf] %v809_v47  ;;  %811 = vst.msk [vmem:[#allocation2 + $0x34] sm:$0xf] %vm256_vm4, %v531_v46  ;;  %v10704_v54 = vrot.slane %v542_v43, 7  ;;  %v559_v56 = vshrl.u32 %v8608_v35, 16  ;;  %v8609_v62 = vpack.c.bf16 %v236_v41, %v236_v41  ;;  %v8610_v6 = vpack.c.bf16 %v237_v57, %v237_v57 }
  0x33   : > { %v10710_v58 = vld [vmem:[#allocation2 + $0x18] sm:$0xff]   ;;  %v553_v59 = vrot.slane %v551_v50, 7  ;;  %v562_v60 = vshll.u32 %v8608_v35, 16  ;;  %v288_v61 = vsel %vm10600_vm2, 0, %v287_v36  ;;  %v816_v0 = vsel %vm10651_vm8, %v539_v52, %v815_v49  ;;  %v293_v12 = vld [vmem:[#allocation2 + $0x6c] sm:$0x1] }
  0x34   : > { %v547_v63 = vor.u32 %v545_v44, %v10704_v54  ;;  %v10717_v1 = vrot.slane %v559_v56, 7  ;;  %289 = vst [vmem:[#allocation2 + $0x54] sm:$0x1] %v288_v61  ;;  %9031 = vmatmul.mubr.msk.bf16.vlgmr.msra.gmra.mrb[0].mxu0 %vm1056_vm9, %v10710_v58  ;;  %817 = vst [vmem:[#allocation2 + $0x3c] sm:$0xf] %v816_v0  ;;  %v568_v7 = vshrl.u32 %v8609_v62, 16  ;;  %v8611_v25 = vpack.c.bf16 %v238_v8, %v238_v8 }
  0x35   : > { %v556_v3 = vor.u32 %v554_v51, %v553_v59  ;;  %v557_v5 = vrot.slane %v553_v59, 4  ;;  %v239_v10 = vld [vmem:[%s10596_s15 + $0x78] sm:$0xff]  ;;  %9063 = vmatpush3.bf16.msra.mxu0 %v10642_v30  ;;  %v571_v16 = vshll.u32 %v8609_v62, 16  ;;  %v240_v17 = vld [vmem:[%s10596_s15 + $0x80] sm:$0xff]  ;;  %v576_v19 = vshrl.u32 %v8610_v6, 16  ;;  %v10311_v30 = vld [vmem:[%s13047_s1 + $0x10] sm:$0xff]  }
  0x36   : > { %v10724_v13 = vld [vmem:[#allocation2 + $0x24] sm:$0xff]   ;;  %v548_v14 = vsel %vm10635_vm7, %v540_v53, %v547_v63  ;;  %v564_v15 = vor.u32 %v562_v60, %v10717_v1  ;;  %9064 = vmatprep.subr.bf16.mxu0 %v10306_v55  ;;  %v570_v18 = vrot.slane %v568_v7, 7  ;;  %v579_v20 = vshll.u32 %v8610_v6, 16  ;;  %v296_v38 = vld [vmem:[#allocation2 + $0x78] sm:$0x1]  ;;  %v242_v49 = vld [vmem:[%s10596_s15 + $0x90] sm:$0xff] }
  0x37   : > { %818 = vst.msk [vmem:[#allocation2 + $0x40] sm:$0xf] %vm256_vm4, %v548_v14  ;;  %v291_v21 = vsel %vm10600_vm2, 0, %v290_v2  ;;  %9034 = vmatprep.mubr.msk.bf16.mxu0 %vm1056_vm9, %v10724_v13  ;;  %v8612_v26 = vpack.c.bf16 %v239_v10, %v239_v10  ;;  %v241_v28 = vld [vmem:[%s10596_s15 + $0x88] sm:$0xff]  ;;  %v294_v31 = vsel %vm10600_vm2, 0, %v293_v12  ;;  %v8613_v37 = vpack.c.bf16 %v240_v17, %v240_v17  ;;  %v10316_v50 = vld [vmem:[%s13047_s1 + $0x18] sm:$0xff]  }
  0x38   : > { %v565_v22 = vsel %vm10635_vm7, %v557_v5, %v564_v15  ;;  %v822_v23 = vld [vmem:[#allocation2 + $0x48] sm:$0xf]  ;;  %292 = vst [vmem:[#allocation2 + $0x60] sm:$0x1] %v291_v21  ;;  %v573_v35 = vor.u32 %v571_v16, %v570_v18  ;;  %v574_v36 = vrot.slane %v570_v18, 4  ;;  %v10748_v39 = vrot.slane %v576_v19, 7 }
  0x39   : > { %v10743_v32 = vld [vmem:[#allocation2 + $0x30] sm:$0xff]   ;;  %v823_v33 = vsel %vm10651_vm8, %v556_v3, %v822_v23  ;;  %825 = vst.msk [vmem:[#allocation2 + $0x4c] sm:$0xf] %vm256_vm4, %v565_v22  ;;  %295 = vst [vmem:[#allocation2 + $0x6c] sm:$0x1] %v294_v31  ;;  %9065 = vmatpush3.bf16.msra.mxu0 %v10306_v55  ;;  %v585_v40 = vshrl.u32 %v8611_v25, 16  ;;  %v8614_v45 = vpack.c.bf16 %v241_v28, %v241_v28 }
  0x3a   : > { %824 = vst [vmem:[#allocation2 + $0x48] sm:$0xf] %v823_v33  ;;  %v588_v41 = vshll.u32 %v8611_v25, 16  ;;  %v593_v42 = vshrl.u32 %v8612_v26, 16  ;;  %v596_v44 = vshll.u32 %v8612_v26, 16  ;;  %v602_v46 = vshrl.u32 %v8613_v37, 16  ;;  %9066 = vmatprep.subr.bf16.mxu0 %v10311_v30 }
  0x3b   : > { %v829_v43 = vld [vmem:[#allocation2 + $0x54] sm:$0xf]  ;;  %v605_v47 = vshll.u32 %v8613_v37, 16  ;;  %v581_v51 = vor.u32 %v579_v20, %v10748_v39  ;;  %v587_v53 = vrot.slane %v585_v40, 7  ;;  %v243_v55 = vld [vmem:[%s10596_s15 + $0x98] sm:$0xff]  ;;  %v610_v59 = vshrl.u32 %v8614_v45, 16 }
  0x3c   : > { %v830_v52 = vsel %vm10651_vm8, %v573_v35, %v829_v43  ;;  %9035 = vmatmul.mubr.msk.bf16.gmra.mrb[4].mxu0 %vm1056_vm9, %v10743_v32  ;;  %v10760_v56 = vrot.slane %v593_v42, 7  ;;  %v604_v57 = vrot.slane %v602_v46, 7  ;;  %v613_v60 = vshll.u32 %v8614_v45, 16  ;;  %v299_v61 = vld [vmem:[#allocation2 + $0x84] sm:$0x1]  ;;  %v245_v18 = vld [vmem:[%s10596_s15 + $0xa8] sm:$0xff] }
  0x3d   : > { %831 = vst [vmem:[#allocation2 + $0x54] sm:$0xf] %v830_v52  ;;  %v582_v63 = vsel %vm10635_vm7, %v574_v36, %v581_v51  ;;  %v590_v0 = vor.u32 %v588_v41, %v587_v53  ;;  %v591_v2 = vrot.slane %v587_v53, 4  ;;  %v297_v3 = vsel %vm10600_vm2, 0, %v296_v38  ;;  %9067 = vmatpush3.bf16.msra.mxu0 %v10311_v30  ;;  %v244_v5 = vld [vmem:[%s10596_s15 + $0xa0] sm:$0xff]  ;;  %v246_v37 = vld [vmem:[%s10596_s15 + $0xb0] sm:$0xff] }
  0x3e   : > { %v10762_v62 = vld [vmem:[#allocation2 + $0x3c] sm:$0xff]   ;;  %832 = vst.msk [vmem:[#allocation2 + $0x58] sm:$0xf] %vm256_vm4, %v582_v63  ;;  %v598_v6 = vor.u32 %v596_v44, %v10760_v56  ;;  %v607_v8 = vor.u32 %v605_v47, %v604_v57  ;;  %v608_v10 = vrot.slane %v604_v57, 4  ;;  %298 = vst [vmem:[#allocation2 + $0x78] sm:$0x1] %v297_v3  ;;  %9068 = vmatprep.subr.bf16.mxu0 %v10316_v50 }
  0x3f   : > { %v836_v7 = vld [vmem:[#allocation2 + $0x60] sm:$0xf]  ;;  %9038 = vmatprep.mubr.msk.bf16.mxu0 %vm1056_vm9, %v10762_v62  ;;  %v10775_v14 = vrot.slane %v610_v59, 7  ;;  %v8615_v16 = vpack.c.bf16 %v242_v49, %v242_v49  ;;  %v8616_v17 = vpack.c.bf16 %v243_v55, %v243_v55  ;;  %v300_v30 = vsel %vm10600_vm2, 0, %v299_v61  ;;  %v302_v23 = vld [vmem:[#allocation2 + $0x90] sm:$0x1] }
  0x40   : > { %v837_v12 = vsel %vm10651_vm8, %v590_v0, %v836_v7  ;;  %v843_v15 = vld [vmem:[#allocation2 + $0x6c] sm:$0xf]  ;;  %v599_v20 = vsel %vm10635_vm7, %v591_v2, %v598_v6  ;;  %v8617_v22 = vpack.c.bf16 %v244_v5, %v244_v5  ;;  %301 = vst [vmem:[#allocation2 + $0x84] sm:$0x1] %v300_v30  ;;  %v8618_v35 = vpack.c.bf16 %v245_v18, %v245_v18  ;;  %v247_v38 = vld [vmem:[%s10596_s15 + $0xb8] sm:$0xff]  ;;  %v10793_v40 = vld [vmem:[%s13047_s1 + $0xc0] sm:$0xff]  }
  0x41   : > { %v10778_v19 = vld [vmem:[#allocation2 + $0x48] sm:$0xff]   ;;  %838 = vst [vmem:[#allocation2 + $0x60] sm:$0xf] %v837_v12  ;;  %v844_v21 = vsel %vm10651_vm8, %v607_v8, %v843_v15  ;;  %839 = vst.msk [vmem:[#allocation2 + $0x64] sm:$0xf] %vm256_vm4, %v599_v20  ;;  %v615_v25 = vor.u32 %v613_v60, %v10775_v14  ;;  %v619_v26 = vshrl.u32 %v8615_v16, 16  ;;  %9069 = vmatpush3.bf16.msra.mxu0 %v10316_v50 }
  0x42   : > { %845 = vst [vmem:[#allocation2 + $0x6c] sm:$0xf] %v844_v21  ;;  %v622_v28 = vshll.u32 %v8615_v16, 16  ;;  %v627_v31 = vshrl.u32 %v8616_v17, 16  ;;  %v630_v33 = vshll.u32 %v8616_v17, 16  ;;  %v636_v36 = vshrl.u32 %v8617_v22, 16  ;;  %9102 = vmatprep.subr.bf16.mxu0 %v10793_v40 }
  0x43   : > { %v616_v41 = vsel %vm10635_vm7, %v608_v10, %v615_v25  ;;  %v621_v42 = vrot.slane %v619_v26, 7  ;;  %v639_v43 = vshll.u32 %v8617_v22, 16  ;;  %v303_v44 = vsel %vm10600_vm2, 0, %v302_v23  ;;  %v248_v45 = vld [vmem:[%s10596_s15 + $0xc0] sm:$0xff]  ;;  %v305_v60 = vld [vmem:[#allocation2 + $0x9c] sm:$0x1] }
  0x44   : > { %9039 = vmatmul.mubr.msk.bf16.gmra.mrb[8].mxu0 %vm1056_vm9, %v10778_v19  ;;  %846 = vst.msk [vmem:[#allocation2 + $0x70] sm:$0xf] %vm256_vm4, %v616_v41  ;;  %v10803_v46 = vrot.slane %v627_v31, 7  ;;  %v638_v47 = vrot.slane %v636_v36, 7  ;;  %v644_v49 = vshrl.u32 %v8618_v35, 16  ;;  %v647_v50 = vshll.u32 %v8618_v35, 16 }
  0x45   : > { %304 = vst [vmem:[#allocation2 + $0x90] sm:$0x1] %v303_v44  ;;  %v10806_v51 = vld [vmem:[#allocation2 + $0x54] sm:$0xff]   ;;  %v624_v52 = vor.u32 %v622_v28, %v621_v42  ;;  %v625_v53 = vrot.slane %v621_v42, 4  ;;  %v8619_v57 = vpack.c.bf16 %v246_v37, %v246_v37  ;;  %v8620_v59 = vpack.c.bf16 %v247_v38, %v247_v38  ;;  %v249_v2 = vld [vmem:[%s10596_s15 + $0xc8] sm:$0xff]  ;;  %s7890_s8 = sshll.u32 %s215_s30, 8 }
  0x46   : > { %v850_v55 = vld [vmem:[#allocation2 + $0x78] sm:$0xf]  ;;  %v632_v61 = vor.u32 %v630_v33, %v10803_v46  ;;  %v641_v63 = vor.u32 %v639_v43, %v638_v47  ;;  %v642_v0 = vrot.slane %v638_v47, 4  ;;  %9042 = vmatprep.mubr.msk.bf16.mxu0 %vm1056_vm9, %v10806_v51  ;;  %v10814_v5 = vrot.slane %v644_v49, 7  ;;  %v250_v8 = vld [vmem:[%s10596_s15 + $0xd0] sm:$0xff]  ;;  %v252_v43 = vld [vmem:[%s10596_s15 + $0xe0] sm:$0xff] }
  0x47   : > { %v851_v3 = vsel %vm10651_vm8, %v624_v52, %v850_v55  ;;  %v653_v6 = vshrl.u32 %v8619_v57, 16  ;;  %v656_v7 = vshll.u32 %v8619_v57, 16  ;;  %v661_v15 = vshrl.u32 %v8620_v59, 16  ;;  %v857_v18 = vld [vmem:[#allocation2 + $0x84] sm:$0xf]  ;;  %v251_v31 = vld [vmem:[%s10596_s15 + $0xd8] sm:$0xff] }
  0x48   : > { %v10817_v10 = vld [vmem:[#allocation2 + $0x60] sm:$0xff]   ;;  %v633_v12 = vsel %vm10635_vm7, %v625_v53, %v632_v61  ;;  %852 = vst [vmem:[#allocation2 + $0x78] sm:$0xf] %v851_v3  ;;  %v8621_v16 = vpack.c.bf16 %v248_v45, %v248_v45  ;;  %v649_v17 = vor.u32 %v647_v50, %v10814_v5  ;;  %v664_v21 = vshll.u32 %v8620_v59, 16  ;;  %v308_v22 = vld [vmem:[#allocation2 + $0xa8] sm:$0x1] }
  0x49   : > { %853 = vst.msk [vmem:[#allocation2 + $0x7c] sm:$0xf] %vm256_vm4, %v633_v12  ;;  %v655_v20 = vrot.slane %v653_v6, 7  ;;  %v8622_v30 = vpack.c.bf16 %v249_v2, %v249_v2  ;;  %v858_v23 = vsel %vm10651_vm8, %v641_v63, %v857_v18  ;;  %v10825_v25 = vrot.slane %v661_v15, 7  ;;  %v311_v33 = vld [vmem:[#allocation2 + $0xb4] sm:$0x1] }
  0x4a   : > { %v306_v26 = vsel %vm10600_vm2, 0, %v305_v60  ;;  %v670_v28 = vshrl.u32 %v8621_v16, 16  ;;  %v650_v36 = vsel %vm10635_vm7, %v642_v0, %v649_v17  ;;  %859 = vst [vmem:[#allocation2 + $0x84] sm:$0xf] %v858_v23  ;;  %v8623_v42 = vpack.c.bf16 %v250_v8, %v250_v8  ;;  %v253_v49 = vld [vmem:[%s10596_s15 + $0xe8] sm:$0xff]  ;;  %v254_v59 = vld [vmem:[%s10596_s15 + $0xf0] sm:$0xff] }
  0x4b   : > { %v10830_v35 = vld [vmem:[#allocation2 + $0x6c] sm:$0xff]   ;;  %v658_v37 = vor.u32 %v656_v7, %v655_v20  ;;  %v659_v38 = vrot.slane %v655_v20, 4  ;;  %307 = vst [vmem:[#allocation2 + $0x9c] sm:$0x1] %v306_v26  ;;  %860 = vst.msk [vmem:[#allocation2 + $0x88] sm:$0xf] %vm256_vm4, %v650_v36  ;;  %v666_v44 = vor.u32 %v664_v21, %v10825_v25  ;;  %v8624_v0 = vpack.c.bf16 %v251_v31, %v251_v31 }
  0x4c   : > { %v864_v41 = vld [vmem:[#allocation2 + $0x90] sm:$0xf]  ;;  %9043 = vmatmul.mubr.msk.bf16.gmra.mrb[12].mxu0 %vm1056_vm9, %v10817_v10  ;;  %v672_v45 = vrot.slane %v670_v28, 7  ;;  %v673_v47 = vshll.u32 %v8621_v16, 16  ;;  %v314_v50 = vld [vmem:[#allocation2 + $0xc0] sm:$0x1]  ;;  %v8625_v17 = vpack.c.bf16 %v252_v43, %v252_v43  ;;  %v8626_v21 = vpack.c.bf16 %v253_v49, %v253_v49 }
  0x4d   : > { %9046 = vmatprep.mubr.msk.bf16.mxu0 %vm1056_vm9, %v10830_v35  ;;  %v865_v52 = vsel %vm10651_vm8, %v658_v37, %v864_v41  ;;  %v678_v53 = vshrl.u32 %v8622_v30, 16  ;;  %v681_v55 = vshll.u32 %v8622_v30, 16  ;;  %v309_v57 = vsel %vm10600_vm2, 0, %v308_v22  ;;  %v255_v2 = vld [vmem:[%s10596_s15 + $0xf8] sm:$0xff]  ;;  %s12870_s9 = scalar_lea.vmem [#allocation4], %s7890_s8  ;;  %s8661_s10 = sshll.u32 %s10555_s22, 12 }
  0x4e   : > { %v667_v60 = vsel %vm10635_vm7, %v659_v38, %v666_v44  ;;  %866 = vst [vmem:[#allocation2 + $0x90] sm:$0xf] %v865_v52  ;;  %v675_v61 = vor.u32 %v673_v47, %v672_v45  ;;  %v676_v63 = vrot.slane %v672_v45, 4  ;;  %310 = vst [vmem:[#allocation2 + $0xa8] sm:$0x1] %v309_v57  ;;  %v687_v6 = vshrl.u32 %v8623_v42, 16  ;;  %s12992_s13 = scalar_lea.hbm %s13051_s5, %s8661_s10 }
  0x4f   : > { %867 = vst.msk [vmem:[#allocation2 + $0x94] sm:$0xf] %vm256_vm4, %v667_v60  ;;  %v10851_v3 = vrot.slane %v678_v53, 7  ;;  %v690_v7 = vshll.u32 %v8623_v42, 16  ;;  %v312_v8 = vsel %vm10600_vm2, 0, %v311_v33  ;;  %v695_v15 = vshrl.u32 %v8624_v0, 16 }
  0x50   : > { %v10855_v12 = vld [vmem:[#allocation2 + $0x78] sm:$0xff]   ;;  %v698_v16 = vshll.u32 %v8624_v0, 16  ;;  %313 = vst [vmem:[#allocation2 + $0xb4] sm:$0x1] %v312_v8  ;;  %v689_v20 = vrot.slane %v687_v6, 7  ;;  %v315_v30 = vsel %vm10600_vm2, 0, %v314_v50  ;;  %v8627_v28 = vpack.c.bf16 %v254_v59, %v254_v59 }
  0x51   : > { %v683_v18 = vor.u32 %v681_v55, %v10851_v3  ;;  %v10860_v23 = vrot.slane %v695_v15, 7  ;;  %v704_v26 = vshrl.u32 %v8625_v17, 16  ;;  %316 = vst [vmem:[#allocation2 + $0xc0] sm:$0x1] %v315_v30  ;;  %v8628_v31 = vpack.c.bf16 %v255_v2, %v255_v2  ;;  %s7824_s11 = sshll.u32 %s12870_s9, 4  ;;  %s13005_s14 = scalar_lea.sflag [#allocation5], %s215_s30  ;;  %s12994_s11 = int_to_ptr.vmem [resolvable:$true] %s7824_s11 }
  0x52   : > { %v871_v22 = vld [vmem:[#allocation2 + $0x9c] sm:$0xf]  ;;  %v10862_v33 = vld [vmem:[#allocation2 + $0x84] sm:$0xff]   ;;  %v692_v38 = vor.u32 %v690_v7, %v689_v20  ;;  %v693_v41 = vrot.slane %v689_v20, 4  ;;  %v707_v44 = vshll.u32 %v8625_v17, 16  ;;  %v712_v47 = vshrl.u32 %v8626_v21, 16 }
  0x53   : > { %v684_v36 = vsel %vm10635_vm7, %v676_v63, %v683_v18  ;;  %v872_v37 = vsel %vm10651_vm8, %v675_v61, %v871_v22  ;;  %v700_v42 = vor.u32 %v698_v16, %v10860_v23  ;;  %v706_v43 = vrot.slane %v704_v26, 7  ;;  %s10436_s16 = scalar_lea.vmem %s12994_s11, 4096  ;;  %s10501_s17 = smov [#allocation4]  }
  0x54   : > { %9047 = vmatmul.mubr.msk.bf16.gmra.mrb[16].mxu0 %vm1056_vm9, %v10855_v12  ;;  %873 = vst [vmem:[#allocation2 + $0x9c] sm:$0xf] %v872_v37  ;;  %874 = vst.msk [vmem:[#allocation2 + $0xa0] sm:$0xf] %vm256_vm4, %v684_v36  ;;  %v715_v49 = vshll.u32 %v8626_v21, 16  ;;  %v10879_v57 = vrot.slane %v712_v47, 7  ;;  %p10437_p11 = scmp.ne.s32.totalorder %s12994_s11, %s10436_s16 }
  0x55   : > { %9050 = vmatprep.mubr.msk.bf16.mxu0 %vm1056_vm9, %v10862_v33  ;;  %v878_v45 = vld [vmem:[#allocation2 + $0xa8] sm:$0xf]  ;;  %v701_v50 = vsel %vm10635_vm7, %v693_v41, %v700_v42  ;;  %v709_v53 = vor.u32 %v707_v44, %v706_v43  ;;  %v710_v55 = vrot.slane %v706_v43, 4  ;;  %v721_v60 = vshrl.u32 %v8627_v28, 16  ;;  %v325_v37 = vld [vmem:[#allocation2 + $0x2c] sm:$0x1] }
  0x56   : > { %v879_v52 = vsel %vm10651_vm8, %v692_v38, %v878_v45  ;;  %881 = vst.msk [vmem:[#allocation2 + $0xac] sm:$0xf] %vm256_vm4, %v701_v50  ;;  %v724_v61 = vshll.u32 %v8627_v28, 16  ;;  %v729_v63 = vshrl.u32 %v8628_v31, 16  ;;  %v10881_v0 = vld [vmem:[#allocation2 + $0x90] sm:$0xff]   ;;  %v732_v6 = vshll.u32 %v8628_v31, 16  ;;  %p10438_p12 = pnand %p10437_p11, %p10572_p5 }
  0x57   : > { %880 = vst [vmem:[#allocation2 + $0xa8] sm:$0xf] %v879_v52  ;;  %v885_v59 = vld [vmem:[#allocation2 + $0xb4] sm:$0xf]  ;;  %v717_v7 = vor.u32 %v715_v49, %v10879_v57  ;;  %v723_v8 = vrot.slane %v721_v60, 7  ;;  %v326_v41 = vsel %vm10610_vm5, 0, %v325_v37 }
  0x58   : > { %v886_v2 = vsel %vm10651_vm8, %v709_v53, %v885_v59  ;;  %v10886_v15 = vrot.slane %v729_v63, 7  ;;  %v892_v16 = vld [vmem:[#allocation2 + $0xc0] sm:$0xf]  ;;  %327 = vst [vmem:[#allocation2 + $0x2c] sm:$0x1] %v326_v41  ;;  %v498_v44 = vrot.slane %v10656_v48, 4  ;;  %p10439_p13 = pneg %p10438_p12 }
  0x59   : > { %887 = vst [vmem:[#allocation2 + $0xb4] sm:$0xf] %v886_v2  ;;  %v718_v18 = vsel %vm10635_vm7, %v710_v55, %v717_v7  ;;  %v726_v20 = vor.u32 %v724_v61, %v723_v8  ;;  %v727_v21 = vrot.slane %v723_v8, 4  ;;  %v322_v31 = vld [vmem:[#allocation2 + $0x20] sm:$0x1]  ;;  %v515_v45 = vrot.slane %v10677_v11, 4 }
  0x5a   : > { %v734_v30 = vor.u32 %v732_v6, %v10886_v15  ;;  %888 = vst.msk [vmem:[#allocation2 + $0xb8] sm:$0xf] %vm256_vm4, %v718_v18  ;;  %v323_v36 = vsel %vm10610_vm5, 0, %v322_v31  ;;  %v10320_v43 = vld [vmem:[#allocation2] sm:$0xff]   ;;  %v10322_v48 = vld [vmem:[%s13047_s1 + $0xc8] sm:$0xff]   ;;  %v10323_v59 = vld [vmem:[%s13047_s1 + $0xd0] sm:$0xff]  }
  0x5b   : > { %v10888_v17 = vld [vmem:[#allocation2 + $0x9c] sm:$0xff]   ;;  %v893_v26 = vsel %vm10651_vm8, %v726_v20, %v892_v16  ;;  %324 = vst [vmem:[#allocation2 + $0x20] sm:$0x1] %v323_v36  ;;  %v328_v11 = vld [vmem:[#allocation2 + $0x38] sm:$0x1]  ;;  %v549_v61 = vrot.slane %v10704_v54, 4 }
  0x5c   : > { %9051 = vmatmul.mubr.msk.bf16.gmra.mrb[20].mxu0 %vm1056_vm9, %v10881_v0  ;;  %v735_v22 = vsel %vm10635_vm7, %v727_v21, %v734_v30  ;;  %894 = vst [vmem:[#allocation2 + $0xc0] sm:$0xf] %v893_v26  ;;  %v331_v53 = vld [vmem:[#allocation2 + $0x44] sm:$0x1]  ;;  %v329_v55 = vsel %vm10610_vm5, 0, %v328_v11  ;;  %v566_v21 = vrot.slane %v10717_v1, 4 }
  0x5d   : > { %9054 = vmatprep.mubr.msk.bf16.mxu0 %vm1056_vm9, %v10888_v17  ;;  %895 = vst.msk [vmem:[#allocation2 + $0xc4] sm:$0xf] %vm256_vm4, %v735_v22  ;;  %330 = vst [vmem:[#allocation2 + $0x38] sm:$0x1] %v329_v55  ;;  %v332_v60 = vsel %vm10610_vm5, 0, %v331_v53  ;;  %v583_v30 = vrot.slane %v10748_v39, 4 }
  0x5e   : > { %v10902_v28 = vld [vmem:[#allocation2 + $0xa8] sm:$0xff]   ;;  %333 = vst [vmem:[#allocation2 + $0x44] sm:$0x1] %v332_v60  ;;  %v334_v2 = vld [vmem:[#allocation2 + $0x50] sm:$0x1]  ;;  %v600_v1 = vrot.slane %v10760_v56, 4 }
  0x5f   : > { %v805_v49 = vld [vmem:[#allocation2 + $0x2c] sm:$0x1]  ;;  %v337_v8 = vld [vmem:[#allocation2 + $0x5c] sm:$0x1]  ;;  %v335_v16 = vsel %vm10610_vm5, 0, %v334_v2  ;;  %v617_v56 = vrot.slane %v10775_v14, 4 }
  0x60   : > { %v806_v52 = vsel %vm10600_vm2, %v515_v45, %v805_v49  ;;  %336 = vst [vmem:[#allocation2 + $0x50] sm:$0x1] %v335_v16  ;;  %v338_v18 = vsel %vm10610_vm5, 0, %v337_v8  ;;  %v340_v20 = vld [vmem:[#allocation2 + $0x68] sm:$0x1]  ;;  %v651_v55 = vrot.slane %v10814_v5, 4 }
  0x61   : > { %v10907_v38 = vld [vmem:[#allocation2 + $0xb4] sm:$0xff]   ;;  %807 = vst [vmem:[#allocation2 + $0x2c] sm:$0x1] %v806_v52  ;;  %339 = vst [vmem:[#allocation2 + $0x5c] sm:$0x1] %v338_v18  ;;  %v341_v22 = vsel %vm10610_vm5, 0, %v340_v20 }
  0x62   : > { %v798_v47 = vld [vmem:[#allocation2 + $0x20] sm:$0x1]  ;;  %342 = vst [vmem:[#allocation2 + $0x68] sm:$0x1] %v341_v22  ;;  %v343_v41 = vld [vmem:[#allocation2 + $0x74] sm:$0x1] }
  0x63   : > { %v799_v50 = vsel %vm10600_vm2, %v498_v44, %v798_v47  ;;  %v346_v39 = vld [vmem:[#allocation2 + $0x80] sm:$0x1]  ;;  %v349_v49 = vld [vmem:[#allocation2 + $0x8c] sm:$0x1]  ;;  %v355_v60 = vld [vmem:[#allocation2 + $0xa4] sm:$0x1] }
  0x64   : > { %9055 = vmatmul.mubr.msk.bf16.gmra.mrb[24].mxu0 %vm1056_vm9, %v10902_v28  ;;  %v10915_v42 = vld [vmem:[#allocation2 + $0xc0] sm:$0xff]   ;;  %800 = vst [vmem:[#allocation2 + $0x20] sm:$0x1] %v799_v50  ;;  %v812_v63 = vld [vmem:[#allocation2 + $0x38] sm:$0x1]  ;;  %v347_v45 = vsel %vm10610_vm5, 0, %v346_v39 }
  0x65   : > { %9058 = vmatprep.mubr.msk.bf16.mxu0 %vm1056_vm9, %v10907_v38  ;;  %v819_v7 = vld [vmem:[#allocation2 + $0x44] sm:$0x1]  ;;  %348 = vst [vmem:[#allocation2 + $0x80] sm:$0x1] %v347_v45  ;;  %v634_v50 = vrot.slane %v10803_v46, 4  ;;  %v356_v5 = vsel %vm10610_vm5, 0, %v355_v60 }
  0x66   : > { %v820_v54 = vsel %vm10600_vm2, %v549_v61, %v819_v7  ;;  %v352_v46 = vld [vmem:[#allocation2 + $0x98] sm:$0x1]  ;;  %v668_v61 = vrot.slane %v10825_v25, 4  ;;  %357 = vst [vmem:[#allocation2 + $0xa4] sm:$0x1] %v356_v5  ;;  %v702_v18 = vrot.slane %v10860_v23, 4 }
  0x67   : > { %821 = vst [vmem:[#allocation2 + $0x44] sm:$0x1] %v820_v54  ;;  %v826_v26 = vld [vmem:[#allocation2 + $0x50] sm:$0x1]  ;;  %v361_v25 = vld [vmem:[#allocation2 + $0xbc] sm:$0x1] }
  0x68   : > { %v827_v31 = vsel %vm10600_vm2, %v566_v21, %v826_v26  ;;  %v833_v36 = vld [vmem:[#allocation2 + $0x5c] sm:$0x1]  ;;  %v358_v2 = vld [vmem:[#allocation2 + $0xb0] sm:$0x1]  ;;  %v362_v16 = vsel %vm10610_vm5, 0, %v361_v25  ;;  %v719_v20 = vrot.slane %v10879_v57, 4 }
  0x69   : > { %828 = vst [vmem:[#allocation2 + $0x50] sm:$0x1] %v827_v31  ;;  %v834_v37 = vsel %vm10600_vm2, %v583_v30, %v833_v36  ;;  %v840_v44 = vld [vmem:[#allocation2 + $0x68] sm:$0x1]  ;;  %v359_v54 = vsel %vm10610_vm5, 0, %v358_v2  ;;  %v10328_v57 = vld [vmem:[%s13047_s1 + $0x38] sm:$0xff]  }
  0x6a   : > { %835 = vst [vmem:[#allocation2 + $0x5c] sm:$0x1] %v834_v37  ;;  %v841_v47 = vsel %vm10600_vm2, %v600_v1, %v840_v44  ;;  %360 = vst [vmem:[#allocation2 + $0xb0] sm:$0x1] %v359_v54  ;;  %v10326_v23 = vld [vmem:[%s13047_s1 + $0x28] sm:$0xff]   ;;  %vm3034_vm13 = vcmask 1042432  }
  0x6b   : > { %842 = vst [vmem:[#allocation2 + $0x68] sm:$0x1] %v841_v47  ;;  %363 = vst [vmem:[#allocation2 + $0xbc] sm:$0x1] %v362_v16  ;;  %v1696_v31 = vld [vmem:[#allocation2 + $0xc] sm:$0xf] }
  0x6c   : > { %9059 = vmatmul.mubr.msk.bf16.gmra.mrb[28].mxu0 %vm1056_vm9, %v10915_v42  ;;  %v854_v53 = vld [vmem:[#allocation2 + $0x80] sm:$0x1]  ;;  %v11068_v36 = vld [vmem:[#allocation2 + $0x10] sm:$0xf]  ;;  %v364_v37 = vld [vmem:[#allocation2 + $0xc8] sm:$0x1] }
  0x6d   : > { %9070 = vmatprep.mubr.msk.bf16.mxu0 %vm1056_vm9, %v10320_v43  ;;  %v344_v43 = vsel %vm10610_vm5, 0, %v343_v41  ;;  %v855_v14 = vsel %vm10600_vm2, %v634_v50, %v854_v53  ;;  %v875_v8 = vld [vmem:[#allocation2 + $0xa4] sm:$0x1]  ;;  %v1775_v1 = vshrl.u32 %v1696_v31, 16  ;;  %v1778_v39 = vshll.u32 %v1696_v31, 16  ;;  %s10440_s23 = sshll.u32 %s10501_s17, 4  ;;  %s10441_s23 = int_to_ptr.vmem [resolvable:$false] %s10440_s23 }
  0x6e   : > { %345 = vst [vmem:[#allocation2 + $0x74] sm:$0x1] %v344_v43  ;;  %856 = vst [vmem:[#allocation2 + $0x80] sm:$0x1] %v855_v14  ;;  %v1784_v43 = vshll.u32 %v11068_v36, 16  ;;  %v1788_v44 = vshrl.u32 %v11068_v36, 16  ;;  %p10443_p0 = scmp.lt.s32.totalorder %s12994_s11, %s10441_s23 }
  0x6f   : > { %v1699_v45 = vld [vmem:[#allocation2 + $0x18] sm:$0xf]  ;;  %v1702_v50 = vld [vmem:[#allocation2 + $0x24] sm:$0xf]  ;;  %v1780_v53 = vrot.slane %v1778_v39, 5  ;;  %vm3035_vm14 = vcmask 1046532  }
  0x70   : > { %v11087_v14 = vrot.slane %v1784_v43, 5  ;;  %vm1747_vm10 = vsmask.f32 3328  ;;  %vm1748_vm11 = vsmask.f32 7440  ;;  %vm11509_vm15 = vmor %vm3034_vm13, %vm3035_vm14  ;;  %s10442_s25 = scalar_lea.vmem %s10441_s23, 8192 }
  0x71   : > { %v882_v21 = vld [vmem:[#allocation2 + $0xb0] sm:$0x1]  ;;  %vm11109_vm12 = vmor %vm1747_vm10, %vm1748_vm11  ;;  %p10444_p1 = scmp.lt.s32.totalorder %s10442_s25, %s10436_s16 }
  0x72   : > { %v883_v30 = vsel %vm10600_vm2, %v702_v18, %v882_v21  ;;  %v889_v22 = vld [vmem:[#allocation2 + $0xbc] sm:$0x1] }
  0x73   : > { %884 = vst [vmem:[#allocation2 + $0xb0] sm:$0x1] %v883_v30  ;;  %v890_v26 = vsel %vm10600_vm2, %v719_v20, %v889_v22  ;;  %p10445_p2 = por %p10444_p1, %p10443_p0 }
  0x74   : > { %9071 = vmatmul.mubr.msk.bf16.vlgmr.msra.gmra.mrb[0].mxu0 %vm1056_vm9, %v10688_v29  ;;  %v532_v29 = vrot.slane %v10686_v24, 4  ;;  %v10953_v24 = vld [vmem:[%s13047_s1 + $0x20] sm:$0xff]   ;;  %891 = vst [vmem:[#allocation2 + $0xbc] sm:$0x1] %v890_v26 }
  0x75   : > { %9103 = vmatpush3.bf16.msra.mxu0 %v10793_v40  ;;  %9074 = vmatprep.mubr.msk.bf16.mxu0 %vm1056_vm9, %v10710_v58  ;;  %v10324_v40 = vld [vmem:[%s13047_s1 + $0xd8] sm:$0xff]   ;;  %v847_v52 = vld [vmem:[#allocation2 + $0x74] sm:$0x1]  ;;  %v11113_v26 = vld [vmem:[#allocation2 + $0x20] sm:$0x1]  ;;  %p10446_p3 = pnand %p10445_p2, %p10439_p13 }
  0x76   : > { %9104 = vmatprep.subr.bf16.mxu0 %v10322_v48  ;;  %v813_v6 = vsel %vm10600_vm2, %v532_v29, %v812_v63  ;;  %v848_v11 = vsel %vm10600_vm2, %v617_v56, %v847_v52  ;;  %v11085_v52 = vld [vmem:[#allocation2 + $0x8] sm:$0x1] }
  0x77   : > { %814 = vst [vmem:[#allocation2 + $0x38] sm:$0x1] %v813_v6  ;;  %849 = vst [vmem:[#allocation2 + $0x74] sm:$0x1] %v848_v11  ;;  %v685_v6 = vrot.slane %v10851_v3, 4  ;;  %v1777_v11 = vrot.slane %v1775_v1, 4 }
  0x78   : > { %v1770_v5 = vshll.u32 %v11085_v52, 16  ;;  %v11124_v1 = vld [vmem:[#allocation2 + $0x2c] sm:$0x1] }
  0x79   : > { %9105 = vmatpush3.bf16.msra.mxu0 %v10322_v48  ;;  %v350_v48 = vsel %vm10610_vm5, 0, %v349_v49  ;;  %v876_v3 = vsel %vm10600_vm2, %v685_v6, %v875_v8  ;;  %v11082_v49 = vld [vmem:[#allocation2 + $0x1c] sm:$0xf]  ;;  %v1781_v6 = vor.u32 %v1780_v53, %v1777_v11 }
  0x7a   : > { %9106 = vmatprep.subr.bf16.mxu0 %v10323_v59  ;;  %351 = vst [vmem:[#allocation2 + $0x8c] sm:$0x1] %v350_v48  ;;  %877 = vst [vmem:[#allocation2 + $0xa4] sm:$0x1] %v876_v3  ;;  %v1808_v60 = vshll.u32 %v11082_v49, 16  ;;  %v1772_v22 = vrot.slane %v1770_v5, 5 }
  0x7b   : > { %v11103_v3 = vld [vmem:[#allocation2 + $0x28] sm:$0xf] }
  0x7c   : > { %9075 = vmatmul.mubr.msk.bf16.gmra.mrb[4].mxu0 %vm1056_vm9, %v10724_v13  ;;  %v11105_v18 = vrot.slane %v1808_v60, 5 }
  0x7d   : > { %9078 = vmatprep.mubr.msk.bf16.mxu0 %vm1056_vm9, %v10743_v32  ;;  %9107 = vmatpush3.bf16.msra.mxu0 %v10323_v59  ;;  %v353_v59 = vsel %vm10610_vm5, 0, %v352_v46  ;;  %v1799_v46 = vshrl.u32 %v1699_v45, 16 }
  0x7e   : > { %9108 = vmatprep.subr.bf16.mxu0 %v10324_v40  ;;  %354 = vst [vmem:[#allocation2 + $0x98] sm:$0x1] %v353_v59  ;;  %v11089_v59 = vld [vmem:[#allocation2 + $0x14] sm:$0x1] }
  0x7f   : > { %v1794_v54 = vshll.u32 %v11089_v59, 16  ;;  %v1801_v8 = vrot.slane %v1799_v46, 4 }
  0x81   : > { %9109 = vmatpush3.bf16.msra.mxu0 %v10324_v40  ;;  %v861_v29 = vld [vmem:[#allocation2 + $0x8c] sm:$0x1]  ;;  %v1796_v31 = vrot.slane %v1794_v54, 5 }
  0x82   : > { %9142 = vmatprep.subr.bf16.mxu0 %v10953_v24  ;;  %v862_v40 = vsel %vm10600_vm2, %v651_v55, %v861_v29  ;;  %v1802_v55 = vshll.u32 %v1699_v45, 16  ;;  %v1812_v29 = vshrl.u32 %v11082_v49, 16 }
  0x83   : > { %863 = vst [vmem:[#allocation2 + $0x8c] sm:$0x1] %v862_v40  ;;  %v1823_v40 = vshrl.u32 %v1702_v50, 16 }
  0x84   : > { %9079 = vmatmul.mubr.msk.bf16.gmra.mrb[8].mxu0 %vm1056_vm9, %v10762_v62  ;;  %v1804_v16 = vrot.slane %v1802_v55, 5 }
  0x85   : > { %9082 = vmatprep.mubr.msk.bf16.mxu0 %vm1056_vm9, %v10778_v19  ;;  %v868_v63 = vld [vmem:[#allocation2 + $0x98] sm:$0x1]  ;;  %v1825_v20 = vrot.slane %v1823_v40, 4 }
  0x86   : > { %v869_v7 = vsel %vm10600_vm2, %v668_v61, %v868_v63  ;;  %v1826_v61 = vshll.u32 %v1702_v50, 16 }
  0x87   : > { %870 = vst [vmem:[#allocation2 + $0x98] sm:$0x1] %v869_v7 }
  0x88   : > { %v1828_v21 = vrot.slane %v1826_v61, 5 }
  0x8c   : > { %9083 = vmatmul.mubr.msk.bf16.gmra.mrb[12].mxu0 %vm1056_vm9, %v10806_v51 }
  0x8d   : > { %9086 = vmatprep.mubr.msk.bf16.mxu0 %vm1056_vm9, %v10817_v10 }
  0x94   : > { %9087 = vmatmul.mubr.msk.bf16.gmra.mrb[16].mxu0 %vm1056_vm9, %v10830_v35 }
  0x95   : > { %9090 = vmatprep.mubr.msk.bf16.mxu0 %vm1056_vm9, %v10855_v12 }
  0x9c   : > { %9091 = vmatmul.mubr.msk.bf16.gmra.mrb[20].mxu0 %vm1056_vm9, %v10862_v33 }
  0x9d   : > { %9094 = vmatprep.mubr.msk.bf16.mxu0 %vm1056_vm9, %v10881_v0 }
  0xa4   : > { %9095 = vmatmul.mubr.msk.bf16.gmra.mrb[24].mxu0 %vm1056_vm9, %v10888_v17 }
  0xa5   : > { %9098 = vmatprep.mubr.msk.bf16.mxu0 %vm1056_vm9, %v10902_v28 }
  0xac   : > { %9099 = vmatmul.mubr.msk.bf16.gmra.mrb[28].mxu0 %vm1056_vm9, %v10907_v38 }
  0xad   : > { %9110 = vmatprep.mubr.msk.bf16.mxu0 %vm1056_vm9, %v10710_v58  ;;  %v10327_v58 = vld [vmem:[%s13047_s1 + $0x30] sm:$0xff]  }
  0xb4   : > { %9111 = vmatmul.mubr.msk.bf16.vlgmr.msra.gmra.mrb[0].mxu0 %vm1056_vm9, %v10724_v13  ;;  %v11055_v13 = vld [vmem:[%s13047_s1 + $0x80] sm:$0xff]  }
  0xb5   : > { %9143 = vmatpush3.bf16.msra.mxu0 %v10953_v24  ;;  %9114 = vmatprep.mubr.msk.bf16.mxu0 %vm1056_vm9, %v10743_v32  ;;  %v1693_v32 = vld [vmem:[#allocation2] sm:$0xf] }
  0xb6   : > { %9144 = vmatprep.subr.bf16.mxu0 %v10326_v23  ;;  %v1754_v24 = vshll.u32 %v1693_v32, 16 }
  0xb9   : > { %9145 = vmatpush3.bf16.msra.mxu0 %v10326_v23  ;;  %v1832_v23 = vshll.u32 %v11103_v3, 16 }
  0xba   : > { %9146 = vmatprep.subr.bf16.mxu0 %v10327_v58 }
  0xbc   : > { %9115 = vmatmul.mubr.msk.bf16.gmra.mrb[4].mxu0 %vm1056_vm9, %v10762_v62  ;;  %v11066_v62 = vld [vmem:[#allocation2 + $0x4] sm:$0xf] }
  0xbd   : > { %9118 = vmatprep.mubr.msk.bf16.mxu0 %vm1056_vm9, %v10778_v19  ;;  %9147 = vmatpush3.bf16.msra.mxu0 %v10327_v58  ;;  %v1751_v19 = vshrl.u32 %v1693_v32, 16  ;;  %v1764_v41 = vshrl.u32 %v11066_v62, 16  ;;  %v1836_v58 = vshrl.u32 %v11103_v3, 16  ;;  %v11117_v32 = vld [vmem:[#allocation2 + $0x34] sm:$0xf] }
  0xbe   : > { %9148 = vmatprep.subr.bf16.mxu0 %v10328_v57  ;;  %v1860_v45 = vshrl.u32 %v11117_v32, 16 }
  0xbf   : > { %v1766_v56 = vrot.slane %v1764_v41, 4  ;;  %v1838_v50 = vrot.slane %v1836_v58, 4 }
  0xc0   : > { %v1862_v5 = vrot.slane %v1860_v45, 4 }
  0xc1   : > { %9149 = vmatpush3.bf16.msra.mxu0 %v10328_v57  ;;  %v1705_v57 = vld [vmem:[#allocation2 + $0x30] sm:$0xf] }
  0xc2   : > { %9182 = vmatprep.subr.bf16.mxu0 %v11055_v13  ;;  %v1847_v39 = vshrl.u32 %v1705_v57, 16  ;;  %v1850_v43 = vshll.u32 %v1705_v57, 16 }
  0xc4   : > { %9119 = vmatmul.mubr.msk.bf16.gmra.mrb[8].mxu0 %vm1056_vm9, %v10806_v51  ;;  %v1760_v51 = vshll.u32 %v11066_v62, 16  ;;  %v1849_v40 = vrot.slane %v1847_v39, 4  ;;  %v1852_v61 = vrot.slane %v1850_v43, 5  ;;  %v1717_v39 = vld [vmem:[#allocation2 + $0x60] sm:$0xf] }
  0xc5   : > { %9122 = vmatprep.mubr.msk.bf16.mxu0 %vm1056_vm9, %v10817_v10  ;;  %v365_v10 = vsel %vm10610_vm5, 0, %v364_v37  ;;  %v1805_v37 = vor.u32 %v1804_v16, %v1801_v8 }
  0xc6   : > { %366 = vst [vmem:[#allocation2 + $0xc8] sm:$0x1] %v365_v10  ;;  %v11080_v47 = vrot.slane %v1760_v51, 5  ;;  %v1708_v51 = vld [vmem:[#allocation2 + $0x3c] sm:$0xf]  ;;  %v1853_v58 = vor.u32 %v1852_v61, %v1849_v40 }
  0xcc   : > { %9123 = vmatmul.mubr.msk.bf16.gmra.mrb[12].mxu0 %vm1056_vm9, %v10830_v35  ;;  %v1753_v35 = vrot.slane %v1751_v19, 4  ;;  %v1782_v19 = vrot.slane %v1781_v6, 4 }
  0xcd   : > { %9126 = vmatprep.mubr.msk.bf16.mxu0 %vm1056_vm9, %v10855_v12  ;;  %v1756_v12 = vrot.slane %v1754_v24, 5  ;;  %v896_v63 = vld [vmem:[#allocation2 + $0xc8] sm:$0x1] }
  0xce   : > { %v1787_v11 = vsel %vm11109_vm12, %v1782_v19, %v11087_v14  ;;  %v1714_v19 = vld [vmem:[#allocation2 + $0x54] sm:$0xf] }
  0xcf   : > { %v1757_v48 = vor.u32 %v1756_v12, %v1753_v35  ;;  %v1818_v35 = vshll.u32 %v11113_v26, 16  ;;  %v1829_v12 = vor.u32 %v1828_v21, %v1825_v20  ;;  %v11156_v20 = vld [vmem:[#allocation2 + $0x4c] sm:$0xf]  ;;  %v1919_v45 = vshrl.u32 %v1714_v19, 16 }
  0xd1   : > { %v1758_v2 = vrot.slane %v1757_v48, 4  ;;  %v1820_v55 = vrot.slane %v1818_v35, 5  ;;  %v11143_v60 = vrot.slane %v1829_v12, 4  ;;  %v1904_v35 = vshll.u32 %v11156_v20, 16 }
  0xd2   : > { %v1908_v12 = vshrl.u32 %v11156_v20, 16 }
  0xd3   : > { %v1763_v41 = vsel %vm11109_vm12, %v1758_v2, %v11080_v47  ;;  %v11189_v40 = vrot.slane %v1904_v35, 5 }
  0xd4   : > { %9127 = vmatmul.mubr.msk.bf16.gmra.mrb[16].mxu0 %vm1056_vm9, %v10862_v33  ;;  %v736_v33 = vrot.slane %v10886_v15, 4  ;;  %v1767_v15 = vor.u32 %v1766_v56, %v11080_v47  ;;  %v11130_v56 = vrot.slane %v1832_v23, 5  ;;  %v1871_v47 = vshrl.u32 %v1708_v51, 16  ;;  %v11160_v23 = vld [vmem:[#allocation2 + $0x38] sm:$0x1] }
  0xd5   : > { %9130 = vmatprep.mubr.msk.bf16.mxu0 %vm1056_vm9, %v10881_v0  ;;  %v1790_v0 = vrot.slane %v1788_v44, 4  ;;  %v1856_v44 = vshll.u32 %v11117_v32, 16  ;;  %v1866_v43 = vshll.u32 %v11160_v23, 16  ;;  %v1910_v61 = vrot.slane %v1908_v12, 4 }
  0xd6   : > { %v897_v7 = vsel %vm10600_vm2, %v736_v33, %v896_v63  ;;  %v1874_v33 = vshll.u32 %v1708_v51, 16  ;;  %v10329_v63 = vld [vmem:[#allocation2 + $0xcc] sm:$0xff]   ;;  %v1873_v2 = vrot.slane %v1871_v47, 4  ;;  %v11170_v51 = vld [vmem:[#allocation2 + $0x58] sm:$0xf] }
  0xd7   : > { %v1791_v25 = vor.u32 %v1790_v0, %v11087_v14  ;;  %898 = vst [vmem:[#allocation2 + $0xc8] sm:$0x1] %v897_v7  ;;  %v1806_v0 = vrot.slane %v1805_v37, 4  ;;  %v1839_v14 = vor.u32 %v1838_v50, %v11130_v56  ;;  %v1854_v50 = vrot.slane %v1853_v58, 4 }
  0xd8   : > { %v1876_v6 = vrot.slane %v1874_v33, 5  ;;  %v1928_v33 = vshll.u32 %v11170_v51, 16 }
  0xd9   : > { %v1792_v24 = vrot.slane %v1791_v25, 4 }
  0xdb   : > { %v1797_v53 = vsel %vm11109_vm12, %v1792_v24, %v1796_v31  ;;  %v1840_v24 = vrot.slane %v1839_v14, 4  ;;  %v1877_v31 = vor.u32 %v1876_v6, %v1873_v2  ;;  %v1921_v2 = vrot.slane %v1919_v45, 4 }
  0xdc   : > { %9131 = vmatmul.mubr.msk.bf16.gmra.mrb[20].mxu0 %vm1056_vm9, %v10888_v17  ;;  %v1814_v17 = vrot.slane %v1812_v29, 4  ;;  %v1842_v29 = vshll.u32 %v11124_v1, 16  ;;  %v11151_v16 = vcombine.low %v1787_v11, %v1797_v53 }
  0xdd   : > { %9134 = vmatprep.mubr.msk.bf16.mxu0 %vm1056_vm9, %v10902_v28  ;;  %v1768_v28 = vrot.slane %v1767_v15, 4  ;;  %v11146_v15 = vrot.slane %v1856_v44, 5 }
  0xde   : > { %v1815_v10 = vor.u32 %v1814_v17, %v11105_v18  ;;  %v1811_v17 = vsel %vm11109_vm12, %v1806_v0, %v11105_v18  ;;  %v1835_v18 = vsel %vm11109_vm12, %v11143_v60, %v11130_v56  ;;  %v1922_v56 = vshll.u32 %v1714_v19, 16  ;;  %v11182_v0 = vld [vmem:[#allocation2 + $0x44] sm:$0x1] }
  0xdf   : > { %v1773_v48 = vsel %vm11109_vm12, %v1768_v28, %v1772_v22  ;;  %v1844_v22 = vrot.slane %v1842_v29, 5  ;;  %v1863_v57 = vor.u32 %v1862_v5, %v11146_v15  ;;  %v1946_v60 = vshll.u32 %v1717_v39, 16 }
  0xe0   : > { %v1816_v46 = vrot.slane %v1815_v10, 4  ;;  %v8027_v25 = vcombine.low %v1763_v41, %v1773_v48  ;;  %v1932_v48 = vshrl.u32 %v11170_v51, 16  ;;  %v11186_v29 = vrot.slane %v1877_v31, 4 }
  0xe1   : > { %v1864_v47 = vrot.slane %v1863_v57, 4  ;;  %v1845_v53 = vsel %vm11109_vm12, %v1840_v24, %v1844_v22  ;;  %v1868_v5 = vrot.slane %v1866_v43, 5  ;;  %v1924_v6 = vrot.slane %v1922_v56, 5  ;;  %v1720_v57 = vld [vmem:[#allocation2 + $0x6c] sm:$0xf] }
  0xe2   : > { %v1821_v28 = vsel %vm11109_vm12, %v1816_v46, %v1820_v55  ;;  %v11184_v46 = vld [vmem:[#allocation2 + $0x64] sm:$0xf]  ;;  %v1943_v55 = vshrl.u32 %v1717_v39, 16  ;;  %v1948_v22 = vrot.slane %v1946_v60, 5  ;;  %v1859_v19 = vsel %vm11109_vm12, %v1854_v50, %v11146_v15  ;;  %v10332_v15 = vld [vmem:[%s13047_s1 + $0x90] sm:$0xff]  }
  0xe3   : > { %v11178_v11 = vcombine.low %v1811_v17, %v1821_v28  ;;  %v1952_v17 = vshll.u32 %v11184_v46, 16  ;;  %v1956_v58 = vshrl.u32 %v11184_v46, 16  ;;  %v1911_v31 = vor.u32 %v1910_v61, %v11189_v40  ;;  %v1723_v39 = vld [vmem:[#allocation2 + $0x78] sm:$0xf] }
  0xe4   : > { %9135 = vmatmul.mubr.msk.bf16.gmra.mrb[24].mxu0 %vm1056_vm9, %v10907_v38  ;;  %v11141_v38 = vld [vmem:[#allocation2 + $0x40] sm:$0xf]  ;;  %v1945_v28 = vrot.slane %v1943_v55, 4  ;;  %v1925_v12 = vor.u32 %v1924_v6, %v1921_v2  ;;  %v1967_v56 = vshrl.u32 %v1720_v57, 16  ;;  %v1994_v2 = vshll.u32 %v1723_v39, 16  ;;  %v10333_v6 = vld [vmem:[%s13047_s1 + $0x98] sm:$0xff]  }
  0xe5   : > { %9138 = vmatprep.mubr.msk.bf16.mxu0 %vm1056_vm9, %v10915_v42  ;;  %v1711_v42 = vld [vmem:[#allocation2 + $0x48] sm:$0xf]  ;;  %v1880_v7 = vshll.u32 %v11141_v38, 16  ;;  %v1884_v54 = vshrl.u32 %v11141_v38, 16  ;;  %v11227_v45 = vrot.slane %v1952_v17, 5  ;;  %v1912_v55 = vrot.slane %v1911_v31, 4 }
  0xe6   : > { %v1895_v8 = vshrl.u32 %v1711_v42, 16  ;;  %v1898_v21 = vshll.u32 %v1711_v42, 16  ;;  %v1949_v50 = vor.u32 %v1948_v22, %v1945_v28  ;;  %v11244_v17 = vld [vmem:[#allocation2 + $0x68] sm:$0x1]  ;;  %v1969_v28 = vrot.slane %v1967_v56, 4 }
  0xe7   : > { %v11168_v37 = vrot.slane %v1880_v7, 5  ;;  %v1886_v41 = vrot.slane %v1884_v54, 4  ;;  %v1890_v7 = vshll.u32 %v11182_v0, 16  ;;  %v11197_v54 = vrot.slane %v1928_v33, 5  ;;  %13112 = vst [vmem:[#allocation13_spill] sm:$0xff] %v11244_v17 }
  0xe8   : > { %v1897_v10 = vrot.slane %v1895_v8, 4  ;;  %v1900_v44 = vrot.slane %v1898_v21, 5  ;;  %v1934_v8 = vrot.slane %v1932_v48, 4  ;;  %v11202_v21 = vcombine.low %v1835_v18, %v1845_v53 }
  0xe9   : > { %v1887_v42 = vor.u32 %v1886_v41, %v11168_v37  ;;  %v1883_v18 = vsel %vm11109_vm12, %v11186_v29, %v11168_v37  ;;  %v11216_v41 = vld [vmem:[#allocation2 + $0x70] sm:$0xf]  ;;  %v1892_v43 = vrot.slane %v1890_v7, 5  ;;  %v11224_v37 = vld [vmem:[#allocation2 + $0x5c] sm:$0x1]  ;;  %v1970_v33 = vshll.u32 %v1720_v57, 16 }
  0xea   : > { %v1901_v14 = vor.u32 %v1900_v44, %v1897_v10  ;;  %13110 = vst [vmem:[#allocation11_spill] sm:$0xff] %v11216_v41  ;;  %v1935_v44 = vor.u32 %v1934_v8, %v11197_v54  ;;  %v1976_v48 = vshll.u32 %v11216_v41, 16  ;;  %v1980_v60 = vshrl.u32 %v11216_v41, 16 }
  0xeb   : > { %v1888_v24 = vrot.slane %v1887_v42, 4  ;;  %v1991_v29 = vshrl.u32 %v1723_v39, 16  ;;  %v1926_v7 = vrot.slane %v1925_v12, 4  ;;  %v1962_v12 = vshll.u32 %v11244_v17, 16  ;;  %v11347_v17 = vld [vmem:[#allocation2 + $0xa4] sm:$0x1] }
  0xec   : > { %9139 = vmatmul.mubr.msk.bf16.gmra.mrb[28].mxu0 %vm1056_vm9, %v10329_v63  ;;  %v10331_v63 = vld [vmem:[%s13047_s1 + $0x88] sm:$0xff]   ;;  %v1902_v10 = vrot.slane %v1901_v14, 4  ;;  %v11237_v14 = vld [vmem:[#allocation2 + $0x7c] sm:$0xf]  ;;  %v1936_v8 = vrot.slane %v1935_v44, 4  ;;  %v11251_v57 = vrot.slane %v1976_v48, 5 }
  0xed   : > { %9150 = vmatprep.mubr.msk.bf16.mxu0 %vm1056_vm9, %v8027_v25  ;;  %v11195_v25 = vld [vmem:[#allocation2 + $0x50] sm:$0x1]  ;;  %13111 = vst [vmem:[#allocation12_spill] sm:$0xff] %v11237_v14  ;;  %v2000_v31 = vshll.u32 %v11237_v14, 16  ;;  %v1996_v39 = vrot.slane %v1994_v2, 5  ;;  %13122 = vst [vmem:[#allocation23_spill] sm:$0xff] %v11347_v17 }
  0xee   : > { %v1914_v35 = vshll.u32 %v11195_v25, 16  ;;  %v1907_v42 = vsel %vm11109_vm12, %v1902_v10, %v11189_v40  ;;  %v11248_v40 = vrot.slane %v1949_v50, 4  ;;  %v11284_v2 = vld [vmem:[#allocation2 + $0x74] sm:$0x1] }
  0xef   : > { %13115 = vst [vmem:[#allocation16_spill] sm:$0xff] %v11284_v2 }
  0xf0   : > { %v1916_v61 = vrot.slane %v1914_v35, 5 }
  0xf2   : > { %v1917_v10 = vsel %vm11109_vm12, %v1912_v55, %v1916_v61  ;;  %v1955_v55 = vsel %vm11109_vm12, %v11248_v40, %v11227_v45  ;;  %v11280_v61 = vld [vmem:[#allocation2 + $0x94] sm:$0xf] }
  0xf3   : > { %v11272_v48 = vcombine.low %v1907_v42, %v1917_v10  ;;  %13114 = vst [vmem:[#allocation15_spill] sm:$0xff] %v11280_v61 }
  0xf4   : > { %9151 = vmatmul.mubr.msk.bf16.vlgmr.msra.gmra.mrb[0].mxu0 %vm1056_vm9, %v11151_v16 }
  0xf5   : > { %9183 = vmatpush3.bf16.msra.mxu0 %v11055_v13  ;;  %9154 = vmatprep.mubr.msk.bf16.mxu0 %vm1056_vm9, %v11178_v11  ;;  %v1869_v13 = vsel %vm11109_vm12, %v1864_v47, %v1868_v5  ;;  %v1958_v47 = vrot.slane %v1956_v58, 4  ;;  %v1938_v5 = vshll.u32 %v11224_v37, 16  ;;  %v1972_v58 = vrot.slane %v1970_v33, 5  ;;  %v11270_v33 = vld [vmem:[#allocation2 + $0x88] sm:$0xf] }
  0xf6   : > { %9184 = vmatprep.subr.bf16.mxu0 %v10331_v63  ;;  %v11230_v53 = vcombine.low %v1859_v19, %v1869_v13  ;;  %v1982_v19 = vrot.slane %v1980_v60, 4  ;;  %v2004_v13 = vshrl.u32 %v11237_v14, 16  ;;  %13113 = vst [vmem:[#allocation14_spill] sm:$0xff] %v11270_v33  ;;  %v11278_v60 = vrot.slane %v2000_v31, 5  ;;  %v11311_v14 = vld [vmem:[#allocation2 + $0xa0] sm:$0xf] }
  0xf7   : > { %v1959_v22 = vor.u32 %v1958_v47, %v11227_v45  ;;  %v1940_v35 = vrot.slane %v1938_v5, 5  ;;  %v1973_v50 = vor.u32 %v1972_v58, %v1969_v28  ;;  %v1726_v47 = vld [vmem:[#allocation2 + $0x84] sm:$0xf]  ;;  %v1964_v5 = vrot.slane %v1962_v12, 5  ;;  %13117 = vst [vmem:[#allocation18_spill] sm:$0xff] %v11311_v14 }
  0xf8   : > { %v1983_v42 = vor.u32 %v1982_v19, %v11251_v57  ;;  %v2015_v45 = vshrl.u32 %v1726_v47, 16  ;;  %v2018_v28 = vshll.u32 %v1726_v47, 16  ;;  %v2024_v40 = vshll.u32 %v11270_v33, 16 }
  0xf9   : > { %9185 = vmatpush3.bf16.msra.mxu0 %v10331_v63  ;;  %v1893_v63 = vsel %vm11109_vm12, %v1888_v24, %v1892_v43  ;;  %v1993_v24 = vrot.slane %v1991_v29, 4  ;;  %v11263_v43 = vld [vmem:[%s13047_s1 + $0xe0] sm:$0xff]   ;;  %v1960_v56 = vrot.slane %v1959_v22, 4  ;;  %v1729_v29 = vld [vmem:[#allocation2 + $0x90] sm:$0xf]  ;;  %v2028_v22 = vshrl.u32 %v11270_v33, 16 }
  0xfa   : > { %9186 = vmatprep.subr.bf16.mxu0 %v10332_v15  ;;  %v11265_v44 = vcombine.low %v1883_v18, %v1893_v63  ;;  %v2006_v18 = vrot.slane %v2004_v13, 4  ;;  %v11287_v63 = vld [vmem:[#allocation2 + $0x80] sm:$0x1]  ;;  %v2048_v58 = vshll.u32 %v11280_v61, 16  ;;  %v2052_v19 = vshrl.u32 %v11280_v61, 16 }
  0xfb   : > { %13116 = vst [vmem:[#allocation17_spill] sm:$0xff] %v11287_v63  ;;  %v1986_v31 = vshll.u32 %v11284_v2, 16  ;;  %v2010_v10 = vshll.u32 %v11287_v63, 16  ;;  %v1965_v12 = vsel %vm11109_vm12, %v1960_v56, %v1964_v5  ;;  %v2020_v27 = vrot.slane %v2018_v28, 5  ;;  %v11322_v28 = vld [vmem:[#allocation2 + $0x98] sm:$0x1] }
  0xfc   : > { %9155 = vmatmul.mubr.msk.bf16.gmra.mrb[4].mxu0 %vm1056_vm9, %v11202_v21  ;;  %v2007_v13 = vor.u32 %v2006_v18, %v11278_v60  ;;  %v11305_v34 = vrot.slane %v2024_v40, 5  ;;  %v2030_v9 = vrot.slane %v2028_v22, 4  ;;  %v11307_v61 = vrot.slane %v2048_v58, 5  ;;  %v1732_v18 = vld [vmem:[#allocation2 + $0x9c] sm:$0xf]  ;;  %13119 = vst [vmem:[#allocation20_spill] sm:$0xff] %v11322_v28 }
  0xfd   : > { %9158 = vmatprep.mubr.msk.bf16.mxu0 %vm1056_vm9, %v11230_v53  ;;  %9187 = vmatpush3.bf16.msra.mxu0 %v10332_v15  ;;  %v1931_v15 = vsel %vm11109_vm12, %v1926_v7, %v11197_v54  ;;  %v1941_v54 = vsel %vm11109_vm12, %v1936_v8, %v1940_v35  ;;  %v1997_v7 = vor.u32 %v1996_v39, %v1993_v24  ;;  %v2042_v8 = vshll.u32 %v1729_v29, 16 }
  0xfe   : > { %9188 = vmatprep.subr.bf16.mxu0 %v10333_v6  ;;  %v1974_v24 = vrot.slane %v1973_v50, 4  ;;  %v11301_v35 = vcombine.low %v1931_v15, %v1941_v54  ;;  %v1984_v39 = vrot.slane %v1983_v42, 4  ;;  %v2054_v33 = vrot.slane %v2052_v19, 4  ;;  %v11319_v42 = vld [vmem:[#allocation2 + $0x8c] sm:$0x1] }
  0xff   : > { %v1998_v47 = vrot.slane %v1997_v7, 4  ;;  %v2044_v50 = vrot.slane %v2042_v8, 5  ;;  %v11309_v2 = vcombine.low %v1955_v55, %v1965_v12  ;;  %v1988_v15 = vrot.slane %v1986_v31, 5  ;;  %13118 = vst [vmem:[#allocation19_spill] sm:$0xff] %v11319_v42  ;;  %v1735_v7 = vld [vmem:[#allocation2 + $0xa8] sm:$0xf] }
 0x100   : > { %v2008_v54 = vrot.slane %v2007_v13, 4  ;;  %v2012_v63 = vrot.slane %v2010_v10, 5  ;;  %v1979_v56 = vsel %vm11109_vm12, %v1974_v24, %v11251_v57  ;;  %v2031_v55 = vor.u32 %v2030_v9, %v11305_v34 }
 0x101   : > { %9189 = vmatpush3.bf16.msra.mxu0 %v10333_v6  ;;  %v2039_v6 = vshrl.u32 %v1729_v29, 16  ;;  %v2017_v29 = vrot.slane %v2015_v45, 4  ;;  %v2003_v5 = vsel %vm11109_vm12, %v1998_v47, %v11278_v60  ;;  %v2063_v40 = vshrl.u32 %v1732_v18, 16 }
 0x102   : > { %9222 = vmatprep.subr.bf16.mxu0 %v11263_v43  ;;  %v2066_v22 = vshll.u32 %v1732_v18, 16  ;;  %v2055_v8 = vor.u32 %v2054_v33, %v11307_v61  ;;  %v2072_v60 = vshll.u32 %v11311_v14, 16  ;;  %v2076_v58 = vshrl.u32 %v11311_v14, 16 }
 0x103   : > { %v2041_v4 = vrot.slane %v2039_v6, 4  ;;  %v2021_v45 = vor.u32 %v2020_v27, %v2017_v29  ;;  %v11324_v6 = vld [vmem:[#allocation2 + $0xac] sm:$0xf]  ;;  %v1989_v9 = vsel %vm11109_vm12, %v1984_v39, %v1988_v15  ;;  %v2013_v27 = vsel %vm11109_vm12, %v2008_v54, %v2012_v63  ;;  %v1738_v63 = vld [vmem:[#allocation2 + $0xb4] sm:$0xf] }
 0x104   : > { %9159 = vmatmul.mubr.msk.bf16.gmra.mrb[8].mxu0 %vm1056_vm9, %v11265_v44  ;;  %13120 = vst [vmem:[#allocation21_spill] sm:$0xff] %v11324_v6  ;;  %v2034_v19 = vshll.u32 %v11319_v42, 16  ;;  %v2087_v24 = vshrl.u32 %v1735_v7, 16  ;;  %v2090_v31 = vshll.u32 %v1735_v7, 16  ;;  %v2096_v33 = vshll.u32 %v11324_v6, 16 }
 0x105   : > { %9162 = vmatprep.mubr.msk.bf16.mxu0 %vm1056_vm9, %v11272_v48  ;;  %v2045_v57 = vor.u32 %v2044_v50, %v2041_v4  ;;  %v2058_v4 = vshll.u32 %v11322_v28, 16  ;;  %v2100_v13 = vshrl.u32 %v11324_v6, 16  ;;  %v2022_v10 = vrot.slane %v2021_v45, 4  ;;  %v11345_v7 = vld [vmem:[#allocation2 + $0xb8] sm:$0xf] }
 0x106   : > { %v2032_v12 = vrot.slane %v2031_v55, 4  ;;  %v2065_v47 = vrot.slane %v2063_v40, 4  ;;  %v2068_v29 = vrot.slane %v2066_v22, 5  ;;  %v11341_v50 = vcombine.low %v1979_v56, %v1989_v9  ;;  %13121 = vst [vmem:[#allocation22_spill] sm:$0xff] %v11345_v7  ;;  %v11373_v6 = vld [vmem:[#allocation2 + $0xbc] sm:$0x1] }
 0x107   : > { %v2046_v39 = vrot.slane %v2045_v57, 4  ;;  %v2074_v18 = vrot.slane %v2072_v60, 5  ;;  %v2078_v15 = vrot.slane %v2076_v58, 4  ;;  %v11343_v54 = vcombine.low %v2003_v5, %v2013_v27  ;;  %v11352_v57 = vld [vmem:[#allocation2 + $0xb0] sm:$0x1] }
 0x108   : > { %v2036_v14 = vrot.slane %v2034_v19, 5  ;;  %v2056_v42 = vrot.slane %v2055_v8, 4  ;;  %v2089_v28 = vrot.slane %v2087_v24, 4  ;;  %v2060_v41 = vrot.slane %v2058_v4, 5 }
 0x109   : > { %v2092_v45 = vrot.slane %v2090_v31, 5  ;;  %v2098_v55 = vrot.slane %v2096_v33, 5  ;;  %v2102_v40 = vrot.slane %v2100_v13, 4  ;;  %v2027_v56 = vsel %vm11109_vm12, %v2022_v10, %v11305_v34 }
 0x10a   : > { %v2069_v22 = vor.u32 %v2068_v29, %v2065_v47  ;;  %v2051_v5 = vsel %vm11109_vm12, %v2046_v39, %v11307_v61  ;;  %v2079_v8 = vor.u32 %v2078_v15, %v2074_v18  ;;  %v2111_v60 = vshrl.u32 %v1738_v63, 16 }
 0x10b   : > { %v2114_v58 = vshll.u32 %v1738_v63, 16  ;;  %v2037_v9 = vsel %vm11109_vm12, %v2032_v12, %v2036_v14  ;;  %v2082_v34 = vshll.u32 %v11347_v17, 16  ;;  %v2120_v27 = vshll.u32 %v11345_v7, 16 }
 0x10c   : > { %9163 = vmatmul.mubr.msk.bf16.gmra.mrb[12].mxu0 %vm1056_vm9, %v11301_v35  ;;  %v2124_v19 = vshrl.u32 %v11345_v7, 16  ;;  %v2061_v24 = vsel %vm11109_vm12, %v2056_v42, %v2060_v41  ;;  %v2093_v4 = vor.u32 %v2092_v45, %v2089_v28  ;;  %v2103_v61 = vor.u32 %v2102_v40, %v2098_v55 }
 0x10d   : > { %9166 = vmatprep.mubr.msk.bf16.mxu0 %vm1056_vm9, %v11309_v2  ;;  %v2106_v31 = vshll.u32 %v11352_v57, 16  ;;  %v2070_v33 = vrot.slane %v2069_v22, 4  ;;  %v11369_v13 = vcombine.low %v2027_v56, %v2037_v9  ;;  %v2080_v10 = vrot.slane %v2079_v8, 4 }
 0x10e   : > { %v2113_v47 = vrot.slane %v2111_v60, 4  ;;  %v2116_v29 = vrot.slane %v2114_v58, 5  ;;  %v11371_v14 = vcombine.low %v2051_v5, %v2061_v24  ;;  %v2084_v12 = vrot.slane %v2082_v34, 5  ;;  %v10336_v34 = vld [vmem:[%s13047_s1 + $0xf0] sm:$0xff]  }
 0x10f   : > { %v2122_v39 = vrot.slane %v2120_v27, 5  ;;  %v2126_v15 = vrot.slane %v2124_v19, 4  ;;  %v2094_v63 = vrot.slane %v2093_v4, 4  ;;  %v2104_v7 = vrot.slane %v2103_v61, 4  ;;  %v1741_v27 = vld [vmem:[#allocation2 + $0xc0] sm:$0xf] }
 0x110   : > { %v2108_v17 = vrot.slane %v2106_v31, 5  ;;  %v2075_v41 = vsel %vm11109_vm12, %v2070_v33, %v2074_v18  ;;  %v2085_v42 = vsel %vm11109_vm12, %v2080_v10, %v2084_v12  ;;  %v2117_v28 = vor.u32 %v2116_v29, %v2113_v47  ;;  %v11435_v19 = vld [vmem:[#allocation2 + $0xc4] sm:$0xf]  ;;  %v11443_v12 = vld [vmem:[#allocation2 + $0xc8] sm:$0x1] }
 0x111   : > { %v2127_v45 = vor.u32 %v2126_v15, %v2122_v39  ;;  %v2130_v40 = vshll.u32 %v11373_v6, 16  ;;  %v2099_v56 = vsel %vm11109_vm12, %v2094_v63, %v2098_v55  ;;  %v11388_v5 = vcombine.low %v2075_v41, %v2085_v42 }
 0x112   : > { %v2109_v22 = vsel %vm11109_vm12, %v2104_v7, %v2108_v17  ;;  %v2118_v18 = vrot.slane %v2117_v28, 4  ;;  %v10335_v7 = vld [vmem:[%s13047_s1 + $0xe8] sm:$0xff]   ;;  %v2457_v24 = vshrl.u32 %v1741_v27, 16  ;;  %v2460_v4 = vshll.u32 %v1741_v27, 16 }
 0x113   : > { %v11390_v8 = vcombine.low %v2099_v56, %v2109_v22  ;;  %v2128_v60 = vrot.slane %v2127_v45, 4  ;;  %v2132_v58 = vrot.slane %v2130_v40, 5  ;;  %v2466_v61 = vshll.u32 %v11435_v19, 16  ;;  %v10339_v22 = vld [vmem:[%s13047_s1 + $0x48] sm:$0xff]  }
 0x114   : > { %9167 = vmatmul.mubr.msk.bf16.gmra.mrb[16].mxu0 %vm1056_vm9, %v11341_v50  ;;  %v2123_v9 = vsel %vm11109_vm12, %v2118_v18, %v2122_v39  ;;  %v2470_v31 = vshrl.u32 %v11435_v19, 16  ;;  %v2459_v33 = vrot.slane %v2457_v24, 4  ;;  %v2462_v10 = vrot.slane %v2460_v4, 5  ;;  %v10340_v18 = vld [vmem:[%s13047_s1 + $0x50] sm:$0xff]  }
 0x115   : > { %9170 = vmatprep.mubr.msk.bf16.mxu0 %vm1056_vm9, %v11343_v54  ;;  %v2133_v55 = vsel %vm11109_vm12, %v2128_v60, %v2132_v58  ;;  %v2468_v47 = vrot.slane %v2466_v61, 5  ;;  %v2476_v63 = vshll.u32 %v11443_v12, 16 }
 0x116   : > { %v11400_v17 = vcombine.low %v2123_v9, %v2133_v55  ;;  %v2472_v29 = vrot.slane %v2470_v31, 4  ;;  %v2463_v39 = vor.u32 %v2462_v10, %v2459_v33  ;;  %v3042_v31 = vrot.slane %v11085_v52, 5 }
 0x117   : > { %v2478_v28 = vrot.slane %v2476_v63, 5  ;;  %v3046_v33 = vrot.slane %v11068_v36, 5  ;;  %v3056_v36 = vrot.slane %v11113_v26, 5  ;;  %v3067_v26 = vrot.slane %v11117_v32, 5 }
 0x118   : > { %v2473_v15 = vor.u32 %v2472_v29, %v2468_v47  ;;  %v2464_v41 = vrot.slane %v2463_v39, 4  ;;  %v3053_v29 = vrot.slane %v11082_v49, 5 }
 0x11a   : > { %v2474_v42 = vrot.slane %v2473_v15, 4  ;;  %v2469_v45 = vsel %vm11109_vm12, %v2464_v41, %v2468_v47  ;;  %v2969_v47 = vld [vmem:[#allocation2 + $0xc] sm:$0xe]  ;;  %v3048_v41 = vrot.slane %v3046_v33, 4 }
 0x11b   : > { %v8122_v63 = vrot.slane %v2969_v47, 9  ;;  %v11593_v47 = vld [vmem:[%s13047_s1 + $0x100] sm:$0xff]  }
 0x11c   : > { %9171 = vmatmul.mubr.msk.bf16.gmra.mrb[20].mxu0 %vm1056_vm9, %v11369_v13  ;;  %v2479_v40 = vsel %vm11109_vm12, %v2474_v42, %v2478_v28  ;;  %v3049_v42 = vrot.slane %v11089_v59, 5 }
 0x11d   : > { %9174 = vmatprep.mubr.msk.bf16.mxu0 %vm1056_vm9, %v11371_v14  ;;  %v8071_v56 = vcombine.low %v2469_v45, %v2479_v40  ;;  %v3055_v45 = vrot.slane %v3053_v29, 4  ;;  %v3047_v40 = vsel %vm11509_vm15, %v8122_v63, %v3046_v33  ;;  %v3091_v63 = vrot.slane %v11224_v37, 5  ;;  %v13127_v37 = vld [vmem:[#allocation11_spill] sm:$0xff] }
 0x11e   : > { %v3050_v49 = vsel %vm11509_vm15, %v3048_v41, %v3049_v42 }
 0x11f   : > { %v3057_v59 = vsel %vm11509_vm15, %v3055_v45, %v3056_v36 }
 0x124   : > { %9175 = vmatmul.mubr.msk.bf16.gmra.mrb[24].mxu0 %vm1056_vm9, %v11388_v5 }
 0x125   : > { %9178 = vmatprep.mubr.msk.bf16.mxu0 %vm1056_vm9, %v11390_v8 }
 0x12c   : > { %9179 = vmatmul.mubr.msk.bf16.gmra.mrb[28].mxu0 %vm1056_vm9, %v11400_v17 }
 0x12d   : > { %9190 = vmatprep.mubr.msk.bf16.mxu0 %vm1056_vm9, %v11151_v16  ;;  %v10337_v16 = vld [vmem:[%s13047_s1 + $0xf8] sm:$0xff]  }
 0x134   : > { %9191 = vmatmul.mubr.msk.bf16.vlgmr.msra.gmra.mrb[0].mxu0 %vm1056_vm9, %v11178_v11 }
 0x135   : > { %9223 = vmatpush3.bf16.msra.mxu0 %v11263_v43  ;;  %9194 = vmatprep.mubr.msk.bf16.mxu0 %vm1056_vm9, %v11202_v21  ;;  %v10338_v43 = vld [vmem:[%s13047_s1 + $0x40] sm:$0xff]  }
 0x136   : > { %9224 = vmatprep.subr.bf16.mxu0 %v10335_v7 }
 0x139   : > { %9225 = vmatpush3.bf16.msra.mxu0 %v10335_v7 }
 0x13a   : > { %9226 = vmatprep.subr.bf16.mxu0 %v10336_v34 }
 0x13c   : > { %9195 = vmatmul.mubr.msk.bf16.gmra.mrb[4].mxu0 %vm1056_vm9, %v11230_v53 }
 0x13d   : > { %9198 = vmatprep.mubr.msk.bf16.mxu0 %vm1056_vm9, %v11265_v44  ;;  %9227 = vmatpush3.bf16.msra.mxu0 %v10336_v34  ;;  %v3039_v34 = vrot.slane %v11066_v62, 5 }
 0x13e   : > { %9228 = vmatprep.subr.bf16.mxu0 %v10337_v16 }
 0x13f   : > { %v3041_v61 = vrot.slane %v3039_v34, 4 }
 0x141   : > { %9229 = vmatpush3.bf16.msra.mxu0 %v10337_v16  ;;  %v2968_v16 = vld [vmem:[#allocation2] sm:$0xe]  ;;  %v3043_v10 = vsel %vm11509_vm15, %v3041_v61, %v3042_v31  ;;  %v3084_v31 = vrot.slane %v11195_v25, 5 }
 0x142   : > { %9262 = vmatprep.subr.bf16.mxu0 %v10338_v43  ;;  %v8121_v4 = vrot.slane %v2968_v16, 9 }
 0x144   : > { %9199 = vmatmul.mubr.msk.bf16.gmra.mrb[8].mxu0 %vm1056_vm9, %v11272_v48  ;;  %v3040_v52 = vsel %vm11509_vm15, %v8121_v4, %v3039_v34  ;;  %v2974_v34 = vld [vmem:[#allocation2 + $0x48] sm:$0xe] }
 0x145   : > { %9202 = vmatprep.mubr.msk.bf16.mxu0 %vm1056_vm9, %v11301_v35  ;;  %v8145_v15 = vcombine.low %v3040_v52, %v3043_v10  ;;  %v8127_v4 = vrot.slane %v2974_v34, 9  ;;  %v2975_v52 = vld [vmem:[#allocation2 + $0x54] sm:$0xe]  ;;  %v3095_v10 = vrot.slane %v11184_v46, 5  ;;  %v2979_v34 = vld [vmem:[#allocation2 + $0x84] sm:$0xe] }
 0x147   : > { %v3097_v42 = vrot.slane %v3095_v10, 4 }
 0x14c   : > { %9203 = vmatmul.mubr.msk.bf16.gmra.mrb[12].mxu0 %vm1056_vm9, %v11309_v2 }
 0x14d   : > { %9206 = vmatprep.mubr.msk.bf16.mxu0 %vm1056_vm9, %v11341_v50 }
 0x154   : > { %9207 = vmatmul.mubr.msk.bf16.gmra.mrb[16].mxu0 %vm1056_vm9, %v11343_v54 }
 0x155   : > { %9210 = vmatprep.mubr.msk.bf16.mxu0 %vm1056_vm9, %v11369_v13 }
 0x15c   : > { %9211 = vmatmul.mubr.msk.bf16.gmra.mrb[20].mxu0 %vm1056_vm9, %v11371_v14 }
 0x15d   : > { %9214 = vmatprep.mubr.msk.bf16.mxu0 %vm1056_vm9, %v11388_v5 }
 0x164   : > { %9215 = vmatmul.mubr.msk.bf16.gmra.mrb[24].mxu0 %vm1056_vm9, %v11390_v8 }
 0x165   : > { %9218 = vmatprep.mubr.msk.bf16.mxu0 %vm1056_vm9, %v11400_v17 }
 0x16c   : > { %9219 = vmatmul.mubr.msk.bf16.gmra.mrb[28].mxu0 %vm1056_vm9, %v8071_v56 }
 0x16d   : > { %9230 = vmatprep.mubr.msk.bf16.mxu0 %vm1056_vm9, %v11178_v11  ;;  %v10341_v11 = vld [vmem:[%s13047_s1 + $0x58] sm:$0xff]  }
 0x174   : > { %9231 = vmatmul.mubr.msk.bf16.vlgmr.msra.gmra.mrb[0].mxu0 %vm1056_vm9, %v11202_v21  ;;  %v11481_v21 = vld [vmem:[%s13047_s1 + $0xa0] sm:$0xff]  }
 0x175   : > { %9263 = vmatpush3.bf16.msra.mxu0 %v10338_v43  ;;  %9234 = vmatprep.mubr.msk.bf16.mxu0 %vm1056_vm9, %v11230_v53  ;;  %v1744_v53 = vld [vmem:[#allocation2 + $0xcc] sm:$0xf] }
 0x176   : > { %9264 = vmatprep.subr.bf16.mxu0 %v10339_v22 }
 0x179   : > { %9265 = vmatpush3.bf16.msra.mxu0 %v10339_v22 }
 0x17a   : > { %9266 = vmatprep.subr.bf16.mxu0 %v10340_v18 }
 0x17c   : > { %9235 = vmatmul.mubr.msk.bf16.gmra.mrb[4].mxu0 %vm1056_vm9, %v11265_v44  ;;  %v11492_v44 = vld [vmem:[#allocation2 + $0xd0] sm:$0xf] }
 0x17d   : > { %9238 = vmatprep.mubr.msk.bf16.mxu0 %vm1056_vm9, %v11272_v48  ;;  %9267 = vmatpush3.bf16.msra.mxu0 %v10340_v18  ;;  %v2713_v48 = vshrl.u32 %v1744_v53, 16  ;;  %v2722_v60 = vshll.u32 %v11492_v44, 16  ;;  %v2971_v18 = vld [vmem:[#allocation2 + $0x24] sm:$0xe] }
 0x17e   : > { %9268 = vmatprep.subr.bf16.mxu0 %v10341_v11 }
 0x17f   : > { %v2715_v58 = vrot.slane %v2713_v48, 4  ;;  %v2724_v9 = vrot.slane %v2722_v60, 5 }
 0x181   : > { %9269 = vmatpush3.bf16.msra.mxu0 %v10341_v11  ;;  %v2972_v11 = vld [vmem:[#allocation2 + $0x30] sm:$0xe] }
 0x182   : > { %9302 = vmatprep.subr.bf16.mxu0 %v11481_v21 }
 0x184   : > { %9239 = vmatmul.mubr.msk.bf16.gmra.mrb[8].mxu0 %vm1056_vm9, %v11301_v35  ;;  %v2716_v35 = vshll.u32 %v1744_v53, 16  ;;  %v11540_v53 = vcombine.low %v3047_v40, %v3050_v49  ;;  %v3102_v40 = vrot.slane %v13127_v37, 5 }
 0x185   : > { %9242 = vmatprep.mubr.msk.bf16.mxu0 %vm1056_vm9, %v11309_v2  ;;  %v2726_v2 = vshrl.u32 %v11492_v44, 16 }
 0x187   : > { %v2728_v55 = vrot.slane %v2726_v2, 4  ;;  %v3063_v2 = vrot.slane %v11124_v1, 5 }
 0x18c   : > { %9243 = vmatmul.mubr.msk.bf16.gmra.mrb[12].mxu0 %vm1056_vm9, %v11341_v50  ;;  %v2718_v50 = vrot.slane %v2716_v35, 5  ;;  %v8124_v35 = vrot.slane %v2971_v18, 9 }
 0x18d   : > { %9246 = vmatprep.mubr.msk.bf16.mxu0 %vm1056_vm9, %v11343_v54  ;;  %v11500_v54 = vld [vmem:[#allocation2 + $0xd4] sm:$0x1] }
 0x18e   : > { %v2732_v7 = vshll.u32 %v11500_v54, 16 }
 0x190   : > { %v2734_v24 = vrot.slane %v2732_v7, 5  ;;  %v10344_v7 = vld [vmem:[%s13047_s1 + $0xb0] sm:$0xff]  }
 0x194   : > { %9247 = vmatmul.mubr.msk.bf16.gmra.mrb[16].mxu0 %vm1056_vm9, %v11369_v13  ;;  %v2719_v13 = vor.u32 %v2718_v50, %v2715_v58  ;;  %v8125_v58 = vrot.slane %v2972_v11, 9  ;;  %v3070_v50 = vrot.slane %v11160_v23, 5  ;;  %v3074_v23 = vrot.slane %v11141_v38, 5 }
 0x195   : > { %9250 = vmatprep.mubr.msk.bf16.mxu0 %vm1056_vm9, %v11371_v14  ;;  %v2729_v14 = vor.u32 %v2728_v55, %v2724_v9 }
 0x196   : > { %v2720_v43 = vrot.slane %v2719_v13, 4  ;;  %v3068_v55 = vsel %vm11509_vm15, %v8125_v58, %v3067_v26  ;;  %v13129_v58 = vld [vmem:[#allocation16_spill] sm:$0xff] }
 0x197   : > { %v2730_v27 = vrot.slane %v2729_v14, 4  ;;  %v2973_v14 = vld [vmem:[#allocation2 + $0x3c] sm:$0xe] }
 0x198   : > { %v2725_v62 = vsel %vm11109_vm12, %v2720_v43, %v2724_v9  ;;  %v10343_v9 = vld [vmem:[%s13047_s1 + $0xa8] sm:$0xff]   ;;  %v8126_v38 = vrot.slane %v2973_v14, 9 }
 0x19c   : > { %9251 = vmatmul.mubr.msk.bf16.gmra.mrb[20].mxu0 %vm1056_vm9, %v11388_v5  ;;  %v13123_v5 = vmov 0 }
 0x19d   : > { %9254 = vmatprep.mubr.msk.bf16.mxu0 %vm1056_vm9, %v11390_v8  ;;  %v13124_v5 = vsel %vm11509_vm15, 4294967295, %v13123_v5  ;;  %v2735_v8 = vsel %vm11109_vm12, %v2730_v27, %v2734_v24  ;;  %v3076_v27 = vrot.slane %v3074_v23, 4  ;;  %v3077_v24 = vrot.slane %v11182_v0, 5 }
 0x19e   : > { %13125 = vst [vmem:[#allocation24_spill] sm:$0xff] %v13124_v5  ;;  %v8100_v39 = vcombine.low %v2725_v62, %v2735_v8  ;;  %v3075_v62 = vsel %vm11509_vm15, %v8126_v38, %v3074_v23  ;;  %v3088_v8 = vrot.slane %v11170_v51, 5  ;;  %v13132_v38 = vld [vmem:[#allocation15_spill] sm:$0xff] }
 0x19f   : > { %v3078_v0 = vsel %vm11509_vm15, %v3076_v27, %v3077_v24  ;;  %v3123_v27 = vrot.slane %v13132_v38, 5  ;;  %v2980_v24 = vld [vmem:[#allocation2 + $0x90] sm:$0xe]  ;;  %v2984_v38 = vld [vmem:[#allocation2 + $0xc0] sm:$0xe] }
 0x1a4   : > { %9255 = vmatmul.mubr.msk.bf16.gmra.mrb[24].mxu0 %vm1056_vm9, %v11400_v17  ;;  %v2970_v17 = vld [vmem:[#allocation2 + $0x18] sm:$0xe] }
 0x1a5   : > { %9258 = vmatprep.mubr.msk.bf16.mxu0 %vm1056_vm9, %v8071_v56  ;;  %v8123_v28 = vrot.slane %v2970_v17, 9  ;;  %v3060_v56 = vrot.slane %v11103_v3, 5  ;;  %v3069_v3 = vrot.slane %v3067_v26, 4  ;;  %v11595_v17 = vcombine.low %v3075_v62, %v3078_v0  ;;  %v2978_v26 = vld [vmem:[#allocation2 + $0x78] sm:$0xe]  ;;  %v13133_v62 = vld [vmem:[#allocation19_spill] sm:$0xff] }
 0x1a6   : > { %v3119_v0 = vrot.slane %v13133_v62, 5 }
 0x1a7   : > { %v3054_v22 = vsel %vm11509_vm15, %v8123_v28, %v3053_v29  ;;  %v3062_v60 = vrot.slane %v3060_v56, 4  ;;  %v3061_v32 = vsel %vm11509_vm15, %v8124_v35, %v3060_v56  ;;  %v3071_v13 = vsel %vm11509_vm15, %v3069_v3, %v3070_v50  ;;  %v2976_v29 = vld [vmem:[#allocation2 + $0x60] sm:$0xe] }
 0x1a8   : > { %v11542_v48 = vcombine.low %v3054_v22, %v3057_v59  ;;  %v11569_v43 = vcombine.low %v3068_v55, %v3071_v13  ;;  %v8129_v41 = vrot.slane %v2976_v29, 9  ;;  %v13126_v28 = vld [vmem:[#allocation13_spill] sm:$0xff]  ;;  %v2977_v22 = vld [vmem:[#allocation2 + $0x6c] sm:$0xe]  ;;  %v13128_v59 = vld [vmem:[#allocation12_spill] sm:$0xff]  ;;  %v3105_v3 = vrot.slane %v13129_v58, 5 }
 0x1a9   : > { %v3064_v1 = vsel %vm11509_vm15, %v3062_v60, %v3063_v2  ;;  %v3098_v46 = vrot.slane %v13126_v28, 5  ;;  %v3109_v18 = vrot.slane %v13128_v59, 5  ;;  %v8130_v60 = vrot.slane %v2977_v22, 9  ;;  %v13131_v13 = vld [vmem:[#allocation14_spill] sm:$0xff]  ;;  %v13136_v28 = vld [vmem:[#allocation21_spill] sm:$0xff] }
 0x1aa   : > { %v11567_v16 = vcombine.low %v3061_v32, %v3064_v1  ;;  %v3096_v49 = vsel %vm11509_vm15, %v8129_v41, %v3095_v10  ;;  %v3104_v2 = vrot.slane %v3102_v40, 4  ;;  %v8131_v50 = vrot.slane %v2978_v26, 9  ;;  %v13130_v32 = vld [vmem:[#allocation17_spill] sm:$0xff]  ;;  %v13138_v58 = vld [vmem:[#allocation22_spill] sm:$0xff] }
 0x1ab   : > { %v3099_v56 = vsel %vm11509_vm15, %v3097_v42, %v3098_v46  ;;  %v3112_v1 = vrot.slane %v13130_v32, 5  ;;  %v3103_v23 = vsel %vm11509_vm15, %v8130_v60, %v3102_v40  ;;  %v3116_v14 = vrot.slane %v13131_v13, 5  ;;  %v2981_v42 = vld [vmem:[#allocation2 + $0x9c] sm:$0xe] }
 0x1ac   : > { %9259 = vmatmul.mubr.msk.bf16.gmra.mrb[28].mxu0 %vm1056_vm9, %v8100_v39  ;;  %v8128_v39 = vrot.slane %v2975_v52, 9  ;;  %v11618_v35 = vcombine.low %v3096_v49, %v3099_v56  ;;  %v3106_v55 = vsel %vm11509_vm15, %v3104_v2, %v3105_v3  ;;  %v3137_v46 = vrot.slane %v13136_v28, 5  ;;  %v13137_v56 = vld [vmem:[#allocation23_spill] sm:$0xff]  ;;  %v10351_v28 = vld [vmem:[%s13049_s3 + $0x68] sm:$0xff]  }
 0x1ad   : > { %9270 = vmatprep.mubr.msk.bf16.mxu0 %vm1056_vm9, %v8145_v15  ;;  %v3090_v15 = vrot.slane %v3088_v8, 4  ;;  %v8134_v40 = vrot.slane %v2981_v42, 9  ;;  %v3133_v22 = vrot.slane %v13137_v56, 5  ;;  %v3140_v26 = vrot.slane %v11352_v57, 5  ;;  %v4091_v42 = vld [vmem:[#allocation3 + $0x38] sm:$0x1] }
 0x1ae   : > { %v3089_v45 = vsel %vm11509_vm15, %v8128_v39, %v3088_v8  ;;  %v8133_v8 = vrot.slane %v2980_v24, 9  ;;  %v13135_v39 = vld [vmem:[#allocation18_spill] sm:$0xff]  ;;  %v3144_v3 = vrot.slane %v13138_v58, 5  ;;  %v3147_v13 = vrot.slane %v11373_v6, 5  ;;  %v4046_v56 = vld [vmem:[#allocation3 + $0x3c] sm:$0x1] }
 0x1af   : > { %v3092_v36 = vsel %vm11509_vm15, %v3090_v15, %v3091_v63  ;;  %v3130_v15 = vrot.slane %v13135_v39, 5  ;;  %v10347_v6 = vld [vmem:[%s13047_s1 + $0x108] sm:$0xff]   ;;  %v4055_v58 = vld [vmem:[#allocation3 + $0x60] sm:$0x1] }
 0x1b0   : > { %v11616_v11 = vcombine.low %v3089_v45, %v3092_v36  ;;  %v3124_v63 = vsel %vm11509_vm15, %v8133_v8, %v3123_v27  ;;  %v2982_v45 = vld [vmem:[#allocation2 + $0xa8] sm:$0xe]  ;;  %v4085_v8 = vld [vmem:[#allocation3 + $0x20] sm:$0x1] }
 0x1b1   : > { %v3132_v49 = vrot.slane %v3130_v15, 4  ;;  %v8135_v59 = vrot.slane %v2982_v45, 9  ;;  %v3131_v60 = vsel %vm11509_vm15, %v8134_v40, %v3130_v15  ;;  %v4040_v15 = vld [vmem:[#allocation3 + $0x24] sm:$0x1]  ;;  %v4088_v45 = vld [vmem:[#allocation3 + $0x2c] sm:$0x1] }
 0x1b2   : > { %v4049_v40 = vld [vmem:[#allocation3 + $0x48] sm:$0x1] }
 0x1b3   : > { %v3134_v2 = vsel %vm11509_vm15, %v3132_v49, %v3133_v22  ;;  %v4050_v49 = vsel %vm10600_vm2, 0, %v4049_v40  ;;  %v4047_v22 = vsel %vm10600_vm2, 0, %v4046_v56 }
 0x1b4   : > { %9271 = vmatmul.mubr.msk.bf16.vlgmr.msra.gmra.mrb[0].mxu0 %vm1056_vm9, %v11540_v53  ;;  %v8158_v32 = vcombine.low %v3131_v60, %v3134_v2  ;;  %4051 = vst [vmem:[#allocation3 + $0x48] sm:$0x1] %v4050_v49  ;;  %4048 = vst [vmem:[#allocation3 + $0x3c] sm:$0x1] %v4047_v22  ;;  %v4094_v60 = vld [vmem:[#allocation3 + $0x44] sm:$0x1] }
 0x1b5   : > { %9303 = vmatpush3.bf16.msra.mxu0 %v11481_v21  ;;  %9274 = vmatprep.mubr.msk.bf16.mxu0 %vm1056_vm9, %v11542_v48  ;;  %v3081_v21 = vrot.slane %v11156_v20, 5  ;;  %v10345_v20 = vld [vmem:[%s13047_s1 + $0xb8] sm:$0xff]   ;;  %v4095_v2 = vsel %vm10610_vm5, 0, %v4094_v60 }
 0x1b6   : > { %9304 = vmatprep.subr.bf16.mxu0 %v10343_v9  ;;  %4096 = vst [vmem:[#allocation3 + $0x44] sm:$0x1] %v4095_v2 }
 0x1b7   : > { %v3083_v61 = vrot.slane %v3081_v21, 4  ;;  %v3082_v25 = vsel %vm11509_vm15, %v8127_v4, %v3081_v21  ;;  %v3110_v21 = vsel %vm11509_vm15, %v8131_v50, %v3109_v18  ;;  %v11636_v4 = vcombine.low %v3103_v23, %v3106_v55 }
 0x1b8   : > { %v3138_v50 = vsel %vm11509_vm15, %v8135_v59, %v3137_v46  ;;  %v3146_v55 = vrot.slane %v3144_v3, 4  ;;  %v4097_v59 = vld [vmem:[#allocation3 + $0x50] sm:$0x1] }
 0x1b9   : > { %9305 = vmatpush3.bf16.msra.mxu0 %v10343_v9  ;;  %v3085_v33 = vsel %vm11509_vm15, %v3083_v61, %v3084_v31  ;;  %v3111_v9 = vrot.slane %v3109_v18, 4  ;;  %v8132_v31 = vrot.slane %v2979_v34, 9  ;;  %v3139_v18 = vrot.slane %v3137_v46, 4  ;;  %v10348_v34 = vld [vmem:[%s13047_s1 + $0x110] sm:$0xff]  }
 0x1ba   : > { %9306 = vmatprep.subr.bf16.mxu0 %v10344_v7  ;;  %v11597_v51 = vcombine.low %v3082_v25, %v3085_v33  ;;  %v3125_v25 = vrot.slane %v3123_v27, 4  ;;  %v13134_v33 = vld [vmem:[#allocation20_spill] sm:$0xff]  ;;  %v8181_v27 = vrot.slane %v2984_v38, 9  ;;  %v4092_v46 = vsel %vm10610_vm5, 0, %v4091_v42  ;;  %v4067_v38 = vld [vmem:[#allocation3 + $0x90] sm:$0x1] }
 0x1bb   : > { %v3126_v52 = vrot.slane %v13134_v33, 5  ;;  %v3117_v10 = vsel %vm11509_vm15, %v8132_v31, %v3116_v14  ;;  %v3141_v57 = vsel %vm11509_vm15, %v3139_v18, %v3140_v26  ;;  %v3479_v31 = vrot.slane %v11443_v12, 5  ;;  %v2985_v12 = vld [vmem:[#allocation2 + $0xcc] sm:$0xe]  ;;  %4093 = vst [vmem:[#allocation3 + $0x38] sm:$0x1] %v4092_v46 }
 0x1bc   : > { %9275 = vmatmul.mubr.msk.bf16.gmra.mrb[4].mxu0 %vm1056_vm9, %v11567_v16  ;;  %v4086_v33 = vsel %vm10610_vm5, 0, %v4085_v8  ;;  %v4098_v18 = vsel %vm10610_vm5, 0, %v4097_v59  ;;  %v10353_v26 = vld [vmem:[%s13049_s3 + $0x78] sm:$0xff]  }
 0x1bd   : > { %9278 = vmatprep.mubr.msk.bf16.mxu0 %vm1056_vm9, %v11569_v43  ;;  %9307 = vmatpush3.bf16.msra.mxu0 %v10344_v7  ;;  %v3113_v7 = vsel %vm11509_vm15, %v3111_v9, %v3112_v1  ;;  %v3127_v41 = vsel %vm11509_vm15, %v3125_v25, %v3126_v52  ;;  %v2983_v9 = vld [vmem:[#allocation2 + $0xb4] sm:$0xe]  ;;  %v8159_v1 = vcombine.low %v3138_v50, %v3141_v57  ;;  %v4082_v52 = vld [vmem:[#allocation3 + $0x14] sm:$0x1] }
 0x1be   : > { %9308 = vmatprep.subr.bf16.mxu0 %v10345_v20  ;;  %v11638_v61 = vcombine.low %v3110_v21, %v3113_v7  ;;  %v11658_v37 = vcombine.low %v3124_v63, %v3127_v41  ;;  %v8136_v23 = vrot.slane %v2983_v9, 9  ;;  %v3148_v21 = vsel %vm11509_vm15, %v3146_v55, %v3147_v13  ;;  %4087 = vst [vmem:[#allocation3 + $0x20] sm:$0x1] %v4086_v33  ;;  %v10350_v41 = vld [vmem:[%s13049_s3 + $0x60] sm:$0xff]   ;;  %v4052_v50 = vld [vmem:[#allocation3 + $0x54] sm:$0x1] }
 0x1bf   : > { %v4041_v63 = vsel %vm10600_vm2, 0, %v4040_v15  ;;  %9382 = vmatprep.subr.bf16.mxu1 %v10350_v41  ;;  %4099 = vst [vmem:[#allocation3 + $0x50] sm:$0x1] %v4098_v18  ;;  %v4053_v57 = vsel %vm10600_vm2, 0, %v4052_v50  ;;  %v4103_v9 = vld [vmem:[#allocation3 + $0x68] sm:$0x1] }
 0x1c0   : > { %4042 = vst [vmem:[#allocation3 + $0x24] sm:$0x1] %v4041_v63  ;;  %9383 = vmatpush3.bf16.msra.mxu1 %v10350_v41  ;;  %4054 = vst [vmem:[#allocation3 + $0x54] sm:$0x1] %v4053_v57  ;;  %v4061_v55 = vld [vmem:[#allocation3 + $0x78] sm:$0x1] }
 0x1c1   : > { %9309 = vmatpush3.bf16.msra.mxu0 %v10345_v20  ;;  %v3118_v20 = vrot.slane %v3116_v14, 4  ;;  %v3145_v14 = vsel %vm11509_vm15, %v8136_v23, %v3144_v3  ;;  %9384 = vmatprep.subr.bf16.mxu1 %v10351_v28  ;;  %v4056_v3 = vsel %vm10600_vm2, 0, %v4055_v58  ;;  %v4062_v13 = vsel %vm10600_vm2, 0, %v4061_v55  ;;  %v4127_v33 = vld [vmem:[#allocation3 + $0xc8] sm:$0x1] }
 0x1c2   : > { %9342 = vmatprep.subr.bf16.mxu0 %v11593_v47  ;;  %v8160_v7 = vcombine.low %v3145_v14, %v3148_v21  ;;  %4057 = vst [vmem:[#allocation3 + $0x60] sm:$0x1] %v4056_v3  ;;  %v4058_v14 = vld [vmem:[#allocation3 + $0x6c] sm:$0x1]  ;;  %4063 = vst [vmem:[#allocation3 + $0x78] sm:$0x1] %v4062_v13 }
 0x1c3   : > { %v3120_v29 = vsel %vm11509_vm15, %v3118_v20, %v3119_v0  ;;  %v4059_v21 = vsel %vm10600_vm2, 0, %v4058_v14 }
 0x1c4   : > { %9279 = vmatmul.mubr.msk.bf16.gmra.mrb[8].mxu0 %vm1056_vm9, %v11595_v17  ;;  %v11656_v36 = vcombine.low %v3117_v10, %v3120_v29  ;;  %v4083_v10 = vsel %vm10610_vm5, 0, %v4082_v52  ;;  %v4043_v29 = vld [vmem:[#allocation3 + $0x30] sm:$0x1]  ;;  %9385 = vmatpush3.bf16.msra.mxu1 %v10351_v28  ;;  %4060 = vst [vmem:[#allocation3 + $0x6c] sm:$0x1] %v4059_v21  ;;  %v4128_v52 = vsel %vm10610_vm5, 0, %v4127_v33 }
 0x1c5   : > { %9282 = vmatprep.mubr.msk.bf16.mxu0 %vm1056_vm9, %v11597_v51  ;;  %4084 = vst [vmem:[#allocation3 + $0x14] sm:$0x1] %v4083_v10  ;;  %v4044_v39 = vsel %vm10600_vm2, 0, %v4043_v29  ;;  %v4124_v10 = vld [vmem:[#allocation3 + $0xbc] sm:$0x1] }
 0x1c6   : > { %4045 = vst [vmem:[#allocation3 + $0x30] sm:$0x1] %v4044_v39  ;;  %4129 = vst [vmem:[#allocation3 + $0xc8] sm:$0x1] %v4128_v52  ;;  %v4125_v29 = vsel %vm10610_vm5, 0, %v4124_v10 }
 0x1c7   : > { %4126 = vst [vmem:[#allocation3 + $0xbc] sm:$0x1] %v4125_v29  ;;  %v11845_v39 = vld [vmem:[%s13048_s2] ss:$0 sm:$0xff] }
 0x1cc   : > { %9283 = vmatmul.mubr.msk.bf16.gmra.mrb[12].mxu0 %vm1056_vm9, %v11616_v11 }
 0x1cd   : > { %9286 = vmatprep.mubr.msk.bf16.mxu0 %vm1056_vm9, %v11618_v35 }
 0x1d4   : > { %9287 = vmatmul.mubr.msk.bf16.gmra.mrb[16].mxu0 %vm1056_vm9, %v11636_v4 }
 0x1d5   : > { %9290 = vmatprep.mubr.msk.bf16.mxu0 %vm1056_vm9, %v11638_v61 }
 0x1dc   : > { %9291 = vmatmul.mubr.msk.bf16.gmra.mrb[20].mxu0 %vm1056_vm9, %v11656_v36 }
 0x1dd   : > { %9294 = vmatprep.mubr.msk.bf16.mxu0 %vm1056_vm9, %v11658_v37 }
 0x1e4   : > { %9295 = vmatmul.mubr.msk.bf16.gmra.mrb[24].mxu0 %vm1056_vm9, %v8158_v32 }
 0x1e5   : > { %9298 = vmatprep.mubr.msk.bf16.mxu0 %vm1056_vm9, %v8159_v1 }
 0x1ec   : > { %9299 = vmatmul.mubr.msk.bf16.gmra.mrb[28].mxu0 %vm1056_vm9, %v8160_v7 }
 0x1ed   : > { %9310 = vmatprep.mubr.msk.bf16.mxu0 %vm1056_vm9, %v11540_v53  ;;  %v10349_v53 = vld [vmem:[%s13047_s1 + $0x118] sm:$0xff]  }
 0x1f4   : > { %9311 = vmatmul.mubr.msk.bf16.vlgmr.msra.gmra.mrb[0].mxu0 %vm1056_vm9, %v11542_v48 }
 0x1f5   : > { %9343 = vmatpush3.bf16.msra.mxu0 %v11593_v47  ;;  %9314 = vmatprep.mubr.msk.bf16.mxu0 %vm1056_vm9, %v11567_v16  ;;  %v3476_v47 = vrot.slane %v11435_v19, 5  ;;  %v3718_v19 = vrot.slane %v11492_v44, 5  ;;  %v10376_v44 = vld [vmem:[%s13049_s3 + $0xc8] sm:$0xff]  }
 0x1f6   : > { %9344 = vmatprep.subr.bf16.mxu0 %v10347_v6 }
 0x1f7   : > { %v3478_v24 = vrot.slane %v3476_v47, 4  ;;  %v3477_v20 = vsel %vm11509_vm15, %v8181_v27, %v3476_v47  ;;  %v4068_v27 = vsel %vm10600_vm2, 0, %v4067_v38 }
 0x1f8   : > { %4069 = vst [vmem:[#allocation3 + $0x90] sm:$0x1] %v4068_v27 }
 0x1f9   : > { %9345 = vmatpush3.bf16.msra.mxu0 %v10347_v6  ;;  %v3480_v62 = vsel %vm11509_vm15, %v3478_v24, %v3479_v31  ;;  %v4109_v6 = vld [vmem:[#allocation3 + $0x80] sm:$0x1]  ;;  %v4064_v24 = vld [vmem:[#allocation3 + $0x84] sm:$0x1] }
 0x1fa   : > { %9346 = vmatprep.subr.bf16.mxu0 %v10348_v34  ;;  %v8190_v0 = vcombine.low %v3477_v20, %v3480_v62  ;;  %v4065_v31 = vsel %vm10600_vm2, 0, %v4064_v24  ;;  %v4115_v20 = vld [vmem:[#allocation3 + $0x98] sm:$0x1] }
 0x1fb   : > { %4066 = vst [vmem:[#allocation3 + $0x84] sm:$0x1] %v4065_v31  ;;  %v4116_v62 = vsel %vm10610_vm5, 0, %v4115_v20 }
 0x1fc   : > { %9315 = vmatmul.mubr.msk.bf16.gmra.mrb[4].mxu0 %vm1056_vm9, %v11569_v43  ;;  %4117 = vst [vmem:[#allocation3 + $0x98] sm:$0x1] %v4116_v62  ;;  %v4557_v62 = vld [vmem:[#allocation3 + $0x20] sm:$0x1] }
 0x1fd   : > { %9318 = vmatprep.mubr.msk.bf16.mxu0 %vm1056_vm9, %v11595_v17  ;;  %9347 = vmatpush3.bf16.msra.mxu0 %v10348_v34  ;;  %v4110_v34 = vsel %vm10610_vm5, 0, %v4109_v6 }
 0x1fe   : > { %9348 = vmatprep.subr.bf16.mxu0 %v10349_v53  ;;  %4111 = vst [vmem:[#allocation3 + $0x80] sm:$0x1] %v4110_v34 }
 0x201   : > { %9349 = vmatpush3.bf16.msra.mxu0 %v10349_v53  ;;  %v4106_v53 = vld [vmem:[#allocation3 + $0x74] sm:$0x1] }
 0x202   : > { %v4107_v47 = vsel %vm10610_vm5, 0, %v4106_v53 }
 0x203   : > { %4108 = vst [vmem:[#allocation3 + $0x74] sm:$0x1] %v4107_v47 }
 0x204   : > { %9319 = vmatmul.mubr.msk.bf16.gmra.mrb[8].mxu0 %vm1056_vm9, %v11597_v51 }
 0x205   : > { %9322 = vmatprep.mubr.msk.bf16.mxu0 %vm1056_vm9, %v11616_v11 }
 0x20c   : > { %9323 = vmatmul.mubr.msk.bf16.gmra.mrb[12].mxu0 %vm1056_vm9, %v11618_v35 }
 0x20d   : > { %9326 = vmatprep.mubr.msk.bf16.mxu0 %vm1056_vm9, %v11636_v4 }
 0x214   : > { %9327 = vmatmul.mubr.msk.bf16.gmra.mrb[16].mxu0 %vm1056_vm9, %v11638_v61 }
 0x215   : > { %9330 = vmatprep.mubr.msk.bf16.mxu0 %vm1056_vm9, %v11656_v36 }
 0x21c   : > { %9331 = vmatmul.mubr.msk.bf16.gmra.mrb[20].mxu0 %vm1056_vm9, %v11658_v37 }
 0x21d   : > { %9334 = vmatprep.mubr.msk.bf16.mxu0 %vm1056_vm9, %v8158_v32 }
 0x224   : > { %9335 = vmatmul.mubr.msk.bf16.gmra.mrb[24].mxu0 %vm1056_vm9, %v8159_v1 }
 0x225   : > { %9338 = vmatprep.mubr.msk.bf16.mxu0 %vm1056_vm9, %v8160_v7 }
 0x22c   : > { %9339 = vmatmul.mubr.msk.bf16.gmra.mrb[28].mxu0 %vm1056_vm9, %v8190_v0 }
 0x22d   : > { %9350 = vmatprep.mubr.msk.bf16.mxu0 %vm1056_vm9, %v11542_v48  ;;  %v8211_v48 = vrot.slane %v2985_v12, 9  ;;  %v4073_v12 = vld [vmem:[#allocation3 + $0xa8] sm:$0x1] }
 0x234   : > { %9351 = vmatmul.mubr.msk.bf16.vlgmr.msra.gmra.mrb[0].mxu0 %vm1056_vm9, %v11567_v16  ;;  %v3720_v16 = vrot.slane %v3718_v19, 4 }
 0x235   : > { %9354 = vmatprep.mubr.msk.bf16.mxu0 %vm1056_vm9, %v11569_v43  ;;  %v3721_v43 = vrot.slane %v11500_v54, 5 }
 0x23c   : > { %9355 = vmatmul.mubr.msk.bf16.gmra.mrb[4].mxu0 %vm1056_vm9, %v11595_v17  ;;  %v3719_v17 = vsel %vm11509_vm15, %v8211_v48, %v3718_v19  ;;  %v4074_v48 = vsel %vm10600_vm2, 0, %v4073_v12 }
 0x23d   : > { %9358 = vmatprep.mubr.msk.bf16.mxu0 %vm1056_vm9, %v11597_v51  ;;  %v3722_v51 = vsel %vm11509_vm15, %v3720_v16, %v3721_v43  ;;  %v4070_v16 = vld [vmem:[#allocation3 + $0x9c] sm:$0x1]  ;;  %4075 = vst [vmem:[#allocation3 + $0xa8] sm:$0x1] %v4074_v48 }
 0x23e   : > { %v4071_v43 = vsel %vm10600_vm2, 0, %v4070_v16 }
 0x23f   : > { %4072 = vst [vmem:[#allocation3 + $0x9c] sm:$0x1] %v4071_v43 }
 0x244   : > { %9359 = vmatmul.mubr.msk.bf16.gmra.mrb[8].mxu0 %vm1056_vm9, %v11616_v11  ;;  %v8220_v11 = vcombine.low %v3719_v17, %v3722_v51  ;;  %v4121_v17 = vld [vmem:[#allocation3 + $0xb0] sm:$0x1] }
 0x245   : > { %9362 = vmatprep.mubr.msk.bf16.mxu0 %vm1056_vm9, %v11618_v35  ;;  %v4037_v35 = vld [vmem:[#allocation3 + $0x18] sm:$0x1]  ;;  %v4122_v51 = vsel %vm10610_vm5, 0, %v4121_v17  ;;  %v4550_v17 = vld [vmem:[#allocation3 + $0x14] sm:$0x1] }
 0x246   : > { %4123 = vst [vmem:[#allocation3 + $0xb0] sm:$0x1] %v4122_v51 }
 0x24c   : > { %9363 = vmatmul.mubr.msk.bf16.gmra.mrb[12].mxu0 %vm1056_vm9, %v11636_v4  ;;  %v4038_v4 = vsel %vm10600_vm2, 0, %v4037_v35 }
 0x24d   : > { %9366 = vmatprep.mubr.msk.bf16.mxu0 %vm1056_vm9, %v11638_v61  ;;  %v4034_v61 = vld [vmem:[#allocation3 + $0xc] sm:$0x1]  ;;  %4039 = vst [vmem:[#allocation3 + $0x18] sm:$0x1] %v4038_v4  ;;  %v4079_v4 = vld [vmem:[#allocation3 + $0xc0] sm:$0x1] }
 0x24e   : > { %v4035_v54 = vsel %vm10600_vm2, 0, %v4034_v61  ;;  %v4080_v61 = vsel %vm10600_vm2, 0, %v4079_v4 }
 0x24f   : > { %4036 = vst [vmem:[#allocation3 + $0xc] sm:$0x1] %v4035_v54  ;;  %v4076_v54 = vld [vmem:[#allocation3 + $0xb4] sm:$0x1]  ;;  %4081 = vst [vmem:[#allocation3 + $0xc0] sm:$0x1] %v4080_v61 }
 0x250   : > { %v4077_v8 = vsel %vm10600_vm2, 0, %v4076_v54  ;;  %v10377_v54 = vld [vmem:[%s13049_s3 + $0xd0] sm:$0xff]  }
 0x251   : > { %4078 = vst [vmem:[#allocation3 + $0xb4] sm:$0x1] %v4077_v8 }
 0x254   : > { %9367 = vmatmul.mubr.msk.bf16.gmra.mrb[16].mxu0 %vm1056_vm9, %v11656_v36  ;;  %v4089_v36 = vsel %vm10610_vm5, 0, %v4088_v45 }
 0x255   : > { %9370 = vmatprep.mubr.msk.bf16.mxu0 %vm1056_vm9, %v11658_v37  ;;  %4090 = vst [vmem:[#allocation3 + $0x2c] sm:$0x1] %v4089_v36  ;;  %v10352_v37 = vld [vmem:[%s13049_s3 + $0x70] sm:$0xff]  }
 0x256   : > { %9386 = vmatprep.subr.bf16.mxu1 %v10352_v37  ;;  %v4546_v47 = vld [vmem:[#allocation3 + $0xc] sm:$0xf] }
 0x257   : > { %9387 = vmatpush3.bf16.msra.mxu1 %v10352_v37 }
 0x258   : > { %9388 = vmatprep.subr.bf16.mxu1 %v10353_v26 }
 0x25b   : > { %9389 = vmatpush3.bf16.msra.mxu1 %v10353_v26 }
 0x25c   : > { %9371 = vmatmul.mubr.msk.bf16.gmra.mrb[20].mxu0 %vm1056_vm9, %v8158_v32  ;;  %v4104_v32 = vsel %vm10610_vm5, 0, %v4103_v9 }
 0x25d   : > { %9374 = vmatprep.mubr.msk.bf16.mxu0 %vm1056_vm9, %v8159_v1  ;;  %v4100_v1 = vld [vmem:[#allocation3 + $0x5c] sm:$0x1]  ;;  %4105 = vst [vmem:[#allocation3 + $0x68] sm:$0x1] %v4104_v32 }
 0x25e   : > { %v4101_v23 = vsel %vm10610_vm5, 0, %v4100_v1 }
 0x25f   : > { %4102 = vst [vmem:[#allocation3 + $0x5c] sm:$0x1] %v4101_v23  ;;  %v4553_v23 = vld [vmem:[#allocation3 + $0x18] sm:$0xf] }
 0x264   : > { %9375 = vmatmul.mubr.msk.bf16.gmra.mrb[24].mxu0 %vm1056_vm9, %v8160_v7  ;;  %v11811_v7 = vld [vmem:[%s13049_s3] sm:$0xff]  }
 0x265   : > { %9378 = vmatprep.mubr.msk.bf16.mxu0 %vm1056_vm9, %v8190_v0  ;;  %9422 = vmatprep.subr.bf16.mxu1 %v11811_v7  ;;  %v4112_v0 = vld [vmem:[#allocation3 + $0x8c] sm:$0x1] }
 0x266   : > { %v4113_v19 = vsel %vm10610_vm5, 0, %v4112_v0 }
 0x267   : > { %4114 = vst [vmem:[#allocation3 + $0x8c] sm:$0x1] %v4113_v19 }
 0x26c   : > { %9379 = vmatmul.mubr.msk.bf16.gmra.mrb[28].mxu0 %vm1056_vm9, %v8220_v11  ;;  %v4118_v11 = vld [vmem:[#allocation3 + $0xa4] sm:$0x1] }
 0x26d   : > { %v4119_v35 = vsel %vm10610_vm5, 0, %v4118_v11 }
 0x26e   : > { %4120 = vst [vmem:[#allocation3 + $0xa4] sm:$0x1] %v4119_v35 }
 0x307   : > { %v9352_v15 = vpop.f32.mrb[0].mxu0 }
 0x308   : > { %v3964_v63 = vadd.f32 %v9352_v15, %v11845_v39  ;;  %v3796_v41 = vpop.f32.mrb[1].mxu0 }
 0x309   : > { %v3962_v42 = vadd.f32 %v11845_v39, %v3796_v41  ;;  %v9353_v28 = vpop.f32.mrb[2].mxu0 }
 0x30a   : > { %v3996_v46 = vmax.f32 %v3964_v63, 0.0  ;;  %v3965_v45 = vadd.f32 %v9353_v28, %v11845_v39  ;;  %v3799_v36 = vpop.f32.mrb[3].mxu0 }
 0x30b   : > { %v3994_v37 = vmax.f32 %v3962_v42, 0.0  ;;  %v3963_v25 = vadd.f32 %v11845_v39, %v3799_v36 }
 0x30c   : > { %v8631_v40 = vpack.c.bf16 %v3996_v46, %v3996_v46  ;;  %v3997_v49 = vmax.f32 %v3965_v45, 0.0 }
 0x30d   : > { %v8629_v56 = vpack.c.bf16 %v3994_v37, %v3994_v37  ;;  %v3995_v22 = vmax.f32 %v3963_v25, 0.0  ;;  %v4567_v37 = vld [vmem:[#allocation3 + $0x30] sm:$0xf] }
 0x30e   : > { %v4244_v59 = vshrl.u32 %v8631_v40, 16  ;;  %v8632_v18 = vpack.c.bf16 %v3997_v49, %v3997_v49  ;;  %v4247_v26 = vshll.u32 %v8631_v40, 16 }
 0x30f   : > { %v4227_v60 = vshrl.u32 %v8629_v56, 16  ;;  %v4230_v2 = vshll.u32 %v8629_v56, 16  ;;  %v8630_v58 = vpack.c.bf16 %v3995_v22, %v3995_v22  ;;  %v9356_v3 = vpop.f32.mrb[4].mxu0 }
 0x310   : > { %v4246_v50 = vrot.slane %v4244_v59, 7  ;;  %v4252_v57 = vshrl.u32 %v8632_v18, 16  ;;  %v4255_v9 = vshll.u32 %v8632_v18, 16  ;;  %v3968_v32 = vadd.f32 %v9356_v3, %v11845_v39  ;;  %v3812_v1 = vpop.f32.mrb[5].mxu0  ;;  %v4560_v18 = vld [vmem:[#allocation3 + $0x24] sm:$0xf] }
 0x311   : > { %v4229_v55 = vrot.slane %v4227_v60, 7  ;;  %v4235_v13 = vshrl.u32 %v8630_v58, 16  ;;  %v4238_v14 = vshll.u32 %v8630_v58, 16  ;;  %v3966_v21 = vadd.f32 %v11845_v39, %v3812_v1  ;;  %v9357_v6 = vpop.f32.mrb[6].mxu0 }
 0x312   : > { %v4249_v34 = vor.u32 %v4247_v26, %v4246_v50  ;;  %v4250_v53 = vrot.slane %v4246_v50, 4  ;;  %v4254_v38 = vrot.slane %v4252_v57, 7  ;;  %v4000_v27 = vmax.f32 %v3968_v32, 0.0  ;;  %v3815_v24 = vpop.f32.mrb[7].mxu0 }
 0x313   : > { %v4232_v31 = vor.u32 %v4230_v2, %v4229_v55  ;;  %v4233_v20 = vrot.slane %v4229_v55, 4  ;;  %v4237_v0 = vrot.slane %v4235_v13, 7  ;;  %v3998_v19 = vmax.f32 %v3966_v21, 0.0 }
 0x314   : > { %v4554_v48 = vsel %vm10651_vm8, %v4249_v34, %v4553_v23  ;;  %v4257_v16 = vor.u32 %v4255_v9, %v4254_v38  ;;  %v4259_v43 = vrot.slane %v4254_v38, 4  ;;  %v8635_v51 = vpack.c.bf16 %v4000_v27, %v4000_v27  ;;  %v10360_v38 = vld [vmem:[%s13049_s3 + $0x8] sm:$0xff]   ;;  %v4571_v27 = vld [vmem:[#allocation3 + $0x38] sm:$0x1] }
 0x315   : > { %4555 = vst [vmem:[#allocation3 + $0x18] sm:$0xf] %v4554_v48  ;;  %v4547_v11 = vsel %vm10651_vm8, %v4232_v31, %v4546_v47  ;;  %v4240_v35 = vor.u32 %v4238_v14, %v4237_v0  ;;  %v4242_v4 = vrot.slane %v4237_v0, 4  ;;  %v8633_v61 = vpack.c.bf16 %v3998_v19, %v3998_v19 }
 0x316   : > { %4548 = vst [vmem:[#allocation3 + $0xc] sm:$0xf] %v4547_v11  ;;  %v4258_v8 = vsel %vm10635_vm7, %v4250_v53, %v4257_v16  ;;  %v4558_v33 = vsel %vm10600_vm2, %v4259_v43, %v4557_v62  ;;  %v4278_v52 = vshrl.u32 %v8635_v51, 16  ;;  %v4281_v15 = vshll.u32 %v8635_v51, 16 }
 0x317   : > { %4556 = vst.msk [vmem:[#allocation3 + $0x1c] sm:$0xf] %vm256_vm4, %v4258_v8  ;;  %4559 = vst [vmem:[#allocation3 + $0x20] sm:$0x1] %v4558_v33  ;;  %v4241_v10 = vsel %vm10635_vm7, %v4233_v20, %v4240_v35  ;;  %v4551_v29 = vsel %vm10600_vm2, %v4242_v4, %v4550_v17  ;;  %v4261_v63 = vshrl.u32 %v8633_v61, 16  ;;  %v9360_v41 = vpop.f32.mrb[8].mxu0  ;;  %v3969_v28 = vadd.f32 %v9357_v6, %v11845_v39 }
 0x318   : > { %4549 = vst.msk [vmem:[#allocation3 + $0x10] sm:$0xf] %vm256_vm4, %v4241_v10  ;;  %4552 = vst [vmem:[#allocation3 + $0x14] sm:$0x1] %v4551_v29  ;;  %v11867_v42 = vrot.slane %v4278_v52, 7  ;;  %v3967_v46 = vadd.f32 %v11845_v39, %v3815_v24  ;;  %v3972_v45 = vadd.f32 %v9360_v41, %v11845_v39  ;;  %v3828_v36 = vpop.f32.mrb[9].mxu0 }
 0x319   : > { %v11872_v25 = vrot.slane %v4261_v63, 7  ;;  %v4264_v40 = vshll.u32 %v8633_v61, 16  ;;  %v3970_v49 = vadd.f32 %v11845_v39, %v3828_v36  ;;  %v9361_v56 = vpop.f32.mrb[10].mxu0  ;;  %v4001_v26 = vmax.f32 %v3969_v28, 0.0  ;;  %v4564_v24 = vld [vmem:[#allocation3 + $0x2c] sm:$0x1] }
 0x31a   : > { %v4283_v22 = vor.u32 %v4281_v15, %v11867_v42  ;;  %v4284_v59 = vrot.slane %v11867_v42, 4  ;;  %v3999_v60 = vmax.f32 %v3967_v46, 0.0  ;;  %v3831_v2 = vpop.f32.mrb[11].mxu0  ;;  %v4004_v50 = vmax.f32 %v3972_v45, 0.0  ;;  %v4581_v17 = vld [vmem:[#allocation3 + $0x48] sm:$0xf] }
 0x31b   : > { %v4266_v58 = vor.u32 %v4264_v40, %v11872_v25  ;;  %v4267_v3 = vrot.slane %v11872_v25, 4  ;;  %v4002_v57 = vmax.f32 %v3970_v49, 0.0  ;;  %v8636_v32 = vpack.c.bf16 %v4001_v26, %v4001_v26  ;;  %v4574_v42 = vld [vmem:[#allocation3 + $0x3c] sm:$0xf] }
 0x31c   : > { %v4568_v9 = vsel %vm10651_vm8, %v4283_v22, %v4567_v37  ;;  %v8634_v1 = vpack.c.bf16 %v3999_v60, %v3999_v60  ;;  %v3973_v23 = vadd.f32 %v9361_v56, %v11845_v39  ;;  %v8639_v13 = vpack.c.bf16 %v4004_v50, %v4004_v50  ;;  %v10365_v22 = vld [vmem:[%s13049_s3 + $0x10] sm:$0xff]  }
 0x31d   : > { %4569 = vst [vmem:[#allocation3 + $0x30] sm:$0xf] %v4568_v9  ;;  %v4561_v55 = vsel %vm10651_vm8, %v4266_v58, %v4560_v18  ;;  %v8637_v14 = vpack.c.bf16 %v4002_v57, %v4002_v57  ;;  %v3971_v21 = vadd.f32 %v11845_v39, %v3831_v2  ;;  %v4286_v6 = vshrl.u32 %v8636_v32, 16 }
 0x31e   : > { %4562 = vst [vmem:[#allocation3 + $0x24] sm:$0xf] %v4561_v55  ;;  %v4289_v34 = vshll.u32 %v8636_v32, 16  ;;  %v4269_v53 = vshrl.u32 %v8634_v1, 16  ;;  %v4272_v47 = vshll.u32 %v8634_v1, 16  ;;  %v4312_v31 = vshrl.u32 %v8639_v13, 16 }
 0x31f   : > { %v4315_v20 = vshll.u32 %v8639_v13, 16  ;;  %v4295_v62 = vshrl.u32 %v8637_v14, 16  ;;  %v4298_v0 = vshll.u32 %v8637_v14, 16  ;;  %v9364_v19 = vpop.f32.mrb[12].mxu0  ;;  %v11888_v48 = vld [vmem:[#allocation3 + $0xc] sm:$0xff]   ;;  %v4288_v16 = vrot.slane %v4286_v6, 7 }
 0x320   : > { %v4271_v43 = vrot.slane %v4269_v53, 7  ;;  %v4005_v51 = vmax.f32 %v3973_v23, 0.0  ;;  %v4003_v11 = vmax.f32 %v3971_v21, 0.0  ;;  %v3844_v35 = vpop.f32.mrb[13].mxu0  ;;  %v11890_v4 = vld [vmem:[#allocation3 + $0x18] sm:$0xff]   ;;  %v11892_v61 = vrot.slane %v4312_v31, 7  ;;  %9390 = vmatprep.mubr.msk.bf16.mxu1 %vm1056_vm9, %v11888_v48 }
 0x321   : > { %v11894_v8 = vrot.slane %v4295_v62, 7  ;;  %v3976_v33 = vadd.f32 %v9364_v19, %v11845_v39  ;;  %v3974_v52 = vadd.f32 %v11845_v39, %v3844_v35  ;;  %v9365_v10 = vpop.f32.mrb[14].mxu0  ;;  %v4291_v29 = vor.u32 %v4289_v34, %v4288_v16  ;;  %9391 = vmatmul.mubr.msk.bf16.vlgmr.msra.gmra.mrb[0].mxu1 %vm1056_vm9, %v11890_v4  ;;  %v4585_v23 = vld [vmem:[#allocation3 + $0x50] sm:$0x1]  ;;  %v10370_v34 = vld [vmem:[%s13049_s3 + $0x18] sm:$0xff]  }
 0x322   : > { %v4293_v15 = vrot.slane %v4288_v16, 4  ;;  %v4274_v63 = vor.u32 %v4272_v47, %v4271_v43  ;;  %v4276_v41 = vrot.slane %v4271_v43, 4  ;;  %v3847_v28 = vpop.f32.mrb[15].mxu0  ;;  %v4317_v46 = vor.u32 %v4315_v20, %v11892_v61  ;;  %9423 = vmatpush3.bf16.msra.mxu1 %v11811_v7  ;;  %v4595_v35 = vld [vmem:[#allocation3 + $0x60] sm:$0xf] }
 0x323   : > { %v4318_v45 = vrot.slane %v11892_v61, 4  ;;  %v4300_v36 = vor.u32 %v4298_v0, %v11894_v8  ;;  %v4301_v37 = vrot.slane %v11894_v8, 4  ;;  %v4292_v25 = vsel %vm10635_vm7, %v4284_v59, %v4291_v29  ;;  %9424 = vmatprep.subr.bf16.mxu1 %v10360_v38 }
 0x324   : > { %v4572_v40 = vsel %vm10600_vm2, %v4293_v15, %v4571_v27  ;;  %v4275_v49 = vsel %vm10635_vm7, %v4267_v3, %v4274_v63  ;;  %v4565_v56 = vsel %vm10600_vm2, %v4276_v41, %v4564_v24  ;;  %4570 = vst.msk [vmem:[#allocation3 + $0x34] sm:$0xf] %vm256_vm4, %v4292_v25  ;;  %v4582_v7 = vsel %vm10651_vm8, %v4317_v46, %v4581_v17  ;;  %v4578_v27 = vld [vmem:[#allocation3 + $0x44] sm:$0x1] }
 0x325   : > { %4573 = vst [vmem:[#allocation3 + $0x38] sm:$0x1] %v4572_v40  ;;  %4563 = vst.msk [vmem:[#allocation3 + $0x28] sm:$0xf] %vm256_vm4, %v4275_v49  ;;  %v4575_v59 = vsel %vm10651_vm8, %v4300_v36, %v4574_v42  ;;  %v8640_v18 = vpack.c.bf16 %v4005_v51, %v4005_v51  ;;  %v8638_v26 = vpack.c.bf16 %v4003_v11, %v4003_v11  ;;  %v4008_v60 = vmax.f32 %v3976_v33, 0.0 }
 0x326   : > { %4566 = vst [vmem:[#allocation3 + $0x2c] sm:$0x1] %v4565_v56  ;;  %4583 = vst [vmem:[#allocation3 + $0x48] sm:$0xf] %v4582_v7  ;;  %v4006_v2 = vmax.f32 %v3974_v52, 0.0  ;;  %v3977_v58 = vadd.f32 %v9365_v10, %v11845_v39  ;;  %v3975_v3 = vadd.f32 %v11845_v39, %v3847_v28  ;;  %9425 = vmatpush3.bf16.msra.mxu1 %v10360_v38  ;;  %v11934_v52 = vld [vmem:[%s13049_s3 + $0xc0] sm:$0xff]  }
 0x327   : > { %4576 = vst [vmem:[#allocation3 + $0x3c] sm:$0xf] %v4575_v59  ;;  %v4320_v50 = vshrl.u32 %v8640_v18, 16  ;;  %v4323_v57 = vshll.u32 %v8640_v18, 16  ;;  %v4303_v9 = vshrl.u32 %v8638_v26, 16  ;;  %v4306_v32 = vshll.u32 %v8638_v26, 16  ;;  %9426 = vmatprep.subr.bf16.mxu1 %v10365_v22 }
 0x328   : > { %v9368_v1 = vpop.f32.mrb[16].mxu0  ;;  %v8643_v55 = vpack.c.bf16 %v4008_v60, %v4008_v60  ;;  %v8641_v13 = vpack.c.bf16 %v4006_v2, %v4006_v2  ;;  %v4009_v14 = vmax.f32 %v3977_v58, 0.0  ;;  %v4007_v21 = vmax.f32 %v3975_v3, 0.0  ;;  %v4588_v33 = vld [vmem:[#allocation3 + $0x54] sm:$0xf] }
 0x329   : > { %v3860_v6 = vpop.f32.mrb[17].mxu0  ;;  %v4322_v53 = vrot.slane %v4320_v50, 7  ;;  %v4305_v47 = vrot.slane %v4303_v9, 7  ;;  %v3980_v24 = vadd.f32 %v9368_v1, %v11845_v39  ;;  %v4592_v1 = vld [vmem:[#allocation3 + $0x5c] sm:$0x1] }
 0x32a   : > { %v3978_v31 = vadd.f32 %v11845_v39, %v3860_v6  ;;  %v9369_v20 = vpop.f32.mrb[18].mxu0  ;;  %v4346_v38 = vshrl.u32 %v8643_v55, 16  ;;  %v4349_v62 = vshll.u32 %v8643_v55, 16  ;;  %v4329_v0 = vshrl.u32 %v8641_v13, 16  ;;  %9427 = vmatpush3.bf16.msra.mxu1 %v10365_v22 }
 0x32b   : > { %v4332_v19 = vshll.u32 %v8641_v13, 16  ;;  %v3863_v16 = vpop.f32.mrb[19].mxu0  ;;  %v4325_v43 = vor.u32 %v4323_v57, %v4322_v53  ;;  %v4327_v17 = vrot.slane %v4322_v53, 4  ;;  %v4308_v51 = vor.u32 %v4306_v32, %v4305_v47  ;;  %v11938_v42 = vld [vmem:[#allocation3 + $0x30] sm:$0xff]   ;;  %9428 = vmatprep.subr.bf16.mxu1 %v10370_v34  ;;  %v4599_v32 = vld [vmem:[#allocation3 + $0x68] sm:$0x1] }
 0x32c   : > { %v4310_v11 = vrot.slane %v4305_v47, 4  ;;  %v4348_v10 = vrot.slane %v4346_v38, 7  ;;  %v4331_v29 = vrot.slane %v4329_v0, 7  ;;  %v8644_v15 = vpack.c.bf16 %v4009_v14, %v4009_v14  ;;  %v11936_v41 = vld [vmem:[#allocation3 + $0x24] sm:$0xff]  }
 0x32d   : > { %v8642_v63 = vpack.c.bf16 %v4007_v21, %v4007_v21  ;;  %v4326_v28 = vsel %vm10635_vm7, %v4318_v45, %v4325_v43  ;;  %v4586_v46 = vsel %vm10600_vm2, %v4327_v17, %v4585_v23  ;;  %v4309_v36 = vsel %vm10635_vm7, %v4301_v37, %v4308_v51  ;;  %9394 = vmatprep.mubr.msk.bf16.mxu1 %vm1056_vm9, %v11936_v41 }
 0x32e   : > { %v4579_v25 = vsel %vm10600_vm2, %v4310_v11, %v4578_v27  ;;  %4584 = vst.msk [vmem:[#allocation3 + $0x4c] sm:$0xf] %vm256_vm4, %v4326_v28  ;;  %4587 = vst [vmem:[#allocation3 + $0x50] sm:$0x1] %v4586_v46  ;;  %v4351_v61 = vor.u32 %v4349_v62, %v4348_v10  ;;  %v4352_v40 = vrot.slane %v4348_v10, 4  ;;  %v4334_v45 = vor.u32 %v4332_v19, %v4331_v29 }
 0x32f   : > { %4577 = vst.msk [vmem:[#allocation3 + $0x40] sm:$0xf] %vm256_vm4, %v4309_v36  ;;  %4580 = vst [vmem:[#allocation3 + $0x44] sm:$0x1] %v4579_v25  ;;  %v4335_v49 = vrot.slane %v4331_v29, 4  ;;  %v4354_v8 = vshrl.u32 %v8644_v15, 16  ;;  %9395 = vmatmul.mubr.msk.bf16.gmra.mrb[4].mxu1 %vm1056_vm9, %v11938_v42  ;;  %v3981_v50 = vadd.f32 %v9369_v20, %v11845_v39  ;;  %v3979_v57 = vadd.f32 %v11845_v39, %v3863_v16 }
 0x330   : > { %v4357_v56 = vshll.u32 %v8644_v15, 16  ;;  %v4337_v22 = vshrl.u32 %v8642_v63, 16  ;;  %v4340_v37 = vshll.u32 %v8642_v63, 16  ;;  %v9372_v7 = vpop.f32.mrb[20].mxu0  ;;  %v4596_v59 = vsel %vm10651_vm8, %v4351_v61, %v4595_v35  ;;  %9429 = vmatpush3.bf16.msra.mxu1 %v10370_v34  ;;  %v4609_v16 = vld [vmem:[#allocation3 + $0x78] sm:$0xf] }
 0x331   : > { %v4589_v18 = vsel %vm10651_vm8, %v4334_v45, %v4588_v33  ;;  %v4012_v26 = vmax.f32 %v3980_v24, 0.0  ;;  %v4010_v60 = vmax.f32 %v3978_v31, 0.0  ;;  %v3876_v2 = vpop.f32.mrb[21].mxu0  ;;  %4597 = vst [vmem:[#allocation3 + $0x60] sm:$0xf] %v4596_v59  ;;  %v4356_v58 = vrot.slane %v4354_v8, 7  ;;  %9462 = vmatprep.subr.bf16.mxu1 %v11934_v52 }
 0x332   : > { %4590 = vst [vmem:[#allocation3 + $0x54] sm:$0xf] %v4589_v18  ;;  %v4339_v3 = vrot.slane %v4337_v22, 7  ;;  %v9373_v9 = vpop.f32.mrb[22].mxu0  ;;  %v3984_v13 = vadd.f32 %v9372_v7, %v11845_v39  ;;  %v3982_v14 = vadd.f32 %v11845_v39, %v3876_v2  ;;  %v4013_v11 = vmax.f32 %v3981_v50, 0.0 }
 0x333   : > { %v8647_v23 = vpack.c.bf16 %v4012_v26, %v4012_v26  ;;  %v8645_v55 = vpack.c.bf16 %v4010_v60, %v4010_v60  ;;  %v3879_v21 = vpop.f32.mrb[23].mxu0  ;;  %v4359_v6 = vor.u32 %v4357_v56, %v4356_v58  ;;  %v4361_v34 = vrot.slane %v4356_v58, 4  ;;  %v4602_v10 = vld [vmem:[#allocation3 + $0x6c] sm:$0xf] }
 0x334   : > { %v4342_v53 = vor.u32 %v4340_v37, %v4339_v3  ;;  %v4344_v47 = vrot.slane %v4339_v3, 4  ;;  %v4011_v35 = vmax.f32 %v3979_v57, 0.0  ;;  %v4016_v29 = vmax.f32 %v3984_v13, 0.0  ;;  %v4613_v57 = vld [vmem:[#allocation3 + $0x80] sm:$0x1] }
 0x335   : > { %v4380_v27 = vshrl.u32 %v8647_v23, 16  ;;  %v4383_v24 = vshll.u32 %v8647_v23, 16  ;;  %v4363_v31 = vshrl.u32 %v8645_v55, 16  ;;  %v4366_v20 = vshll.u32 %v8645_v55, 16  ;;  %v11983_v33 = vld [vmem:[#allocation3 + $0x48] sm:$0xff]  }
 0x336   : > { %v4360_v38 = vsel %vm10635_vm7, %v4352_v40, %v4359_v6  ;;  %v4600_v62 = vsel %vm10600_vm2, %v4361_v34, %v4599_v32  ;;  %v4343_v0 = vsel %vm10635_vm7, %v4335_v49, %v4342_v53  ;;  %v4593_v19 = vsel %vm10600_vm2, %v4344_v47, %v4592_v1  ;;  %v11975_v43 = vld [vmem:[#allocation3 + $0x3c] sm:$0xff]  }
 0x337   : > { %4598 = vst.msk [vmem:[#allocation3 + $0x64] sm:$0xf] %vm256_vm4, %v4360_v38  ;;  %4601 = vst [vmem:[#allocation3 + $0x68] sm:$0x1] %v4600_v62  ;;  %v11979_v17 = vrot.slane %v4380_v27, 7  ;;  %v11981_v51 = vrot.slane %v4363_v31, 7  ;;  %v3985_v63 = vadd.f32 %v9373_v9, %v11845_v39  ;;  %v3983_v28 = vadd.f32 %v11845_v39, %v3879_v21  ;;  %9398 = vmatprep.mubr.msk.bf16.mxu1 %vm1056_vm9, %v11975_v43 }
 0x338   : > { %4591 = vst.msk [vmem:[#allocation3 + $0x58] sm:$0xf] %vm256_vm4, %v4343_v0  ;;  %4594 = vst [vmem:[#allocation3 + $0x5c] sm:$0x1] %v4593_v19  ;;  %v4014_v15 = vmax.f32 %v3982_v14, 0.0  ;;  %v9376_v46 = vpop.f32.mrb[24].mxu0  ;;  %9399 = vmatmul.mubr.msk.bf16.gmra.mrb[8].mxu1 %vm1056_vm9, %v11983_v33  ;;  %v8648_v49 = vpack.c.bf16 %v4013_v11, %v4013_v11  ;;  %v8646_v8 = vpack.c.bf16 %v4011_v35, %v4011_v35 }
 0x339   : > { %v4385_v36 = vor.u32 %v4383_v24, %v11979_v17  ;;  %v4386_v25 = vrot.slane %v11979_v17, 4  ;;  %v4368_v61 = vor.u32 %v4366_v20, %v11981_v51  ;;  %v4369_v40 = vrot.slane %v11981_v51, 4  ;;  %v3892_v45 = vpop.f32.mrb[25].mxu0  ;;  %v4606_v9 = vld [vmem:[#allocation3 + $0x74] sm:$0x1] }
 0x33a   : > { %v8651_v56 = vpack.c.bf16 %v4016_v29, %v4016_v29  ;;  %v8649_v22 = vpack.c.bf16 %v4014_v15, %v4014_v15  ;;  %v11995_v37 = vpop.f32.mrb[26].mxu0  ;;  %v4017_v18 = vmax.f32 %v3985_v63, 0.0  ;;  %v4015_v26 = vmax.f32 %v3983_v28, 0.0  ;;  %v4623_v21 = vld [vmem:[#allocation3 + $0x90] sm:$0xf] }
 0x33b   : > { %v4610_v7 = vsel %vm10651_vm8, %v4385_v36, %v4609_v16  ;;  %v4603_v59 = vsel %vm10651_vm8, %v4368_v61, %v4602_v10  ;;  %v3895_v60 = vpop.f32.mrb[27].mxu0  ;;  %v4388_v2 = vshrl.u32 %v8648_v49, 16  ;;  %v4391_v58 = vshll.u32 %v8648_v49, 16  ;;  %v4616_v16 = vld [vmem:[#allocation3 + $0x84] sm:$0xf] }
 0x33c   : > { %4611 = vst [vmem:[#allocation3 + $0x78] sm:$0xf] %v4610_v7  ;;  %4604 = vst [vmem:[#allocation3 + $0x6c] sm:$0xf] %v4603_v59  ;;  %v4371_v3 = vshrl.u32 %v8646_v8, 16  ;;  %v4374_v50 = vshll.u32 %v8646_v8, 16  ;;  %v8652_v6 = vpack.c.bf16 %v4017_v18, %v4017_v18  ;;  %v8650_v34 = vpack.c.bf16 %v4015_v26, %v4015_v26 }
 0x33d   : > { %v4414_v32 = vshrl.u32 %v8651_v56, 16  ;;  %v4417_v1 = vshll.u32 %v8651_v56, 16  ;;  %v4397_v23 = vshrl.u32 %v8649_v22, 16  ;;  %v4400_v55 = vshll.u32 %v8649_v22, 16 }
 0x33e   : > { %v4390_v13 = vrot.slane %v4388_v2, 7  ;;  %v4373_v14 = vrot.slane %v4371_v3, 7  ;;  %v3988_v24 = vadd.f32 %v9376_v46, %v11845_v39  ;;  %v3986_v31 = vadd.f32 %v11845_v39, %v3892_v45  ;;  %v12007_v20 = vld [vmem:[#allocation3 + $0x60] sm:$0xff]  }
 0x33f   : > { %v12001_v53 = vld [vmem:[#allocation3 + $0x54] sm:$0xff]   ;;  %v4416_v47 = vrot.slane %v4414_v32, 7  ;;  %v12003_v27 = vrot.slane %v4397_v23, 7  ;;  %v9380_v17 = vpop.f32.mrb[28].mxu0  ;;  %v4422_v45 = vshrl.u32 %v8652_v6, 16  ;;  %v4425_v49 = vshll.u32 %v8652_v6, 16 }
 0x340   : > { %v4393_v38 = vor.u32 %v4391_v58, %v4390_v13  ;;  %v4395_v62 = vrot.slane %v4390_v13, 4  ;;  %v4376_v0 = vor.u32 %v4374_v50, %v4373_v14  ;;  %v4378_v19 = vrot.slane %v4373_v14, 4  ;;  %9402 = vmatprep.mubr.msk.bf16.mxu1 %vm1056_vm9, %v12001_v53  ;;  %v3908_v29 = vpop.f32.mrb[29].mxu0  ;;  %v4627_v58 = vld [vmem:[#allocation3 + $0x98] sm:$0x1] }
 0x341   : > { %v4419_v51 = vor.u32 %v4417_v1, %v4416_v47  ;;  %v4420_v11 = vrot.slane %v4416_v47, 4  ;;  %v4402_v35 = vor.u32 %v4400_v55, %v12003_v27  ;;  %v4403_v10 = vrot.slane %v12003_v27, 4  ;;  %9403 = vmatmul.mubr.msk.bf16.gmra.mrb[12].mxu1 %vm1056_vm9, %v12007_v20  ;;  %v12023_v36 = vpop.f32.mrb[30].mxu0  ;;  %v4620_v23 = vld [vmem:[#allocation3 + $0x8c] sm:$0x1] }
 0x342   : > { %v4394_v15 = vsel %vm10635_vm7, %v4386_v25, %v4393_v38  ;;  %v4614_v63 = vsel %vm10600_vm2, %v4395_v62, %v4613_v57  ;;  %v4377_v28 = vsel %vm10635_vm7, %v4369_v40, %v4376_v0  ;;  %v4607_v46 = vsel %vm10600_vm2, %v4378_v19, %v4606_v9  ;;  %v12031_v40 = vpop.f32.mrb[31].mxu0  ;;  %v4637_v47 = vld [vmem:[#allocation3 + $0xa8] sm:$0xf]  ;;  %v4630_v0 = vld [vmem:[#allocation3 + $0x9c] sm:$0xf] }
 0x343   : > { %4612 = vst.msk [vmem:[#allocation3 + $0x7c] sm:$0xf] %vm256_vm4, %v4394_v15  ;;  %4615 = vst [vmem:[#allocation3 + $0x80] sm:$0x1] %v4614_v63  ;;  %v4624_v25 = vsel %vm10651_vm8, %v4419_v51, %v4623_v21  ;;  %v4617_v61 = vsel %vm10651_vm8, %v4402_v35, %v4616_v16  ;;  %v4405_v8 = vshrl.u32 %v8650_v34, 16  ;;  %v4408_v56 = vshll.u32 %v8650_v34, 16 }
 0x344   : > { %4605 = vst.msk [vmem:[#allocation3 + $0x70] sm:$0xf] %vm256_vm4, %v4377_v28  ;;  %4608 = vst [vmem:[#allocation3 + $0x74] sm:$0x1] %v4607_v46  ;;  %v4020_v22 = vmax.f32 %v3988_v24, 0.0  ;;  %v4018_v7 = vmax.f32 %v3986_v31, 0.0  ;;  %v3989_v18 = vadd.f32 %v11995_v37, %v11845_v39  ;;  %v3987_v26 = vadd.f32 %v11845_v39, %v3895_v60 }
 0x345   : > { %4625 = vst [vmem:[#allocation3 + $0x90] sm:$0xf] %v4624_v25  ;;  %4618 = vst [vmem:[#allocation3 + $0x84] sm:$0xf] %v4617_v61  ;;  %v4424_v59 = vrot.slane %v4422_v45, 7  ;;  %v3992_v2 = vadd.f32 %v9380_v17, %v11845_v39  ;;  %v4407_v3 = vrot.slane %v4405_v8, 7  ;;  %v3990_v9 = vadd.f32 %v11845_v39, %v3908_v29 }
 0x346   : > { %v8655_v50 = vpack.c.bf16 %v4020_v22, %v4020_v22  ;;  %v8653_v57 = vpack.c.bf16 %v4018_v7, %v4018_v7  ;;  %v4021_v55 = vmax.f32 %v3989_v18, 0.0  ;;  %v4019_v13 = vmax.f32 %v3987_v26, 0.0 }
 0x347   : > { %v4427_v32 = vor.u32 %v4425_v49, %v4424_v59  ;;  %v4429_v1 = vrot.slane %v4424_v59, 4  ;;  %v4410_v14 = vor.u32 %v4408_v56, %v4407_v3  ;;  %v4412_v21 = vrot.slane %v4407_v3, 4  ;;  %v4641_v59 = vld [vmem:[#allocation3 + $0xb0] sm:$0x1] }
 0x348   : > { %v4448_v6 = vshrl.u32 %v8655_v50, 16  ;;  %v4451_v34 = vshll.u32 %v8655_v50, 16  ;;  %v4431_v27 = vshrl.u32 %v8653_v57, 16  ;;  %v4434_v24 = vshll.u32 %v8653_v57, 16  ;;  %v4634_v50 = vld [vmem:[#allocation3 + $0xa4] sm:$0x1] }
 0x349   : > { %v4428_v37 = vsel %vm10635_vm7, %v4420_v11, %v4427_v32  ;;  %v4628_v60 = vsel %vm10600_vm2, %v4429_v1, %v4627_v58  ;;  %v4411_v31 = vsel %vm10635_vm7, %v4403_v10, %v4410_v14  ;;  %v4621_v38 = vsel %vm10600_vm2, %v4412_v21, %v4620_v23 }
 0x34a   : > { %4626 = vst.msk [vmem:[#allocation3 + $0x94] sm:$0xf] %vm256_vm4, %v4428_v37  ;;  %4629 = vst [vmem:[#allocation3 + $0x98] sm:$0x1] %v4628_v60  ;;  %v4450_v62 = vrot.slane %v4448_v6, 7  ;;  %v8656_v19 = vpack.c.bf16 %v4021_v55, %v4021_v55  ;;  %v4433_v17 = vrot.slane %v4431_v27, 7  ;;  %v8654_v51 = vpack.c.bf16 %v4019_v13, %v4019_v13 }
 0x34b   : > { %v12047_v16 = vld [vmem:[#allocation3 + $0x6c] sm:$0xff]   ;;  %4619 = vst.msk [vmem:[#allocation3 + $0x88] sm:$0xf] %vm256_vm4, %v4411_v31  ;;  %4622 = vst [vmem:[#allocation3 + $0x8c] sm:$0x1] %v4621_v38  ;;  %v4024_v11 = vmax.f32 %v3992_v2, 0.0  ;;  %v3993_v26 = vadd.f32 %v12023_v36, %v11845_v39  ;;  %v3991_v2 = vadd.f32 %v11845_v39, %v12031_v40 }
 0x34c   : > { %v4022_v35 = vmax.f32 %v3990_v9, 0.0  ;;  %v12050_v29 = vld [vmem:[#allocation3 + $0x78] sm:$0xff]   ;;  %v4453_v15 = vor.u32 %v4451_v34, %v4450_v62  ;;  %v4454_v63 = vrot.slane %v4450_v62, 4  ;;  %v4456_v10 = vshrl.u32 %v8656_v19, 16  ;;  %9406 = vmatprep.mubr.msk.bf16.mxu1 %vm1056_vm9, %v12047_v16  ;;  %v4651_v34 = vld [vmem:[#allocation3 + $0xc0] sm:$0xf] }
 0x34d   : > { %v4459_v28 = vshll.u32 %v8656_v19, 16  ;;  %v4436_v46 = vor.u32 %v4434_v24, %v4433_v17  ;;  %v4437_v25 = vrot.slane %v4433_v17, 4  ;;  %v4439_v61 = vshrl.u32 %v8654_v51, 16  ;;  %9407 = vmatmul.mubr.msk.bf16.gmra.mrb[16].mxu1 %vm1056_vm9, %v12050_v29  ;;  %v4644_v24 = vld [vmem:[#allocation3 + $0xb4] sm:$0xf] }
 0x34e   : > { %v4442_v45 = vshll.u32 %v8654_v51, 16  ;;  %v4638_v49 = vsel %vm10651_vm8, %v4453_v15, %v4637_v47  ;;  %v4458_v8 = vrot.slane %v4456_v10, 7  ;;  %v8659_v56 = vpack.c.bf16 %v4024_v11, %v4024_v11  ;;  %v4655_v15 = vld [vmem:[#allocation3 + $0xc8] sm:$0x1] }
 0x34f   : > { %v8657_v22 = vpack.c.bf16 %v4022_v35, %v4022_v35  ;;  %4639 = vst [vmem:[#allocation3 + $0xa8] sm:$0xf] %v4638_v49  ;;  %v4631_v7 = vsel %vm10651_vm8, %v4436_v46, %v4630_v0  ;;  %v4441_v18 = vrot.slane %v4439_v61, 7  ;;  %v4025_v21 = vmax.f32 %v3993_v26, 0.0  ;;  %v4648_v61 = vld [vmem:[#allocation3 + $0xbc] sm:$0x1] }
 0x350   : > { %4632 = vst [vmem:[#allocation3 + $0x9c] sm:$0xf] %v4631_v7  ;;  %v4461_v58 = vor.u32 %v4459_v28, %v4458_v8  ;;  %v4463_v3 = vrot.slane %v4458_v8, 4  ;;  %v4482_v57 = vshrl.u32 %v8659_v56, 16  ;;  %v4485_v9 = vshll.u32 %v8659_v56, 16 }
 0x351   : > { %v4444_v32 = vor.u32 %v4442_v45, %v4441_v18  ;;  %v4446_v1 = vrot.slane %v4441_v18, 4  ;;  %v4465_v23 = vshrl.u32 %v8657_v22, 16  ;;  %v4468_v55 = vshll.u32 %v8657_v22, 16  ;;  %v12075_v47 = vld [vmem:[#allocation3 + $0x90] sm:$0xff]  }
 0x352   : > { %v4462_v13 = vsel %vm10635_vm7, %v4454_v63, %v4461_v58  ;;  %v4642_v14 = vsel %vm10600_vm2, %v4463_v3, %v4641_v59  ;;  %v4484_v36 = vrot.slane %v4482_v57, 7  ;;  %v12068_v6 = vld [vmem:[#allocation3 + $0x84] sm:$0xff]   ;;  %v4023_v60 = vmax.f32 %v3991_v2, 0.0  ;;  %v12159_v57 = vld [vmem:[#allocation3 + $0x38] sm:$0x1] }
 0x353   : > { %4640 = vst.msk [vmem:[#allocation3 + $0xac] sm:$0xf] %vm256_vm4, %v4462_v13  ;;  %4643 = vst [vmem:[#allocation3 + $0xb0] sm:$0x1] %v4642_v14  ;;  %v4445_v39 = vsel %vm10635_vm7, %v4437_v25, %v4444_v32  ;;  %v4635_v40 = vsel %vm10600_vm2, %v4446_v1, %v4634_v50  ;;  %v4467_v37 = vrot.slane %v4465_v23, 7  ;;  %v8660_v31 = vpack.c.bf16 %v4025_v21, %v4025_v21  ;;  %v10374_v2 = vld [vmem:[#allocation3] sm:$0xff]  }
 0x354   : > { %4633 = vst.msk [vmem:[#allocation3 + $0xa0] sm:$0xf] %vm256_vm4, %v4445_v39  ;;  %4636 = vst [vmem:[#allocation3 + $0xa4] sm:$0x1] %v4635_v40  ;;  %v4487_v27 = vor.u32 %v4485_v9, %v4484_v36  ;;  %9410 = vmatprep.mubr.msk.bf16.mxu1 %vm1056_vm9, %v12068_v6  ;;  %v8658_v62 = vpack.c.bf16 %v4023_v60, %v4023_v60  ;;  %v4488_v28 = vrot.slane %v4484_v36, 4  ;;  %v10378_v3 = vld [vmem:[%s13049_s3 + $0xd8] sm:$0xff]  }
 0x355   : > { %v4470_v38 = vor.u32 %v4468_v55, %v4467_v37  ;;  %9411 = vmatmul.mubr.msk.bf16.gmra.mrb[20].mxu1 %vm1056_vm9, %v12075_v47  ;;  %v4490_v19 = vshrl.u32 %v8660_v31, 16  ;;  %v4493_v35 = vshll.u32 %v8660_v31, 16  ;;  %v4471_v45 = vrot.slane %v4467_v37, 4  ;;  %v6727_v50 = vld [vmem:[#allocation3 + $0x30] sm:$0xe] }
 0x356   : > { %v4652_v0 = vsel %vm10651_vm8, %v4487_v27, %v4651_v34  ;;  %v4473_v51 = vshrl.u32 %v8658_v62, 16  ;;  %v4476_v10 = vshll.u32 %v8658_v62, 16  ;;  %v12161_v9 = vld [vmem:[#allocation3 + $0x40] sm:$0xf]  ;;  %v12164_v1 = vld [vmem:[#allocation3 + $0x4c] sm:$0xf] }
 0x357   : > { %4653 = vst [vmem:[#allocation3 + $0xc0] sm:$0xf] %v4652_v0  ;;  %v4645_v17 = vsel %vm10651_vm8, %v4470_v38, %v4644_v24  ;;  %v4492_v11 = vrot.slane %v4490_v19, 7  ;;  %v6728_v23 = vld [vmem:[#allocation3 + $0x3c] sm:$0xe]  ;;  %v8474_v36 = vrot.slane %v6727_v50, 9 }
 0x358   : > { %4646 = vst [vmem:[#allocation3 + $0xb4] sm:$0xf] %v4645_v17  ;;  %v4475_v63 = vrot.slane %v4473_v51, 7  ;;  %v6729_v55 = vld [vmem:[#allocation3 + $0x48] sm:$0xe]  ;;  %v6822_v40 = vrot.slane %v12159_v57, 5 }
 0x359   : > { %v4495_v46 = vor.u32 %v4493_v35, %v4492_v11  ;;  %v4497_v25 = vrot.slane %v4492_v11, 4  ;;  %v12166_v13 = vld [vmem:[#allocation3 + $0x44] sm:$0x1]  ;;  %v12168_v14 = vld [vmem:[#allocation3 + $0x50] sm:$0x1]  ;;  %v6826_v34 = vrot.slane %v12161_v9, 5 }
 0x35a   : > { %v4478_v49 = vor.u32 %v4476_v10, %v4475_v63  ;;  %v4480_v8 = vrot.slane %v4475_v63, 4  ;;  %v12092_v7 = vld [vmem:[#allocation3 + $0xa8] sm:$0xff]   ;;  %v12172_v21 = vld [vmem:[#allocation3 + $0x58] sm:$0xf]  ;;  %v12178_v37 = vld [vmem:[#allocation3 + $0x5c] sm:$0x1] }
 0x35b   : > { %v12086_v56 = vld [vmem:[#allocation3 + $0x9c] sm:$0xff]   ;;  %v4496_v12 = vsel %vm10635_vm7, %v4488_v28, %v4495_v46  ;;  %v4656_v22 = vsel %vm10600_vm2, %v4497_v25, %v4655_v15  ;;  %v8475_v27 = vrot.slane %v6728_v23, 9  ;;  %v6833_v24 = vrot.slane %v12164_v1, 5  ;;  %v6730_v31 = vld [vmem:[#allocation3 + $0x54] sm:$0xe] }
 0x35c   : > { %4654 = vst.msk [vmem:[#allocation3 + $0xc4] sm:$0xf] %vm256_vm4, %v4496_v12  ;;  %4657 = vst [vmem:[#allocation3 + $0xc8] sm:$0x1] %v4656_v22  ;;  %v4479_v59 = vsel %vm10635_vm7, %v4471_v45, %v4478_v49  ;;  %v4649_v18 = vsel %vm10600_vm2, %v4480_v8, %v4648_v61  ;;  %9414 = vmatprep.mubr.msk.bf16.mxu1 %vm1056_vm9, %v12086_v56  ;;  %v12183_v38 = vld [vmem:[#allocation3 + $0x64] sm:$0xf] }
 0x35d   : > { %4647 = vst.msk [vmem:[#allocation3 + $0xb8] sm:$0xf] %vm256_vm4, %v4479_v59  ;;  %4650 = vst [vmem:[#allocation3 + $0xbc] sm:$0x1] %v4649_v18  ;;  %9415 = vmatmul.mubr.msk.bf16.gmra.mrb[24].mxu1 %vm1056_vm9, %v12092_v7  ;;  %v6828_v0 = vrot.slane %v6826_v34, 4  ;;  %v6829_v19 = vrot.slane %v12166_v13, 5  ;;  %v6827_v11 = vsel %vm11509_vm15, %v8475_v27, %v6826_v34 }
 0x35e   : > { %v8476_v17 = vrot.slane %v6729_v55, 9  ;;  %v12188_v51 = vld [vmem:[#allocation3 + $0x68] sm:$0x1]  ;;  %v6835_v35 = vrot.slane %v6833_v24, 4  ;;  %v6836_v15 = vrot.slane %v12168_v14, 5  ;;  %v8477_v25 = vrot.slane %v6730_v31, 9 }
 0x35f   : > { %v6731_v63 = vld [vmem:[#allocation3 + $0x60] sm:$0xe]  ;;  %v12195_v10 = vld [vmem:[#allocation3 + $0x70] sm:$0xf]  ;;  %v6830_v28 = vsel %vm11509_vm15, %v6828_v0, %v6829_v19  ;;  %v6840_v61 = vrot.slane %v12172_v21, 5  ;;  %v6843_v59 = vrot.slane %v12178_v37, 5 }
 0x360   : > { %v6834_v46 = vsel %vm11509_vm15, %v8476_v17, %v6833_v24  ;;  %v6732_v45 = vld [vmem:[#allocation3 + $0x6c] sm:$0xe]  ;;  %v12202_v49 = vld [vmem:[#allocation3 + $0x74] sm:$0x1]  ;;  %v12204_v8 = vld [vmem:[#allocation3 + $0x7c] sm:$0xf]  ;;  %v12206_v12 = vcombine.low %v6827_v11, %v6830_v28  ;;  %v6837_v22 = vsel %vm11509_vm15, %v6835_v35, %v6836_v15 }
 0x361   : > { %v6847_v18 = vrot.slane %v12183_v38, 5  ;;  %v6850_v50 = vrot.slane %v12188_v51, 5  ;;  %v12218_v23 = vld [vmem:[#allocation3 + $0x80] sm:$0x1]  ;;  %v6841_v55 = vsel %vm11509_vm15, %v8477_v25, %v6840_v61  ;;  %v10381_v34 = vld [vmem:[%s13049_s3 + $0x30] sm:$0xff]   ;;  %v6861_v0 = vrot.slane %v12204_v8, 5 }
 0x362   : > { %13144 = vst [vmem:[#allocation11_spill] sm:$0xff] %v12206_v12  ;;  %v12230_v27 = vld [vmem:[#allocation3 + $0x8c] sm:$0x1]  ;;  %v6734_v15 = vld [vmem:[#allocation3 + $0x84] sm:$0xe] }
 0x363   : > { %v12106_v58 = vld [vmem:[#allocation3 + $0xc0] sm:$0xff]   ;;  %v6735_v25 = vld [vmem:[#allocation3 + $0x90] sm:$0xe] }
 0x364   : > { %v12104_v26 = vld [vmem:[#allocation3 + $0xb4] sm:$0xff]  }
 0x365   : > { %9418 = vmatprep.mubr.msk.bf16.mxu1 %vm1056_vm9, %v12104_v26 }
 0x366   : > { %9419 = vmatmul.mubr.msk.bf16.gmra.mrb[28].mxu1 %vm1056_vm9, %v12106_v58 }
 0x367   : > { %9430 = vmatprep.mubr.msk.bf16.mxu1 %vm1056_vm9, %v10374_v2  ;;  %v10380_v2 = vld [vmem:[%s13049_s3 + $0x28] sm:$0xff]  }
 0x36e   : > { %9431 = vmatmul.mubr.msk.bf16.vlgmr.msra.gmra.mrb[0].mxu1 %vm1056_vm9, %v11888_v48  ;;  %v12134_v48 = vld [vmem:[%s13049_s3 + $0x20] sm:$0xff]  }
 0x36f   : > { %9463 = vmatpush3.bf16.msra.mxu1 %v11934_v52  ;;  %9434 = vmatprep.mubr.msk.bf16.mxu1 %vm1056_vm9, %v11890_v4  ;;  %v12157_v52 = vld [vmem:[#allocation3 + $0x34] sm:$0xf] }
 0x370   : > { %9464 = vmatprep.subr.bf16.mxu1 %v10376_v44  ;;  %v6819_v32 = vrot.slane %v12157_v52, 5 }
 0x372   : > { %v6821_v39 = vrot.slane %v6819_v32, 4  ;;  %v6820_v60 = vsel %vm11509_vm15, %v8474_v36, %v6819_v32  ;;  %v6733_v32 = vld [vmem:[#allocation3 + $0x78] sm:$0xe]  ;;  %v6849_v36 = vrot.slane %v6847_v18, 4 }
 0x373   : > { %9465 = vmatpush3.bf16.msra.mxu1 %v10376_v44  ;;  %v12215_v44 = vcombine.low %v6834_v46, %v6837_v22  ;;  %v8480_v35 = vrot.slane %v6733_v32, 9  ;;  %v6863_v46 = vrot.slane %v6861_v0, 4  ;;  %v8481_v32 = vrot.slane %v6734_v15, 9  ;;  %v6737_v15 = vld [vmem:[#allocation3 + $0xa8] sm:$0xe] }
 0x374   : > { %9466 = vmatprep.subr.bf16.mxu1 %v10377_v54  ;;  %v6823_v62 = vsel %vm11509_vm15, %v6821_v39, %v6822_v40  ;;  %v8479_v39 = vrot.slane %v6732_v45, 9  ;;  %v6854_v40 = vrot.slane %v12195_v10, 5  ;;  %v6851_v17 = vsel %vm11509_vm15, %v6849_v36, %v6850_v50  ;;  %v6736_v36 = vld [vmem:[#allocation3 + $0x9c] sm:$0xe] }
 0x375   : > { %13145 = vst [vmem:[#allocation12_spill] sm:$0xff] %v12215_v44 }
 0x376   : > { %9435 = vmatmul.mubr.msk.bf16.gmra.mrb[4].mxu1 %vm1056_vm9, %v11936_v41  ;;  %v6856_v11 = vrot.slane %v6854_v40, 4  ;;  %v6855_v45 = vsel %vm11509_vm15, %v8479_v39, %v6854_v40  ;;  %v12270_v39 = vld [vmem:[#allocation3 + $0xb0] sm:$0x1] }
 0x377   : > { %9438 = vmatprep.mubr.msk.bf16.mxu1 %vm1056_vm9, %v11938_v42  ;;  %9467 = vmatpush3.bf16.msra.mxu1 %v10377_v54  ;;  %v6842_v54 = vrot.slane %v6840_v61, 4  ;;  %v12254_v61 = vld [vmem:[#allocation3 + $0xa4] sm:$0x1] }
 0x378   : > { %9468 = vmatprep.subr.bf16.mxu1 %v10378_v3 }
 0x379   : > { %v6844_v24 = vsel %vm11509_vm15, %v6842_v54, %v6843_v59  ;;  %v6862_v59 = vsel %vm11509_vm15, %v8480_v35, %v6861_v0  ;;  %v12263_v54 = vld [vmem:[#allocation3 + $0xac] sm:$0xf]  ;;  %v10382_v0 = vld [vmem:[%s13049_s3 + $0x38] sm:$0xff]  }
 0x37a   : > { %v12243_v19 = vcombine.low %v6841_v55, %v6844_v24 }
 0x37b   : > { %9469 = vmatpush3.bf16.msra.mxu1 %v10378_v3  ;;  %v8478_v3 = vrot.slane %v6731_v63, 9  ;;  %v12247_v63 = vld [vmem:[#allocation3 + $0x98] sm:$0x1] }
 0x37c   : > { %9502 = vmatprep.subr.bf16.mxu1 %v12134_v48  ;;  %13146 = vst [vmem:[#allocation16_spill] sm:$0xff] %v12243_v19  ;;  %v6878_v35 = vrot.slane %v12247_v63, 5 }
 0x37d   : > { %v6848_v31 = vsel %vm11509_vm15, %v8478_v3, %v6847_v18 }
 0x37e   : > { %9439 = vmatmul.mubr.msk.bf16.gmra.mrb[8].mxu1 %vm1056_vm9, %v11975_v43  ;;  %v12249_v28 = vcombine.low %v6848_v31, %v6851_v17  ;;  %v6871_v31 = vrot.slane %v12230_v27, 5 }
 0x37f   : > { %9442 = vmatprep.mubr.msk.bf16.mxu1 %vm1056_vm9, %v11983_v33 }
 0x380   : > { %13147 = vst [vmem:[#allocation17_spill] sm:$0xff] %v12249_v28 }
 0x386   : > { %9443 = vmatmul.mubr.msk.bf16.gmra.mrb[12].mxu1 %vm1056_vm9, %v12001_v53 }
 0x387   : > { %9446 = vmatprep.mubr.msk.bf16.mxu1 %vm1056_vm9, %v12007_v20 }
 0x38e   : > { %9447 = vmatmul.mubr.msk.bf16.gmra.mrb[16].mxu1 %vm1056_vm9, %v12047_v16 }
 0x38f   : > { %9450 = vmatprep.mubr.msk.bf16.mxu1 %vm1056_vm9, %v12050_v29 }
 0x396   : > { %9451 = vmatmul.mubr.msk.bf16.gmra.mrb[20].mxu1 %vm1056_vm9, %v12068_v6 }
 0x397   : > { %9454 = vmatprep.mubr.msk.bf16.mxu1 %vm1056_vm9, %v12075_v47 }
 0x39e   : > { %9455 = vmatmul.mubr.msk.bf16.gmra.mrb[24].mxu1 %vm1056_vm9, %v12086_v56 }
 0x39f   : > { %9458 = vmatprep.mubr.msk.bf16.mxu1 %vm1056_vm9, %v12092_v7 }
 0x3a6   : > { %9459 = vmatmul.mubr.msk.bf16.gmra.mrb[28].mxu1 %vm1056_vm9, %v12104_v26 }
 0x3a7   : > { %9470 = vmatprep.mubr.msk.bf16.mxu1 %vm1056_vm9, %v11890_v4  ;;  %v12190_v4 = vcombine.low %v6820_v60, %v6823_v62  ;;  %v12228_v60 = vld [vmem:[#allocation3 + $0x88] sm:$0xf]  ;;  %v6857_v62 = vrot.slane %v12202_v49, 5 }
 0x3a8   : > { %v6868_v18 = vrot.slane %v12228_v60, 5 }
 0x3a9   : > { %13143 = vst [vmem:[#allocation13_spill] sm:$0xff] %v12190_v4  ;;  %v6858_v22 = vsel %vm11509_vm15, %v6856_v11, %v6857_v62  ;;  %v8482_v62 = vrot.slane %v6735_v25, 9 }
 0x3aa   : > { %v12265_v3 = vcombine.low %v6855_v45, %v6858_v22  ;;  %v6870_v24 = vrot.slane %v6868_v18, 4  ;;  %v6869_v17 = vsel %vm11509_vm15, %v8481_v32, %v6868_v18  ;;  %v8483_v45 = vrot.slane %v6736_v36, 9  ;;  %v12293_v18 = vld [vmem:[#allocation3 + $0xc4] sm:$0xf] }
 0x3ab   : > { %v6889_v22 = vrot.slane %v12263_v54, 5  ;;  %v8484_v36 = vrot.slane %v6737_v15, 9  ;;  %v6739_v15 = vld [vmem:[#allocation3 + $0xc0] sm:$0xe] }
 0x3ac   : > { %13148 = vst [vmem:[#allocation14_spill] sm:$0xff] %v12265_v3 }
 0x3ae   : > { %9471 = vmatmul.mubr.msk.bf16.vlgmr.msra.gmra.mrb[0].mxu1 %vm1056_vm9, %v11936_v41  ;;  %v12241_v41 = vld [vmem:[#allocation3 + $0x94] sm:$0xf] }
 0x3af   : > { %9503 = vmatpush3.bf16.msra.mxu1 %v12134_v48  ;;  %9474 = vmatprep.mubr.msk.bf16.mxu1 %vm1056_vm9, %v11938_v42  ;;  %v6864_v48 = vrot.slane %v12218_v23, 5  ;;  %v12252_v42 = vld [vmem:[#allocation3 + $0xa0] sm:$0xf]  ;;  %v6875_v55 = vrot.slane %v12241_v41, 5 }
 0x3b0   : > { %9504 = vmatprep.subr.bf16.mxu1 %v10380_v2 }
 0x3b1   : > { %v6865_v50 = vsel %vm11509_vm15, %v6863_v46, %v6864_v48  ;;  %v6877_v11 = vrot.slane %v6875_v55, 4  ;;  %v12282_v46 = vld [vmem:[#allocation3 + $0xb8] sm:$0xf]  ;;  %v6872_v48 = vsel %vm11509_vm15, %v6870_v24, %v6871_v31  ;;  %v6876_v25 = vsel %vm11509_vm15, %v8482_v62, %v6875_v55  ;;  %v6738_v62 = vld [vmem:[#allocation3 + $0xb4] sm:$0xe] }
 0x3b2   : > { %v12272_v40 = vcombine.low %v6862_v59, %v6865_v50  ;;  %v12291_v59 = vld [vmem:[#allocation3 + $0xbc] sm:$0x1]  ;;  %v12295_v50 = vcombine.low %v6869_v17, %v6872_v48  ;;  %v6885_v24 = vrot.slane %v12254_v61, 5  ;;  %v6892_v31 = vrot.slane %v12270_v39, 5  ;;  %v12308_v17 = vld [vmem:[%s13049_s3 + $0x80] sm:$0xff]  }
 0x3b3   : > { %9505 = vmatpush3.bf16.msra.mxu1 %v10380_v2  ;;  %v6882_v2 = vrot.slane %v12252_v42, 5  ;;  %v6879_v32 = vsel %vm11509_vm15, %v6877_v11, %v6878_v35  ;;  %v12310_v11 = vld [vmem:[#allocation3 + $0xc8] sm:$0x1]  ;;  %v8485_v3 = vrot.slane %v6738_v62, 9 }
 0x3b4   : > { %13149 = vst [vmem:[#allocation15_spill] sm:$0xff] %v12272_v40  ;;  %9506 = vmatprep.subr.bf16.mxu1 %v10381_v34  ;;  %13150 = vst [vmem:[#allocation19_spill] sm:$0xff] %v12295_v50  ;;  %v12302_v55 = vcombine.low %v6876_v25, %v6879_v32  ;;  %v6890_v25 = vsel %vm11509_vm15, %v8484_v36, %v6889_v22 }
 0x3b5   : > { %v6884_v40 = vrot.slane %v6882_v2, 4  ;;  %v6883_v35 = vsel %vm11509_vm15, %v8483_v45, %v6882_v2  ;;  %v6899_v45 = vrot.slane %v12291_v59, 5 }
 0x3b6   : > { %9475 = vmatmul.mubr.msk.bf16.gmra.mrb[4].mxu1 %vm1056_vm9, %v11975_v43  ;;  %13151 = vst [vmem:[#allocation20_spill] sm:$0xff] %v12302_v55  ;;  %v6891_v43 = vrot.slane %v6889_v22, 4  ;;  %v7228_v55 = vrot.slane %v12293_v18, 5 }
 0x3b7   : > { %9478 = vmatprep.mubr.msk.bf16.mxu1 %vm1056_vm9, %v11983_v33  ;;  %9507 = vmatpush3.bf16.msra.mxu1 %v10381_v34  ;;  %v6886_v33 = vsel %vm11509_vm15, %v6884_v40, %v6885_v24  ;;  %v6896_v34 = vrot.slane %v12282_v46, 5  ;;  %v8530_v40 = vrot.slane %v6739_v15, 9  ;;  %v5454_v15 = vld [vmem:[#allocation3 + $0xc] sm:$0xf] }
 0x3b8   : > { %9508 = vmatprep.subr.bf16.mxu1 %v10382_v0  ;;  %v12317_v48 = vcombine.low %v6883_v35, %v6886_v33  ;;  %v6893_v32 = vsel %vm11509_vm15, %v6891_v43, %v6892_v31  ;;  %v7230_v24 = vrot.slane %v7228_v55, 4  ;;  %v7231_v35 = vrot.slane %v12310_v11, 5  ;;  %v12349_v33 = vld [vmem:[#allocation3 + $0x4] sm:$0xf] }
 0x3b9   : > { %v12324_v50 = vcombine.low %v6890_v25, %v6893_v32  ;;  %v6898_v2 = vrot.slane %v6896_v34, 4  ;;  %v6897_v22 = vsel %vm11509_vm15, %v8485_v3, %v6896_v34  ;;  %v7229_v31 = vsel %vm11509_vm15, %v8530_v40, %v7228_v55  ;;  %v5451_v3 = vld [vmem:[#allocation3] sm:$0xf]  ;;  %v5457_v25 = vld [vmem:[#allocation3 + $0x18] sm:$0xf] }
 0x3ba   : > { %13152 = vst [vmem:[#allocation18_spill] sm:$0xff] %v12317_v48  ;;  %v5509_v55 = vshll.u32 %v5451_v3, 16  ;;  %v5515_v34 = vshll.u32 %v12349_v33, 16  ;;  %v5533_v32 = vshll.u32 %v5454_v15, 16 }
 0x3bb   : > { %13153 = vst [vmem:[#allocation21_spill] sm:$0xff] %v12324_v50  ;;  %9509 = vmatpush3.bf16.msra.mxu1 %v10382_v0  ;;  %v6900_v36 = vsel %vm11509_vm15, %v6898_v2, %v6899_v45  ;;  %v7232_v0 = vsel %vm11509_vm15, %v7230_v24, %v7231_v35  ;;  %v12359_v2 = vld [vmem:[#allocation3 + $0x1c] sm:$0xf]  ;;  %v12365_v35 = vld [vmem:[#allocation3 + $0x8] sm:$0x1] }
 0x3bc   : > { %9542 = vmatprep.subr.bf16.mxu1 %v12308_v17  ;;  %v12333_v43 = vcombine.low %v6897_v22, %v6900_v36  ;;  %v12341_v62 = vcombine.low %v7229_v31, %v7232_v0  ;;  %13157 = vst [vmem:[#allocation8_spill] sm:$0xff] %v12359_v2  ;;  %v5511_v40 = vrot.slane %v5509_v55, 5  ;;  %13159 = vst [vmem:[#allocation9_spill] sm:$0xff] %v12365_v35  ;;  %v5554_v31 = vshrl.u32 %v5457_v25, 16 }
 0x3bd   : > { %v5557_v0 = vshll.u32 %v5457_v25, 16  ;;  %v5525_v25 = vshll.u32 %v12365_v35, 16  ;;  %v5535_v50 = vrot.slane %v5533_v32, 5 }
 0x3be   : > { %13154 = vst [vmem:[#allocation23_spill] sm:$0xff] %v12333_v43  ;;  %9479 = vmatmul.mubr.msk.bf16.gmra.mrb[8].mxu1 %vm1056_vm9, %v12001_v53  ;;  %13155 = vst [vmem:[#allocation22_spill] sm:$0xff] %v12341_v62  ;;  %v5506_v53 = vshrl.u32 %v5451_v3, 16  ;;  %v5563_v3 = vshll.u32 %v12359_v2, 16  ;;  %v5556_v28 = vrot.slane %v5554_v31, 4 }
 0x3bf   : > { %9482 = vmatprep.mubr.msk.bf16.mxu1 %vm1056_vm9, %v12007_v20  ;;  %v5519_v20 = vshrl.u32 %v12349_v33, 16  ;;  %v5559_v19 = vrot.slane %v5557_v0, 5 }
 0x3c0   : > { %v5508_v45 = vrot.slane %v5506_v53, 4  ;;  %v5567_v53 = vshrl.u32 %v12359_v2, 16  ;;  %v12381_v44 = vrot.slane %v5563_v3, 5 }
 0x3c1   : > { %v5521_v24 = vrot.slane %v5519_v20, 4  ;;  %v5560_v31 = vor.u32 %v5559_v19, %v5556_v28  ;;  %v5611_v28 = vshll.u32 %v12157_v52, 16 }
 0x3c2   : > { %v5512_v62 = vor.u32 %v5511_v40, %v5508_v45  ;;  %v5527_v40 = vrot.slane %v5525_v25, 5 }
 0x3c3   : > { %v5561_v25 = vrot.slane %v5560_v31, 4  ;;  %v12408_v5 = vrot.slane %v5611_v28, 5 }
 0x3c6   : > { %9483 = vmatmul.mubr.msk.bf16.gmra.mrb[12].mxu1 %vm1056_vm9, %v12047_v16  ;;  %v12357_v16 = vld [vmem:[#allocation3 + $0x10] sm:$0xf] }
 0x3c7   : > { %9486 = vmatprep.mubr.msk.bf16.mxu1 %vm1056_vm9, %v12050_v29  ;;  %13156 = vst [vmem:[#allocation7_spill] sm:$0xff] %v12357_v16  ;;  %v5530_v29 = vshrl.u32 %v5454_v15, 16  ;;  %v5539_v22 = vshll.u32 %v12357_v16, 16  ;;  %v5543_v36 = vshrl.u32 %v12357_v16, 16 }
 0x3c9   : > { %v5532_v55 = vrot.slane %v5530_v29, 4  ;;  %v5545_v48 = vrot.slane %v5543_v36, 4  ;;  %v12390_v36 = vld [vmem:[#allocation3 + $0x20] sm:$0x1] }
 0x3ca   : > { %13161 = vst [vmem:[#allocation26_spill] sm:$0xff] %v12390_v36 }
 0x3cb   : > { %v5536_v16 = vor.u32 %v5535_v50, %v5532_v55 }
 0x3cd   : > { %v5537_v55 = vrot.slane %v5536_v16, 4 }
 0x3ce   : > { %9487 = vmatmul.mubr.msk.bf16.gmra.mrb[16].mxu1 %vm1056_vm9, %v12068_v6  ;;  %v12361_v6 = vrot.slane %v5515_v34, 5  ;;  %v5460_v34 = vld [vmem:[#allocation3 + $0x24] sm:$0xf] }
 0x3cf   : > { %9490 = vmatprep.mubr.msk.bf16.mxu1 %vm1056_vm9, %v12075_v47  ;;  %v12363_v47 = vld [vmem:[#allocation3 + $0x28] sm:$0xf]  ;;  %v5578_v29 = vshrl.u32 %v5460_v34, 16  ;;  %v5581_v12 = vshll.u32 %v5460_v34, 16 }
 0x3d0   : > { %13158 = vst [vmem:[#allocation10_spill] sm:$0xff] %v12363_v47  ;;  %v5587_v20 = vshll.u32 %v12363_v47, 16  ;;  %v5591_v15 = vshrl.u32 %v12363_v47, 16  ;;  %v5522_v43 = vor.u32 %v5521_v24, %v12361_v6  ;;  %v5513_v47 = vrot.slane %v5512_v62, 4  ;;  %v5463_v24 = vld [vmem:[#allocation3 + $0x30] sm:$0xf] }
 0x3d1   : > { %v5580_v3 = vrot.slane %v5578_v29, 4  ;;  %v5605_v62 = vshll.u32 %v5463_v24, 16 }
 0x3d2   : > { %v12383_v4 = vrot.slane %v5587_v20, 5  ;;  %v5593_v2 = vrot.slane %v5591_v15, 4  ;;  %v5523_v45 = vrot.slane %v5522_v43, 4  ;;  %v12395_v43 = vld [vmem:[#allocation3 + $0x2c] sm:$0x1]  ;;  %v5573_v20 = vshll.u32 %v12390_v36, 16 }
 0x3d3   : > { %v10383_v15 = vld [vmem:[#allocation3 + $0xcc] sm:$0xff]  }
 0x3d4   : > { %v5594_v50 = vor.u32 %v5593_v2, %v12383_v4  ;;  %v5528_v19 = vsel %vm11109_vm12, %v5523_v45, %v5527_v40  ;;  %v5466_v2 = vld [vmem:[#allocation3 + $0x3c] sm:$0xf]  ;;  %v5607_v40 = vrot.slane %v5605_v62, 5  ;;  %v5575_v35 = vrot.slane %v5573_v20, 5 }
 0x3d5   : > { %v5626_v16 = vshrl.u32 %v5466_v2, 16  ;;  %v5659_v20 = vshll.u32 %v12164_v1, 16 }
 0x3d6   : > { %9491 = vmatmul.mubr.msk.bf16.gmra.mrb[20].mxu1 %vm1056_vm9, %v12086_v56  ;;  %v12379_v56 = vrot.slane %v5539_v22, 5  ;;  %v12388_v22 = vld [vmem:[#allocation3 + $0x14] sm:$0x1] }
 0x3d7   : > { %9494 = vmatprep.mubr.msk.bf16.mxu1 %vm1056_vm9, %v12092_v7  ;;  %v5569_v7 = vrot.slane %v5567_v53, 4  ;;  %13160 = vst [vmem:[#allocation25_spill] sm:$0xff] %v12388_v22  ;;  %v5583_v53 = vrot.slane %v5581_v12, 5  ;;  %v5615_v12 = vshrl.u32 %v12157_v52, 16 }
 0x3d8   : > { %v5546_v32 = vor.u32 %v5545_v48, %v12379_v56  ;;  %v5602_v48 = vshrl.u32 %v5463_v24, 16  ;;  %v5595_v24 = vrot.slane %v5594_v50, 4  ;;  %v5542_v36 = vsel %vm11109_vm12, %v5537_v55, %v12379_v56  ;;  %v5469_v50 = vld [vmem:[#allocation3 + $0x48] sm:$0xf] }
 0x3d9   : > { %v5570_v0 = vor.u32 %v5569_v7, %v12381_v44  ;;  %v5584_v29 = vor.u32 %v5583_v53, %v5580_v3  ;;  %v5617_v52 = vrot.slane %v5615_v12, 4  ;;  %v5635_v3 = vshll.u32 %v12161_v9, 16 }
 0x3da   : > { %v5547_v34 = vrot.slane %v5546_v32, 4  ;;  %v5604_v45 = vrot.slane %v5602_v48, 4  ;;  %v5629_v32 = vshll.u32 %v5466_v2, 16  ;;  %v5639_v53 = vshrl.u32 %v12161_v9, 16 }
 0x3db   : > { %v5571_v7 = vrot.slane %v5570_v0, 4  ;;  %v5585_v31 = vrot.slane %v5584_v29, 4  ;;  %v5566_v56 = vsel %vm11109_vm12, %v5561_v25, %v12381_v44  ;;  %v5618_v28 = vor.u32 %v5617_v52, %v12408_v5  ;;  %v5472_v29 = vld [vmem:[#allocation3 + $0x54] sm:$0xf] }
 0x3dc   : > { %v5628_v9 = vrot.slane %v5626_v16, 4  ;;  %v5631_v12 = vrot.slane %v5629_v32, 5  ;;  %v5650_v55 = vshrl.u32 %v5469_v50, 16  ;;  %v5641_v2 = vrot.slane %v5639_v53, 4 }
 0x3dd   : > { %v5576_v62 = vsel %vm11109_vm12, %v5571_v7, %v5575_v35  ;;  %v5590_v44 = vsel %vm11109_vm12, %v5585_v31, %v12383_v4  ;;  %v5621_v35 = vshll.u32 %v12159_v57, 16  ;;  %v5645_v4 = vshll.u32 %v12166_v13, 16  ;;  %v5475_v57 = vld [vmem:[#allocation3 + $0x60] sm:$0xf] }
 0x3de   : > { %9495 = vmatmul.mubr.msk.bf16.gmra.mrb[24].mxu1 %vm1056_vm9, %v12104_v26  ;;  %v5518_v26 = vsel %vm11109_vm12, %v5513_v47, %v12361_v6  ;;  %v5597_v6 = vshll.u32 %v12395_v43, 16  ;;  %v12437_v25 = vcombine.low %v5566_v56, %v5576_v62  ;;  %v12445_v52 = vrot.slane %v5659_v20, 5  ;;  %v13166_v30 = vld [vmem:[#allocation25_spill] sm:$0xff] }
 0x3df   : > { %9498 = vmatprep.mubr.msk.bf16.mxu1 %vm1056_vm9, %v12106_v58  ;;  %v5549_v58 = vshll.u32 %v12388_v22, 16  ;;  %v8376_v47 = vcombine.low %v5518_v26, %v5528_v19  ;;  %v5608_v26 = vor.u32 %v5607_v40, %v5604_v45  ;;  %v5652_v45 = vrot.slane %v5650_v55, 4 }
 0x3e0   : > { %v5599_v0 = vrot.slane %v5597_v6, 5  ;;  %v5623_v16 = vrot.slane %v5621_v35, 5  ;;  %v5674_v31 = vshrl.u32 %v5472_v29, 16  ;;  %v5683_v13 = vshll.u32 %v12172_v21, 16  ;;  %v5478_v35 = vld [vmem:[#allocation3 + $0x6c] sm:$0xf] }
 0x3e1   : > { %v5551_v22 = vrot.slane %v5549_v58, 5  ;;  %v5653_v58 = vshll.u32 %v5469_v50, 16  ;;  %v5609_v6 = vrot.slane %v5608_v26, 4  ;;  %v5698_v53 = vshrl.u32 %v5475_v57, 16 }
 0x3e2   : > { %v5600_v19 = vsel %vm11109_vm12, %v5595_v24, %v5599_v0  ;;  %v5632_v24 = vor.u32 %v5631_v12, %v5628_v9  ;;  %v5677_v0 = vshll.u32 %v5472_v29, 16  ;;  %v5701_v50 = vshll.u32 %v5475_v57, 16 }
 0x3e3   : > { %v5552_v48 = vsel %vm11109_vm12, %v5547_v34, %v5551_v22  ;;  %v5663_v22 = vshrl.u32 %v12164_v1, 16  ;;  %v12433_v34 = vrot.slane %v5635_v3, 5  ;;  %v12439_v7 = vcombine.low %v5590_v44, %v5600_v19  ;;  %v10385_v1 = vld [vmem:[%s13049_s3 + $0x88] sm:$0xff]  }
 0x3e4   : > { %v5655_v40 = vrot.slane %v5653_v58, 5  ;;  %v5687_v3 = vshrl.u32 %v12172_v21, 16  ;;  %v5647_v56 = vrot.slane %v5645_v4, 5  ;;  %v5707_v62 = vshll.u32 %v12183_v38, 16 }
 0x3e5   : > { %v5642_v32 = vor.u32 %v5641_v2, %v12433_v34  ;;  %v5711_v26 = vshrl.u32 %v12183_v38, 16  ;;  %v5633_v21 = vrot.slane %v5632_v24, 4  ;;  %v5676_v55 = vrot.slane %v5674_v31, 4 }
 0x3e6   : > { %9499 = vmatmul.mubr.msk.bf16.gmra.mrb[28].mxu1 %vm1056_vm9, %v10383_v15  ;;  %v12435_v15 = vcombine.low %v5542_v36, %v5552_v48  ;;  %v5665_v36 = vrot.slane %v5663_v22, 4  ;;  %v5614_v48 = vsel %vm11109_vm12, %v5609_v6, %v12408_v5  ;;  %v5669_v5 = vshll.u32 %v12168_v14, 16  ;;  %v10387_v14 = vld [vmem:[%s13049_s3 + $0x98] sm:$0xff]  }
 0x3e7   : > { %9510 = vmatprep.mubr.msk.bf16.mxu1 %vm1056_vm9, %v8376_v47  ;;  %v5619_v47 = vrot.slane %v5618_v28, 4  ;;  %v5656_v28 = vor.u32 %v5655_v40, %v5652_v45  ;;  %v5643_v12 = vrot.slane %v5642_v32, 4  ;;  %v5679_v58 = vrot.slane %v5677_v0, 5 }
 0x3e8   : > { %v5666_v9 = vor.u32 %v5665_v36, %v12445_v52  ;;  %v12467_v20 = vrot.slane %v5683_v13, 5  ;;  %v5689_v38 = vrot.slane %v5687_v3, 4  ;;  %v5700_v22 = vrot.slane %v5698_v53, 4  ;;  %v12494_v53 = vld [vmem:[%s13049_s3 + $0xe0] sm:$0xff]  }
 0x3e9   : > { %v5624_v19 = vsel %vm11109_vm12, %v5619_v47, %v5623_v16  ;;  %v5703_v44 = vrot.slane %v5701_v50, 5  ;;  %v12469_v2 = vrot.slane %v5707_v62, 5  ;;  %v5713_v29 = vrot.slane %v5711_v26, 4 }
 0x3ea   : > { %v5731_v6 = vshll.u32 %v12195_v10, 16  ;;  %v5735_v47 = vshrl.u32 %v12195_v10, 16  ;;  %v12476_v24 = vcombine.low %v5614_v48, %v5624_v19  ;;  %v5667_v4 = vrot.slane %v5666_v9, 4 }
 0x3eb   : > { %v5638_v57 = vsel %vm11109_vm12, %v5633_v21, %v12433_v34  ;;  %v5648_v45 = vsel %vm11109_vm12, %v5643_v12, %v5647_v56  ;;  %v5680_v40 = vor.u32 %v5679_v58, %v5676_v55  ;;  %v5671_v10 = vrot.slane %v5669_v5, 5  ;;  %v5481_v34 = vld [vmem:[#allocation3 + $0x78] sm:$0xf] }
 0x3ec   : > { %v5690_v36 = vor.u32 %v5689_v38, %v12467_v20  ;;  %v5722_v16 = vshrl.u32 %v5478_v35, 16  ;;  %v5725_v32 = vshll.u32 %v5478_v35, 16  ;;  %v5704_v31 = vor.u32 %v5703_v44, %v5700_v22 }
 0x3ed   : > { %v5714_v0 = vor.u32 %v5713_v29, %v12469_v2  ;;  %v12489_v13 = vrot.slane %v5731_v6, 5  ;;  %v5737_v3 = vrot.slane %v5735_v47, 4  ;;  %v12496_v50 = vcombine.low %v5638_v57, %v5648_v45  ;;  %v5484_v29 = vld [vmem:[#allocation3 + $0x84] sm:$0xf] }
 0x3ee   : > { %9511 = vmatmul.mubr.msk.bf16.vlgmr.msra.gmra.mrb[0].mxu1 %vm1056_vm9, %v12435_v15  ;;  %v5672_v56 = vsel %vm11109_vm12, %v5667_v4, %v5671_v10  ;;  %v5693_v62 = vshll.u32 %v12178_v37, 16  ;;  %v5681_v26 = vrot.slane %v5680_v40, 4  ;;  %v5755_v19 = vshll.u32 %v12204_v8, 16 }
 0x3ef   : > { %9543 = vmatpush3.bf16.msra.mxu1 %v12308_v17  ;;  %9514 = vmatprep.mubr.msk.bf16.mxu1 %vm1056_vm9, %v12437_v25  ;;  %v10386_v17 = vld [vmem:[%s13049_s3 + $0x90] sm:$0xff]   ;;  %v5759_v21 = vshrl.u32 %v12204_v8, 16  ;;  %v5727_v9 = vrot.slane %v5725_v32, 5  ;;  %v5746_v12 = vshrl.u32 %v5481_v34, 16  ;;  %v5749_v5 = vshll.u32 %v5481_v34, 16 }
 0x3f0   : > { %9544 = vmatprep.subr.bf16.mxu1 %v10385_v1  ;;  %v5691_v55 = vrot.slane %v5690_v36, 4  ;;  %v5705_v58 = vrot.slane %v5704_v31, 4  ;;  %v5738_v38 = vor.u32 %v5737_v3, %v12489_v13  ;;  %v5695_v22 = vrot.slane %v5693_v62, 5 }
 0x3f1   : > { %v5741_v8 = vshll.u32 %v12202_v49, 16  ;;  %v12514_v44 = vrot.slane %v5755_v19, 5  ;;  %v5761_v35 = vrot.slane %v5759_v21, 4  ;;  %v5686_v6 = vsel %vm11109_vm12, %v5681_v26, %v12467_v20 }
 0x3f2   : > { %v5696_v4 = vsel %vm11109_vm12, %v5691_v55, %v5695_v22  ;;  %v5710_v49 = vsel %vm11109_vm12, %v5705_v58, %v12469_v2  ;;  %v5739_v45 = vrot.slane %v5738_v38, 4  ;;  %v5770_v40 = vshrl.u32 %v5484_v29, 16 }
 0x3f3   : > { %9545 = vmatpush3.bf16.msra.mxu1 %v10385_v1  ;;  %v5657_v1 = vrot.slane %v5656_v28, 4  ;;  %v5724_v28 = vrot.slane %v5722_v16, 4  ;;  %v5773_v10 = vshll.u32 %v5484_v29, 16  ;;  %v5779_v36 = vshll.u32 %v12228_v60, 16  ;;  %v5487_v16 = vld [vmem:[#allocation3 + $0x90] sm:$0xf] }
 0x3f4   : > { %9546 = vmatprep.subr.bf16.mxu1 %v10386_v17  ;;  %v5783_v20 = vshrl.u32 %v12228_v60, 16  ;;  %v5743_v32 = vrot.slane %v5741_v8, 5  ;;  %v5762_v31 = vor.u32 %v5761_v35, %v12514_v44  ;;  %v5807_v3 = vshrl.u32 %v12241_v41, 16 }
 0x3f5   : > { %v5662_v48 = vsel %vm11109_vm12, %v5657_v1, %v12445_v52  ;;  %v5715_v52 = vrot.slane %v5714_v0, 4  ;;  %v5728_v47 = vor.u32 %v5727_v9, %v5724_v28  ;;  %v5751_v1 = vrot.slane %v5749_v5, 5 }
 0x3f6   : > { %9515 = vmatmul.mubr.msk.bf16.gmra.mrb[4].mxu1 %vm1056_vm9, %v12439_v7  ;;  %v12509_v37 = vcombine.low %v5662_v48, %v5672_v56  ;;  %v5803_v0 = vshll.u32 %v12241_v41, 16  ;;  %v12533_v34 = vcombine.low %v5686_v6, %v5696_v4  ;;  %v5744_v62 = vsel %vm11109_vm12, %v5739_v45, %v5743_v32 }
 0x3f7   : > { %9518 = vmatprep.mubr.msk.bf16.mxu1 %vm1056_vm9, %v12476_v24  ;;  %9547 = vmatpush3.bf16.msra.mxu1 %v10386_v17  ;;  %v5717_v17 = vshll.u32 %v12188_v51, 16  ;;  %v5729_v48 = vrot.slane %v5728_v47, 4  ;;  %v5765_v26 = vshll.u32 %v12218_v23, 16  ;;  %v5794_v60 = vshrl.u32 %v5487_v16, 16  ;;  %v5493_v47 = vld [vmem:[#allocation3 + $0xa8] sm:$0xf] }
 0x3f8   : > { %9548 = vmatprep.subr.bf16.mxu1 %v10387_v14  ;;  %v5772_v19 = vrot.slane %v5770_v40, 4  ;;  %v5775_v21 = vrot.slane %v5773_v10, 5  ;;  %v5781_v28 = vrot.slane %v5779_v36, 5  ;;  %v5785_v9 = vrot.slane %v5783_v20, 4 }
 0x3f9   : > { %v5719_v51 = vrot.slane %v5717_v17, 5  ;;  %v5797_v17 = vshll.u32 %v5487_v16, 16  ;;  %v5763_v41 = vrot.slane %v5762_v31, 4  ;;  %v5809_v5 = vrot.slane %v5807_v3, 4 }
 0x3fa   : > { %v5734_v55 = vsel %vm11109_vm12, %v5729_v48, %v12489_v13  ;;  %v5796_v38 = vrot.slane %v5794_v60, 4  ;;  %v5776_v8 = vor.u32 %v5775_v21, %v5772_v19  ;;  %v5786_v35 = vor.u32 %v5785_v9, %v5781_v28  ;;  %v5496_v19 = vld [vmem:[#allocation3 + $0xb4] sm:$0xf] }
 0x3fb   : > { %9549 = vmatpush3.bf16.msra.mxu1 %v10387_v14  ;;  %v5748_v14 = vrot.slane %v5746_v12, 4  ;;  %v5720_v57 = vsel %vm11109_vm12, %v5715_v52, %v5719_v51  ;;  %v5805_v12 = vrot.slane %v5803_v0, 5  ;;  %v12547_v58 = vcombine.low %v5734_v55, %v5744_v62  ;;  %v5490_v51 = vld [vmem:[#allocation3 + $0x9c] sm:$0xf] }
 0x3fc   : > { %9582 = vmatprep.subr.bf16.mxu1 %v12494_v53  ;;  %v12535_v2 = vcombine.low %v5710_v49, %v5720_v57  ;;  %v5767_v52 = vrot.slane %v5765_v26, 5  ;;  %v5799_v22 = vrot.slane %v5797_v17, 5  ;;  %v5827_v29 = vshll.u32 %v12252_v42, 16 }
 0x3fd   : > { %v5752_v56 = vor.u32 %v5751_v1, %v5748_v14  ;;  %v5831_v6 = vshrl.u32 %v12252_v42, 16  ;;  %v5810_v1 = vor.u32 %v5809_v5, %v5805_v12  ;;  %v5851_v13 = vshll.u32 %v12263_v54, 16 }
 0x3fe   : > { %9519 = vmatmul.mubr.msk.bf16.gmra.mrb[8].mxu1 %vm1056_vm9, %v12496_v50  ;;  %v5768_v14 = vsel %vm11109_vm12, %v5763_v41, %v5767_v52  ;;  %v5855_v4 = vshrl.u32 %v12263_v54, 16  ;;  %v5789_v57 = vshll.u32 %v12230_v27, 16  ;;  %v5818_v45 = vshrl.u32 %v5490_v51, 16 }
 0x3ff   : > { %9522 = vmatprep.mubr.msk.bf16.mxu1 %vm1056_vm9, %v12509_v37  ;;  %v5753_v23 = vrot.slane %v5752_v56, 4  ;;  %v5821_v40 = vshll.u32 %v5490_v51, 16  ;;  %v5800_v10 = vor.u32 %v5799_v22, %v5796_v38  ;;  %v5813_v42 = vshll.u32 %v12247_v63, 16 }
 0x400   : > { %v5842_v36 = vshrl.u32 %v5493_v47, 16  ;;  %v5845_v20 = vshll.u32 %v5493_v47, 16  ;;  %v5787_v32 = vrot.slane %v5786_v35, 4  ;;  %v5829_v31 = vrot.slane %v5827_v29, 5 }
 0x401   : > { %v5758_v49 = vsel %vm11109_vm12, %v5753_v23, %v12514_v44  ;;  %v5833_v0 = vrot.slane %v5831_v6, 4  ;;  %v5777_v54 = vrot.slane %v5776_v8, 4  ;;  %v5811_v3 = vrot.slane %v5810_v1, 4 }
 0x402   : > { %v12560_v16 = vcombine.low %v5758_v49, %v5768_v14  ;;  %v5853_v44 = vrot.slane %v5851_v13, 5  ;;  %v5857_v48 = vrot.slane %v5855_v4, 4  ;;  %v5791_v27 = vrot.slane %v5789_v57, 5 }
 0x403   : > { %v5820_v56 = vrot.slane %v5818_v45, 4  ;;  %v5823_v63 = vrot.slane %v5821_v40, 5  ;;  %v5801_v62 = vrot.slane %v5800_v10, 4  ;;  %v5815_v26 = vrot.slane %v5813_v42, 5 }
 0x404   : > { %v5844_v60 = vrot.slane %v5842_v36, 4  ;;  %v5847_v17 = vrot.slane %v5845_v20, 5  ;;  %v5792_v21 = vsel %vm11109_vm12, %v5787_v32, %v5791_v27  ;;  %v5834_v9 = vor.u32 %v5833_v0, %v5829_v31 }
 0x405   : > { %v5875_v41 = vshll.u32 %v12282_v46, 16  ;;  %v5879_v5 = vshrl.u32 %v12282_v46, 16  ;;  %v5782_v55 = vsel %vm11109_vm12, %v5777_v54, %v5781_v28  ;;  %v5816_v23 = vsel %vm11109_vm12, %v5811_v3, %v5815_v26 }
 0x406   : > { %9523 = vmatmul.mubr.msk.bf16.gmra.mrb[12].mxu1 %vm1056_vm9, %v12533_v34  ;;  %v5858_v52 = vor.u32 %v5857_v48, %v5853_v44  ;;  %v5824_v38 = vor.u32 %v5823_v63, %v5820_v56  ;;  %v5837_v22 = vshll.u32 %v12254_v61, 16  ;;  %v5866_v51 = vshrl.u32 %v5496_v19, 16  ;;  %v10390_v63 = vld [vmem:[%s13049_s3 + $0xf0] sm:$0xff]  }
 0x407   : > { %9526 = vmatprep.mubr.msk.bf16.mxu1 %vm1056_vm9, %v12535_v2  ;;  %v5869_v8 = vshll.u32 %v5496_v19, 16  ;;  %v12575_v35 = vcombine.low %v5782_v55, %v5792_v21  ;;  %v5806_v29 = vsel %vm11109_vm12, %v5801_v62, %v5805_v12  ;;  %v5848_v6 = vor.u32 %v5847_v17, %v5844_v60  ;;  %v5499_v62 = vld [vmem:[#allocation3 + $0xc0] sm:$0xf] }
 0x408   : > { %v5861_v46 = vshll.u32 %v12270_v39, 16  ;;  %v12580_v47 = vcombine.low %v5806_v29, %v5816_v23  ;;  %v5835_v28 = vrot.slane %v5834_v9, 4  ;;  %v5877_v14 = vrot.slane %v5875_v41, 5 }
 0x409   : > { %v5881_v1 = vrot.slane %v5879_v5, 4  ;;  %v5859_v13 = vrot.slane %v5858_v52, 4  ;;  %v5825_v61 = vrot.slane %v5824_v38, 4  ;;  %v5839_v4 = vrot.slane %v5837_v22, 5 }
 0x40a   : > { %v5868_v49 = vrot.slane %v5866_v51, 4  ;;  %v5871_v57 = vrot.slane %v5869_v8, 5  ;;  %v5849_v12 = vrot.slane %v5848_v6, 4  ;;  %v5863_v45 = vrot.slane %v5861_v46, 5  ;;  %v10394_v6 = vld [vmem:[%s13049_s3 + $0x50] sm:$0xff]  }
 0x40b   : > { %v5840_v39 = vsel %vm11109_vm12, %v5835_v28, %v5839_v4  ;;  %v5882_v40 = vor.u32 %v5881_v1, %v5877_v14  ;;  %v5830_v42 = vsel %vm11109_vm12, %v5825_v61, %v5829_v31  ;;  %v5885_v20 = vshll.u32 %v12291_v59, 16  ;;  %v6723_v4 = vld [vmem:[#allocation3] sm:$0xe] }
 0x40c   : > { %v5864_v10 = vsel %vm11109_vm12, %v5859_v13, %v5863_v45  ;;  %v5872_v36 = vor.u32 %v5871_v57, %v5868_v49  ;;  %v12593_v32 = vcombine.low %v5830_v42, %v5840_v39  ;;  %v5854_v0 = vsel %vm11109_vm12, %v5849_v12, %v5853_v44  ;;  %v10389_v44 = vld [vmem:[%s13049_s3 + $0xe8] sm:$0xff]  }
 0x40d   : > { %v12597_v54 = vcombine.low %v5854_v0, %v5864_v10  ;;  %v5883_v3 = vrot.slane %v5882_v40, 4  ;;  %v5887_v27 = vrot.slane %v5885_v20, 5  ;;  %v6221_v26 = vshll.u32 %v12293_v18, 16  ;;  %v13162_v40 = vld [vmem:[#allocation9_spill] sm:$0xff]  ;;  %v13164_v0 = vld [vmem:[#allocation7_spill] sm:$0xff] }
 0x40e   : > { %9527 = vmatmul.mubr.msk.bf16.gmra.mrb[16].mxu1 %vm1056_vm9, %v12547_v58  ;;  %v5873_v48 = vrot.slane %v5872_v36, 4  ;;  %v6225_v60 = vshrl.u32 %v12293_v18, 16  ;;  %v6212_v17 = vshrl.u32 %v5499_v62, 16  ;;  %v6215_v19 = vshll.u32 %v5499_v62, 16 }
 0x40f   : > { %9530 = vmatprep.mubr.msk.bf16.mxu1 %vm1056_vm9, %v12560_v16  ;;  %v5888_v31 = vsel %vm11109_vm12, %v5883_v3, %v5887_v27  ;;  %v6223_v21 = vrot.slane %v6221_v26, 5  ;;  %v6231_v52 = vshll.u32 %v12310_v11, 16  ;;  %v10393_v11 = vld [vmem:[%s13049_s3 + $0x48] sm:$0xff]   ;;  %v6791_v61 = vrot.slane %v12349_v33, 5 }
 0x410   : > { %v5878_v59 = vsel %vm11109_vm12, %v5873_v48, %v5877_v14  ;;  %v6227_v9 = vrot.slane %v6225_v60, 4  ;;  %v6214_v41 = vrot.slane %v6212_v17, 4  ;;  %v6217_v5 = vrot.slane %v6215_v19, 5  ;;  %v13165_v48 = vld [vmem:[#allocation8_spill] sm:$0xff]  ;;  %v13168_v17 = vld [vmem:[#allocation10_spill] sm:$0xff] }
 0x411   : > { %v12607_v56 = vcombine.low %v5878_v59, %v5888_v31  ;;  %v6233_v22 = vrot.slane %v6231_v52, 5  ;;  %v8470_v45 = vrot.slane %v6723_v4, 9  ;;  %v6793_v39 = vrot.slane %v6791_v61, 4  ;;  %v10403_v4 = vld [vmem:[%s13049_s3 + $0x118] sm:$0xff]  }
 0x412   : > { %v6228_v55 = vor.u32 %v6227_v9, %v6223_v21  ;;  %v6218_v23 = vor.u32 %v6217_v5, %v6214_v41  ;;  %v6794_v10 = vrot.slane %v13162_v40, 5  ;;  %v6805_v27 = vrot.slane %v13165_v48, 5 }
 0x413   : > { %v6792_v20 = vsel %vm11509_vm15, %v8470_v45, %v6791_v61  ;;  %v6812_v19 = vrot.slane %v13168_v17, 5  ;;  %v10402_v61 = vld [vmem:[%s13049_s3 + $0x110] sm:$0xff]  }
 0x414   : > { %v6229_v38 = vrot.slane %v6228_v55, 4  ;;  %v6219_v18 = vrot.slane %v6218_v23, 4  ;;  %v10397_v23 = vld [vmem:[%s13049_s3 + $0xa8] sm:$0xff]  }
 0x416   : > { %9531 = vmatmul.mubr.msk.bf16.gmra.mrb[20].mxu1 %vm1056_vm9, %v12575_v35  ;;  %v6234_v51 = vsel %vm11109_vm12, %v6229_v38, %v6233_v22  ;;  %v6224_v8 = vsel %vm11109_vm12, %v6219_v18, %v6223_v21  ;;  %v6814_v38 = vrot.slane %v6812_v19, 4  ;;  %v6726_v18 = vld [vmem:[#allocation3 + $0x24] sm:$0xe]  ;;  %v6815_v22 = vrot.slane %v12395_v43, 5  ;;  %v13169_v43 = vld [vmem:[#allocation13_spill] sm:$0xff] }
 0x417   : > { %9534 = vmatprep.mubr.msk.bf16.mxu1 %vm1056_vm9, %v12580_v47  ;;  %v8420_v29 = vcombine.low %v6224_v8, %v6234_v51  ;;  %v10398_v51 = vld [vmem:[%s13049_s3 + $0xb0] sm:$0xff]   ;;  %v8473_v8 = vrot.slane %v6726_v18, 9  ;;  %v10411_v18 = vld [vmem:[%s10596_s15 + $0x28] sm:$0xff] }
 0x41e   : > { %9535 = vmatmul.mubr.msk.bf16.gmra.mrb[24].mxu1 %vm1056_vm9, %v12593_v32 }
 0x41f   : > { %9538 = vmatprep.mubr.msk.bf16.mxu1 %vm1056_vm9, %v12597_v54 }
 0x426   : > { %9539 = vmatmul.mubr.msk.bf16.gmra.mrb[28].mxu1 %vm1056_vm9, %v12607_v56 }
 0x427   : > { %9550 = vmatprep.mubr.msk.bf16.mxu1 %vm1056_vm9, %v12435_v15  ;;  %v10391_v15 = vld [vmem:[%s13049_s3 + $0xf8] sm:$0xff]  }
 0x42e   : > { %9551 = vmatmul.mubr.msk.bf16.vlgmr.msra.gmra.mrb[0].mxu1 %vm1056_vm9, %v12437_v25 }
 0x42f   : > { %9583 = vmatpush3.bf16.msra.mxu1 %v12494_v53  ;;  %9554 = vmatprep.mubr.msk.bf16.mxu1 %vm1056_vm9, %v12439_v7  ;;  %v10392_v53 = vld [vmem:[%s13049_s3 + $0x40] sm:$0xff]  }
 0x430   : > { %9584 = vmatprep.subr.bf16.mxu1 %v10389_v44 }
 0x433   : > { %9585 = vmatpush3.bf16.msra.mxu1 %v10389_v44  ;;  %v6807_v44 = vrot.slane %v6805_v27, 4 }
 0x434   : > { %9586 = vmatprep.subr.bf16.mxu1 %v10390_v63 }
 0x436   : > { %9555 = vmatmul.mubr.msk.bf16.gmra.mrb[4].mxu1 %vm1056_vm9, %v12476_v24 }
 0x437   : > { %9558 = vmatprep.mubr.msk.bf16.mxu1 %vm1056_vm9, %v12496_v50  ;;  %9587 = vmatpush3.bf16.msra.mxu1 %v10390_v63  ;;  %v6801_v63 = vrot.slane %v13166_v30, 5 }
 0x438   : > { %9588 = vmatprep.subr.bf16.mxu1 %v10391_v15 }
 0x43b   : > { %9589 = vmatpush3.bf16.msra.mxu1 %v10391_v15  ;;  %v6725_v15 = vld [vmem:[#allocation3 + $0x18] sm:$0xe] }
 0x43c   : > { %9622 = vmatprep.subr.bf16.mxu1 %v10392_v53  ;;  %v8472_v21 = vrot.slane %v6725_v15, 9 }
 0x43e   : > { %9559 = vmatmul.mubr.msk.bf16.gmra.mrb[8].mxu1 %vm1056_vm9, %v12509_v37  ;;  %v6806_v55 = vsel %vm11509_vm15, %v8472_v21, %v6805_v27 }
 0x43f   : > { %9562 = vmatprep.mubr.msk.bf16.mxu1 %vm1056_vm9, %v12533_v34 }
 0x446   : > { %9563 = vmatmul.mubr.msk.bf16.gmra.mrb[12].mxu1 %vm1056_vm9, %v12535_v2 }
 0x447   : > { %9566 = vmatprep.mubr.msk.bf16.mxu1 %vm1056_vm9, %v12547_v58 }
 0x44e   : > { %9567 = vmatmul.mubr.msk.bf16.gmra.mrb[16].mxu1 %vm1056_vm9, %v12560_v16 }
 0x44f   : > { %9570 = vmatprep.mubr.msk.bf16.mxu1 %vm1056_vm9, %v12575_v35 }
 0x456   : > { %9571 = vmatmul.mubr.msk.bf16.gmra.mrb[20].mxu1 %vm1056_vm9, %v12580_v47 }
 0x457   : > { %9574 = vmatprep.mubr.msk.bf16.mxu1 %vm1056_vm9, %v12593_v32 }
 0x45e   : > { %9575 = vmatmul.mubr.msk.bf16.gmra.mrb[24].mxu1 %vm1056_vm9, %v12597_v54 }
 0x45f   : > { %9578 = vmatprep.mubr.msk.bf16.mxu1 %vm1056_vm9, %v12607_v56 }
 0x466   : > { %9579 = vmatmul.mubr.msk.bf16.gmra.mrb[28].mxu1 %vm1056_vm9, %v8420_v29 }
 0x467   : > { %9590 = vmatprep.mubr.msk.bf16.mxu1 %vm1056_vm9, %v12437_v25  ;;  %v10395_v25 = vld [vmem:[%s13049_s3 + $0x58] sm:$0xff]  }
 0x46e   : > { %9591 = vmatmul.mubr.msk.bf16.vlgmr.msra.gmra.mrb[0].mxu1 %vm1056_vm9, %v12439_v7  ;;  %v12684_v7 = vld [vmem:[%s13049_s3 + $0xa0] sm:$0xff]  }
 0x46f   : > { %9623 = vmatpush3.bf16.msra.mxu1 %v10392_v53  ;;  %9594 = vmatprep.mubr.msk.bf16.mxu1 %vm1056_vm9, %v12476_v24  ;;  %v5502_v24 = vld [vmem:[#allocation3 + $0xcc] sm:$0xf]  ;;  %v13167_v53 = vld [vmem:[#allocation26_spill] sm:$0xff] }
 0x470   : > { %9624 = vmatprep.subr.bf16.mxu1 %v10393_v11  ;;  %v6808_v62 = vrot.slane %v13167_v53, 5 }
 0x472   : > { %v6809_v9 = vsel %vm11509_vm15, %v6807_v44, %v6808_v62  ;;  %v10406_v44 = vld [vmem:[%s10596_s15 + $0x18] sm:$0xff] }
 0x473   : > { %9625 = vmatpush3.bf16.msra.mxu1 %v10393_v11  ;;  %v8496_v52 = vcombine.low %v6806_v55, %v6809_v9  ;;  %v6813_v11 = vsel %vm11509_vm15, %v8473_v8, %v6812_v19  ;;  %v10408_v19 = vld [vmem:[%s10596_s15 + $0x30] sm:$0xff] }
 0x474   : > { %9626 = vmatprep.subr.bf16.mxu1 %v10394_v6 }
 0x476   : > { %9595 = vmatmul.mubr.msk.bf16.gmra.mrb[4].mxu1 %vm1056_vm9, %v12496_v50  ;;  %v12695_v50 = vld [vmem:[#allocation3 + $0xd0] sm:$0xf] }
 0x477   : > { %9598 = vmatprep.mubr.msk.bf16.mxu1 %vm1056_vm9, %v12509_v37  ;;  %9627 = vmatpush3.bf16.msra.mxu1 %v10394_v6  ;;  %v6468_v37 = vshrl.u32 %v5502_v24, 16  ;;  %v6477_v46 = vshll.u32 %v12695_v50, 16 }
 0x478   : > { %9628 = vmatprep.subr.bf16.mxu1 %v10395_v25 }
 0x479   : > { %v6470_v28 = vrot.slane %v6468_v37, 4  ;;  %v6479_v14 = vrot.slane %v6477_v46, 5  ;;  %v13171_v37 = vld [vmem:[#allocation12_spill] sm:$0xff]  ;;  %v13173_v46 = vld [vmem:[#allocation17_spill] sm:$0xff] }
 0x47b   : > { %9629 = vmatpush3.bf16.msra.mxu1 %v10395_v25  ;;  %v10399_v25 = vld [vmem:[%s13049_s3 + $0xb8] sm:$0xff]  }
 0x47c   : > { %9662 = vmatprep.subr.bf16.mxu1 %v12684_v7 }
 0x47e   : > { %9599 = vmatmul.mubr.msk.bf16.gmra.mrb[8].mxu1 %vm1056_vm9, %v12533_v34  ;;  %v6471_v34 = vshll.u32 %v5502_v24, 16  ;;  %v13170_v24 = vld [vmem:[#allocation11_spill] sm:$0xff] }
 0x47f   : > { %9602 = vmatprep.mubr.msk.bf16.mxu1 %vm1056_vm9, %v12535_v2  ;;  %v6481_v2 = vshrl.u32 %v12695_v50, 16 }
 0x481   : > { %v6483_v1 = vrot.slane %v6481_v2, 4  ;;  %v13174_v2 = vld [vmem:[#allocation14_spill] sm:$0xff] }
 0x486   : > { %9603 = vmatmul.mubr.msk.bf16.gmra.mrb[12].mxu1 %vm1056_vm9, %v12547_v58  ;;  %v6473_v58 = vrot.slane %v6471_v34, 5  ;;  %v13172_v34 = vld [vmem:[#allocation16_spill] sm:$0xff] }
 0x487   : > { %9606 = vmatprep.mubr.msk.bf16.mxu1 %vm1056_vm9, %v12560_v16  ;;  %v12703_v16 = vld [vmem:[#allocation3 + $0xd4] sm:$0x1] }
 0x488   : > { %v6487_v13 = vshll.u32 %v12703_v16, 16  ;;  %v7473_v40 = vrot.slane %v12703_v16, 5  ;;  %v12860_v16 = vld [vmem:[%s13050_s4] ss:$0 sm:$0xff] }
 0x48a   : > { %v6489_v12 = vrot.slane %v6487_v13, 5  ;;  %v10401_v13 = vld [vmem:[%s13049_s3 + $0x108] sm:$0xff]  }
 0x48e   : > { %9607 = vmatmul.mubr.msk.bf16.gmra.mrb[16].mxu1 %vm1056_vm9, %v12575_v35  ;;  %v6474_v35 = vor.u32 %v6473_v58, %v6470_v28  ;;  %v13175_v28 = vld [vmem:[#allocation15_spill] sm:$0xff] }
 0x48f   : > { %9610 = vmatprep.mubr.msk.bf16.mxu1 %vm1056_vm9, %v12580_v47  ;;  %v6484_v47 = vor.u32 %v6483_v1, %v6479_v14  ;;  %v13176_v58 = vld [vmem:[#allocation19_spill] sm:$0xff]  ;;  %v13178_v1 = vld [vmem:[#allocation18_spill] sm:$0xff] }
 0x490   : > { %v6475_v49 = vrot.slane %v6474_v35, 4  ;;  %v13179_v35 = vld [vmem:[#allocation21_spill] sm:$0xff] }
 0x491   : > { %v6485_v57 = vrot.slane %v6484_v47, 4  ;;  %v13180_v47 = vld [vmem:[#allocation23_spill] sm:$0xff] }
 0x492   : > { %v6480_v42 = vsel %vm11109_vm12, %v6475_v49, %v6479_v14  ;;  %v13177_v14 = vld [vmem:[#allocation20_spill] sm:$0xff]  ;;  %v13181_v49 = vld [vmem:[#allocation22_spill] sm:$0xff] }
 0x493   : > { %v6490_v36 = vsel %vm11109_vm12, %v6485_v57, %v6489_v12  ;;  %v7470_v57 = vrot.slane %v12695_v50, 5  ;;  %v6740_v12 = vld [vmem:[#allocation3 + $0xcc] sm:$0xe] }
 0x494   : > { %v8449_v3 = vcombine.low %v6480_v42, %v6490_v36  ;;  %v8560_v45 = vrot.slane %v6740_v12, 9 }
 0x496   : > { %9611 = vmatmul.mubr.msk.bf16.gmra.mrb[20].mxu1 %vm1056_vm9, %v12593_v32  ;;  %v6795_v32 = vsel %vm11509_vm15, %v6793_v39, %v6794_v10  ;;  %v7472_v39 = vrot.slane %v7470_v57, 4  ;;  %v7471_v10 = vsel %vm11509_vm15, %v8560_v45, %v7470_v57  ;;  %v10417_v45 = vld [vmem:[%s10596_s15 + $0x60] sm:$0xff] }
 0x497   : > { %9614 = vmatprep.mubr.msk.bf16.mxu1 %vm1056_vm9, %v12597_v54  ;;  %v6798_v54 = vrot.slane %v13164_v0, 5  ;;  %v8494_v31 = vcombine.low %v6792_v20, %v6795_v32 }
 0x498   : > { %v7474_v42 = vsel %vm11509_vm15, %v7472_v39, %v7473_v40 }
 0x499   : > { %v6800_v59 = vrot.slane %v6798_v54, 4  ;;  %v8569_v50 = vcombine.low %v7471_v10, %v7474_v42  ;;  %v10418_v10 = vld [vmem:[%s10596_s15 + $0x78] sm:$0xff] }
 0x49b   : > { %v6802_v60 = vsel %vm11509_vm15, %v6800_v59, %v6801_v63  ;;  %v10407_v63 = vld [vmem:[%s10596_s15 + $0x8] sm:$0xff] }
 0x49e   : > { %9615 = vmatmul.mubr.msk.bf16.gmra.mrb[24].mxu1 %vm1056_vm9, %v12607_v56  ;;  %v6724_v56 = vld [vmem:[#allocation3 + $0xc] sm:$0xe] }
 0x49f   : > { %9618 = vmatprep.mubr.msk.bf16.mxu1 %vm1056_vm9, %v8420_v29  ;;  %v8471_v26 = vrot.slane %v6724_v56, 9  ;;  %v6816_v29 = vsel %vm11509_vm15, %v6814_v38, %v6815_v22 }
 0x4a0   : > { %v8497_v6 = vcombine.low %v6813_v11, %v6816_v29 }
 0x4a1   : > { %v6799_v41 = vsel %vm11509_vm15, %v8471_v26, %v6798_v54  ;;  %v10404_v54 = vld [vmem:[%s10596_s15 + $0x10] sm:$0xff] }
 0x4a2   : > { %v8495_v5 = vcombine.low %v6799_v41, %v6802_v60 }
 0x4a6   : > { %9619 = vmatmul.mubr.msk.bf16.gmra.mrb[28].mxu1 %vm1056_vm9, %v8449_v3 }
 0x4a7   : > { %9630 = vmatprep.mubr.msk.bf16.mxu1 %vm1056_vm9, %v8494_v31  ;;  %v10405_v31 = vld [vmem:[%s10596_s15] sm:$0xff] }
 0x4ae   : > { %9631 = vmatmul.mubr.msk.bf16.vlgmr.msra.gmra.mrb[0].mxu1 %vm1056_vm9, %v8495_v5 }
 0x4af   : > { %9663 = vmatpush3.bf16.msra.mxu1 %v12684_v7  ;;  %9634 = vmatprep.mubr.msk.bf16.mxu1 %vm1056_vm9, %v8496_v52  ;;  %v10400_v7 = vld [vmem:[%s13049_s3 + $0x100] sm:$0xff]  }
 0x4b0   : > { %9664 = vmatprep.subr.bf16.mxu1 %v10397_v23 }
 0x4b3   : > { %9665 = vmatpush3.bf16.msra.mxu1 %v10397_v23 }
 0x4b4   : > { %9666 = vmatprep.subr.bf16.mxu1 %v10398_v51 }
 0x4b6   : > { %9635 = vmatmul.mubr.msk.bf16.gmra.mrb[4].mxu1 %vm1056_vm9, %v8497_v6 }
 0x4b7   : > { %9638 = vmatprep.mubr.msk.bf16.mxu1 %vm1056_vm9, %v13169_v43  ;;  %9667 = vmatpush3.bf16.msra.mxu1 %v10398_v51 }
 0x4b8   : > { %9668 = vmatprep.subr.bf16.mxu1 %v10399_v25 }
 0x4bb   : > { %9669 = vmatpush3.bf16.msra.mxu1 %v10399_v25  ;;  %v10412_v25 = vld [vmem:[%s10596_s15 + $0x50] sm:$0xff] }
 0x4bc   : > { %9702 = vmatprep.subr.bf16.mxu1 %v10400_v7 }
 0x4be   : > { %9639 = vmatmul.mubr.msk.bf16.gmra.mrb[8].mxu1 %vm1056_vm9, %v13170_v24 }
 0x4bf   : > { %9642 = vmatprep.mubr.msk.bf16.mxu1 %vm1056_vm9, %v13171_v37 }
 0x4c6   : > { %9643 = vmatmul.mubr.msk.bf16.gmra.mrb[12].mxu1 %vm1056_vm9, %v13172_v34 }
 0x4c7   : > { %9646 = vmatprep.mubr.msk.bf16.mxu1 %vm1056_vm9, %v13173_v46 }
 0x4ce   : > { %9647 = vmatmul.mubr.msk.bf16.gmra.mrb[16].mxu1 %vm1056_vm9, %v13174_v2 }
 0x4cf   : > { %9650 = vmatprep.mubr.msk.bf16.mxu1 %vm1056_vm9, %v13175_v28 }
 0x4d6   : > { %9651 = vmatmul.mubr.msk.bf16.gmra.mrb[20].mxu1 %vm1056_vm9, %v13176_v58 }
 0x4d7   : > { %9654 = vmatprep.mubr.msk.bf16.mxu1 %vm1056_vm9, %v13177_v14 }
 0x4de   : > { %9655 = vmatmul.mubr.msk.bf16.gmra.mrb[24].mxu1 %vm1056_vm9, %v13178_v1 }
 0x4df   : > { %9658 = vmatprep.mubr.msk.bf16.mxu1 %vm1056_vm9, %v13179_v35 }
 0x4e6   : > { %9659 = vmatmul.mubr.msk.bf16.gmra.mrb[28].mxu1 %vm1056_vm9, %v13180_v47 }
 0x4e7   : > { %9670 = vmatprep.mubr.msk.bf16.mxu1 %vm1056_vm9, %v8495_v5  ;;  %v10409_v5 = vld [vmem:[%s10596_s15 + $0x20] sm:$0xff] }
 0x4ee   : > { %9671 = vmatmul.mubr.msk.bf16.vlgmr.msra.gmra.mrb[0].mxu1 %vm1056_vm9, %v8496_v52 }
 0x4ef   : > { %9703 = vmatpush3.bf16.msra.mxu1 %v10400_v7  ;;  %9674 = vmatprep.mubr.msk.bf16.mxu1 %vm1056_vm9, %v8497_v6 }
 0x4f0   : > { %9704 = vmatprep.subr.bf16.mxu1 %v10401_v13 }
 0x4f3   : > { %9705 = vmatpush3.bf16.msra.mxu1 %v10401_v13 }
 0x4f4   : > { %9706 = vmatprep.subr.bf16.mxu1 %v10402_v61 }
 0x4f6   : > { %9675 = vmatmul.mubr.msk.bf16.gmra.mrb[4].mxu1 %vm1056_vm9, %v13169_v43 }
 0x4f7   : > { %9678 = vmatprep.mubr.msk.bf16.mxu1 %vm1056_vm9, %v13170_v24  ;;  %9707 = vmatpush3.bf16.msra.mxu1 %v10402_v61 }
 0x4f8   : > { %9708 = vmatprep.subr.bf16.mxu1 %v10403_v4 }
 0x4fb   : > { %9709 = vmatpush3.bf16.msra.mxu1 %v10403_v4  ;;  %v10416_v4 = vld [vmem:[%s10596_s15 + $0x70] sm:$0xff] }
 0x4fe   : > { %9679 = vmatmul.mubr.msk.bf16.gmra.mrb[8].mxu1 %vm1056_vm9, %v13171_v37 }
 0x4ff   : > { %9682 = vmatprep.mubr.msk.bf16.mxu1 %vm1056_vm9, %v13172_v34 }
 0x506   : > { %9683 = vmatmul.mubr.msk.bf16.gmra.mrb[12].mxu1 %vm1056_vm9, %v13173_v46 }
 0x507   : > { %9686 = vmatprep.mubr.msk.bf16.mxu1 %vm1056_vm9, %v13174_v2 }
 0x50e   : > { %9687 = vmatmul.mubr.msk.bf16.gmra.mrb[16].mxu1 %vm1056_vm9, %v13175_v28 }
 0x50f   : > { %9690 = vmatprep.mubr.msk.bf16.mxu1 %vm1056_vm9, %v13176_v58 }
 0x516   : > { %9691 = vmatmul.mubr.msk.bf16.gmra.mrb[20].mxu1 %vm1056_vm9, %v13177_v14 }
 0x517   : > { %9694 = vmatprep.mubr.msk.bf16.mxu1 %vm1056_vm9, %v13178_v1 }
 0x51e   : > { %9695 = vmatmul.mubr.msk.bf16.gmra.mrb[24].mxu1 %vm1056_vm9, %v13179_v35 }
 0x51f   : > { %9698 = vmatprep.mubr.msk.bf16.mxu1 %vm1056_vm9, %v13180_v47 }
 0x526   : > { %9699 = vmatmul.mubr.msk.bf16.gmra.mrb[28].mxu1 %vm1056_vm9, %v13181_v49 }
 0x527   : > { %9710 = vmatprep.mubr.msk.bf16.mxu1 %vm1056_vm9, %v8496_v52  ;;  %v10410_v52 = vld [vmem:[%s10596_s15 + $0x38] sm:$0xff] }
 0x52e   : > { %9711 = vmatmul.mubr.msk.bf16.vlgmr.msra.gmra.mrb[0].mxu1 %vm1056_vm9, %v8497_v6 }
 0x52f   : > { %9714 = vmatprep.mubr.msk.bf16.mxu1 %vm1056_vm9, %v13169_v43 }
 0x536   : > { %9715 = vmatmul.mubr.msk.bf16.gmra.mrb[4].mxu1 %vm1056_vm9, %v13170_v24 }
 0x537   : > { %9718 = vmatprep.mubr.msk.bf16.mxu1 %vm1056_vm9, %v13171_v37  ;;  %v10413_v37 = vld [vmem:[%s10596_s15 + $0x40] sm:$0xff] }
 0x53e   : > { %9719 = vmatmul.mubr.msk.bf16.gmra.mrb[8].mxu1 %vm1056_vm9, %v13172_v34 }
 0x53f   : > { %9722 = vmatprep.mubr.msk.bf16.mxu1 %vm1056_vm9, %v13173_v46 }
 0x546   : > { %9723 = vmatmul.mubr.msk.bf16.gmra.mrb[12].mxu1 %vm1056_vm9, %v13174_v2  ;;  %v10414_v2 = vld [vmem:[%s10596_s15 + $0x58] sm:$0xff] }
 0x547   : > { %9726 = vmatprep.mubr.msk.bf16.mxu1 %vm1056_vm9, %v13175_v28 }
 0x54e   : > { %9727 = vmatmul.mubr.msk.bf16.gmra.mrb[16].mxu1 %vm1056_vm9, %v13176_v58  ;;  %v10415_v58 = vld [vmem:[%s10596_s15 + $0x48] sm:$0xff] }
 0x54f   : > { %9730 = vmatprep.mubr.msk.bf16.mxu1 %vm1056_vm9, %v13177_v14 }
 0x556   : > { %9731 = vmatmul.mubr.msk.bf16.gmra.mrb[20].mxu1 %vm1056_vm9, %v13178_v1 }
 0x557   : > { %9734 = vmatprep.mubr.msk.bf16.mxu1 %vm1056_vm9, %v13179_v35 }
 0x55e   : > { %9735 = vmatmul.mubr.msk.bf16.gmra.mrb[24].mxu1 %vm1056_vm9, %v13180_v47 }
 0x55f   : > { %9738 = vmatprep.mubr.msk.bf16.mxu1 %vm1056_vm9, %v13181_v49 }
 0x566   : > { %9739 = vmatmul.mubr.msk.bf16.gmra.mrb[28].mxu1 %vm1056_vm9, %v8569_v50  ;;  %v10419_v50 = vld [vmem:[%s10596_s15 + $0x68] sm:$0xff] }
 0x601   : > { %v9712_v36 = vpop.f32.mrb[0].mxu1 }
 0x602   : > { %v7716_v20 = vadd.f32 %v9712_v36, %v12860_v16  ;;  %v7548_v32 = vpop.f32.mrb[1].mxu1 }
 0x603   : > { %v7714_v33 = vadd.f32 %v12860_v16, %v7548_v32  ;;  %v9713_v0 = vpop.f32.mrb[2].mxu1 }
 0x604   : > { %v7748_v3 = vadd.f32 %v10404_v54, %v7716_v20  ;;  %v7717_v48 = vadd.f32 %v9713_v0, %v12860_v16  ;;  %v7551_v27 = vpop.f32.mrb[3].mxu1 }
 0x605   : > { %v7746_v59 = vadd.f32 %v10405_v31, %v7714_v33  ;;  %v7715_v56 = vadd.f32 %v12860_v16, %v7551_v27 }
 0x606   : > { %7780 = vst.msk [vmem:[%s12870_s9 + $0x10] sm:$0xff] %vm1056_vm9, %v7748_v3  ;;  %v7749_v30 = vadd.f32 %v10406_v44, %v7717_v48  ;;  %v10420_v3 = vld [vmem:[%s10596_s15 + $0x90] sm:$0xff] }
 0x607   : > { %7778 = vst.msk [vmem:[%s12870_s9] sm:$0xff] %vm1056_vm9, %v7746_v59  ;;  %v7747_v15 = vadd.f32 %v10407_v63, %v7715_v56  ;;  %v10421_v59 = vld [vmem:[%s10596_s15 + $0x80] sm:$0xff] }
 0x608   : > { %7781 = vst.msk [vmem:[%s12870_s9 + $0x18] sm:$0xff] %vm1056_vm9, %v7749_v30  ;;  %v10422_v30 = vld [vmem:[%s10596_s15 + $0x98] sm:$0xff] }
 0x609   : > { %7779 = vst.msk [vmem:[%s12870_s9 + $0x8] sm:$0xff] %vm1056_vm9, %v7747_v15  ;;  %v9716_v53 = vpop.f32.mrb[4].mxu1  ;;  %v10423_v15 = vld [vmem:[%s10596_s15 + $0x88] sm:$0xff] }
 0x60a   : > { %v7720_v62 = vadd.f32 %v9716_v53, %v12860_v16  ;;  %v7564_v26 = vpop.f32.mrb[5].mxu1 }
 0x60b   : > { %v7718_v60 = vadd.f32 %v12860_v16, %v7564_v26  ;;  %v9717_v17 = vpop.f32.mrb[6].mxu1 }
 0x60c   : > { %v7752_v21 = vadd.f32 %v10408_v19, %v7720_v62  ;;  %v7721_v9 = vadd.f32 %v9717_v17, %v12860_v16  ;;  %v7567_v41 = vpop.f32.mrb[7].mxu1 }
 0x60d   : > { %v7750_v55 = vadd.f32 %v10409_v5, %v7718_v60  ;;  %v7719_v23 = vadd.f32 %v12860_v16, %v7567_v41 }
 0x60e   : > { %7784 = vst.msk [vmem:[%s12870_s9 + $0x30] sm:$0xff] %vm1056_vm9, %v7752_v21  ;;  %v7753_v38 = vadd.f32 %v10410_v52, %v7721_v9  ;;  %v10424_v21 = vld [vmem:[%s10596_s15 + $0xb0] sm:$0xff] }
 0x60f   : > { %7782 = vst.msk [vmem:[%s12870_s9 + $0x20] sm:$0xff] %vm1056_vm9, %v7750_v55  ;;  %v7751_v22 = vadd.f32 %v10411_v18, %v7719_v23  ;;  %v10425_v55 = vld [vmem:[%s10596_s15 + $0xa0] sm:$0xff] }
 0x610   : > { %7785 = vst.msk [vmem:[%s12870_s9 + $0x38] sm:$0xff] %vm1056_vm9, %v7753_v38  ;;  %v10426_v38 = vld [vmem:[%s10596_s15 + $0xb8] sm:$0xff] }
 0x611   : > { %7783 = vst.msk [vmem:[%s12870_s9 + $0x28] sm:$0xff] %vm1056_vm9, %v7751_v22  ;;  %v9720_v51 = vpop.f32.mrb[8].mxu1  ;;  %v10427_v22 = vld [vmem:[%s10596_s15 + $0xa8] sm:$0xff] }
 0x612   : > { %v7724_v8 = vadd.f32 %v9720_v51, %v12860_v16  ;;  %v7580_v29 = vpop.f32.mrb[9].mxu1 }
 0x613   : > { %v7722_v11 = vadd.f32 %v12860_v16, %v7580_v29  ;;  %v9721_v6 = vpop.f32.mrb[10].mxu1 }
 0x614   : > { %v7756_v43 = vadd.f32 %v10412_v25, %v7724_v8  ;;  %v7725_v7 = vadd.f32 %v9721_v6, %v12860_v16  ;;  %v7583_v24 = vpop.f32.mrb[11].mxu1 }
 0x615   : > { %v7754_v34 = vadd.f32 %v10413_v37, %v7722_v11  ;;  %v7723_v46 = vadd.f32 %v12860_v16, %v7583_v24 }
 0x616   : > { %7788 = vst.msk [vmem:[%s12870_s9 + $0x50] sm:$0xff] %vm1056_vm9, %v7756_v43  ;;  %v7757_v28 = vadd.f32 %v10414_v2, %v7725_v7  ;;  %v10428_v43 = vld [vmem:[%s10596_s15 + $0xd0] sm:$0xff] }
 0x617   : > { %7786 = vst.msk [vmem:[%s12870_s9 + $0x40] sm:$0xff] %vm1056_vm9, %v7754_v34  ;;  %v7755_v14 = vadd.f32 %v10415_v58, %v7723_v46  ;;  %v10429_v34 = vld [vmem:[%s10596_s15 + $0xc0] sm:$0xff] }
 0x618   : > { %7789 = vst.msk [vmem:[%s12870_s9 + $0x58] sm:$0xff] %vm1056_vm9, %v7757_v28  ;;  %v10430_v28 = vld [vmem:[%s10596_s15 + $0xd8] sm:$0xff] }
 0x619   : > { %7787 = vst.msk [vmem:[%s12870_s9 + $0x48] sm:$0xff] %vm1056_vm9, %v7755_v14  ;;  %v9724_v1 = vpop.f32.mrb[12].mxu1  ;;  %v10431_v14 = vld [vmem:[%s10596_s15 + $0xc8] sm:$0xff] }
 0x61a   : > { %v7728_v35 = vadd.f32 %v9724_v1, %v12860_v16  ;;  %v7596_v47 = vpop.f32.mrb[13].mxu1 }
 0x61b   : > { %v7726_v13 = vadd.f32 %v12860_v16, %v7596_v47  ;;  %v9725_v61 = vpop.f32.mrb[14].mxu1 }
 0x61c   : > { %v7760_v49 = vadd.f32 %v10416_v4, %v7728_v35  ;;  %v7729_v57 = vadd.f32 %v9725_v61, %v12860_v16  ;;  %v7599_v12 = vpop.f32.mrb[15].mxu1 }
 0x61d   : > { %v7758_v39 = vadd.f32 %v10417_v45, %v7726_v13  ;;  %v7727_v40 = vadd.f32 %v12860_v16, %v7599_v12 }
 0x61e   : > { %7792 = vst.msk [vmem:[%s12870_s9 + $0x70] sm:$0xff] %vm1056_vm9, %v7760_v49  ;;  %v7761_v42 = vadd.f32 %v10418_v10, %v7729_v57  ;;  %v10432_v49 = vld [vmem:[%s10596_s15 + $0xf0] sm:$0xff] }
 0x61f   : > { %7790 = vst.msk [vmem:[%s12870_s9 + $0x60] sm:$0xff] %vm1056_vm9, %v7758_v39  ;;  %v7759_v36 = vadd.f32 %v10419_v50, %v7727_v40  ;;  %v10433_v39 = vld [vmem:[%s10596_s15 + $0xe0] sm:$0xff] }
 0x620   : > { %7793 = vst.msk [vmem:[%s12870_s9 + $0x78] sm:$0xff] %vm1056_vm9, %v7761_v42  ;;  %v10434_v42 = vld [vmem:[%s10596_s15 + $0xf8] sm:$0xff] }
 0x621   : > { %7791 = vst.msk [vmem:[%s12870_s9 + $0x68] sm:$0xff] %vm1056_vm9, %v7759_v36  ;;  %v9728_v20 = vpop.f32.mrb[16].mxu1  ;;  %v10435_v36 = vld [vmem:[%s10596_s15 + $0xe8] sm:$0xff] }
 0x622   : > { %v7732_v32 = vadd.f32 %v9728_v20, %v12860_v16  ;;  %v7612_v33 = vpop.f32.mrb[17].mxu1 }
 0x623   : > { %v7730_v0 = vadd.f32 %v12860_v16, %v7612_v33  ;;  %v9729_v54 = vpop.f32.mrb[18].mxu1 }
 0x624   : > { %v7764_v48 = vadd.f32 %v10420_v3, %v7732_v32  ;;  %v7733_v27 = vadd.f32 %v9729_v54, %v12860_v16  ;;  %v7615_v31 = vpop.f32.mrb[19].mxu1 }
 0x625   : > { %v7762_v56 = vadd.f32 %v10421_v59, %v7730_v0  ;;  %v7731_v44 = vadd.f32 %v12860_v16, %v7615_v31 }
 0x626   : > { %7796 = vst.msk [vmem:[%s12870_s9 + $0x90] sm:$0xff] %vm1056_vm9, %v7764_v48  ;;  %v7765_v63 = vadd.f32 %v10422_v30, %v7733_v27 }
 0x627   : > { %7794 = vst.msk [vmem:[%s12870_s9 + $0x80] sm:$0xff] %vm1056_vm9, %v7762_v56  ;;  %v7763_v53 = vadd.f32 %v10423_v15, %v7731_v44 }
 0x628   : > { %7797 = vst.msk [vmem:[%s12870_s9 + $0x98] sm:$0xff] %vm1056_vm9, %v7765_v63 }
 0x629   : > { %7795 = vst.msk [vmem:[%s12870_s9 + $0x88] sm:$0xff] %vm1056_vm9, %v7763_v53  ;;  %v9732_v62 = vpop.f32.mrb[20].mxu1 }
 0x62a   : > { %v7736_v26 = vadd.f32 %v9732_v62, %v12860_v16  ;;  %v7628_v60 = vpop.f32.mrb[21].mxu1 }
 0x62b   : > { %v7734_v17 = vadd.f32 %v12860_v16, %v7628_v60  ;;  %v9733_v19 = vpop.f32.mrb[22].mxu1 }
 0x62c   : > { %v7768_v9 = vadd.f32 %v10424_v21, %v7736_v26  ;;  %v7737_v41 = vadd.f32 %v9733_v19, %v12860_v16  ;;  %v7631_v5 = vpop.f32.mrb[23].mxu1 }
 0x62d   : > { %v7766_v23 = vadd.f32 %v10425_v55, %v7734_v17  ;;  %v7735_v52 = vadd.f32 %v12860_v16, %v7631_v5 }
 0x62e   : > { %7800 = vst.msk [vmem:[%s12870_s9 + $0xb0] sm:$0xff] %vm1056_vm9, %v7768_v9  ;;  %v7769_v18 = vadd.f32 %v10426_v38, %v7737_v41 }
 0x62f   : > { %7798 = vst.msk [vmem:[%s12870_s9 + $0xa0] sm:$0xff] %vm1056_vm9, %v7766_v23  ;;  %v7767_v51 = vadd.f32 %v10427_v22, %v7735_v52 }
 0x630   : > { %7801 = vst.msk [vmem:[%s12870_s9 + $0xb8] sm:$0xff] %vm1056_vm9, %v7769_v18 }
 0x631   : > { %7799 = vst.msk [vmem:[%s12870_s9 + $0xa8] sm:$0xff] %vm1056_vm9, %v7767_v51  ;;  %v9736_v8 = vpop.f32.mrb[24].mxu1 }
 0x632   : > { %v7740_v29 = vadd.f32 %v9736_v8, %v12860_v16  ;;  %v7644_v11 = vpop.f32.mrb[25].mxu1 }
 0x633   : > { %v7738_v6 = vadd.f32 %v12860_v16, %v7644_v11  ;;  %v9737_v25 = vpop.f32.mrb[26].mxu1 }
 0x634   : > { %v7772_v7 = vadd.f32 %v10428_v43, %v7740_v29  ;;  %v7741_v24 = vadd.f32 %v9737_v25, %v12860_v16  ;;  %v7647_v37 = vpop.f32.mrb[27].mxu1 }
 0x635   : > { %v7770_v46 = vadd.f32 %v10429_v34, %v7738_v6  ;;  %v7739_v2 = vadd.f32 %v12860_v16, %v7647_v37 }
 0x636   : > { %7804 = vst.msk [vmem:[%s12870_s9 + $0xd0] sm:$0xff] %vm1056_vm9, %v7772_v7  ;;  %v7773_v58 = vadd.f32 %v10430_v28, %v7741_v24 }
 0x637   : > { %7802 = vst.msk [vmem:[%s12870_s9 + $0xc0] sm:$0xff] %vm1056_vm9, %v7770_v46  ;;  %v7771_v1 = vadd.f32 %v10431_v14, %v7739_v2 }
 0x638   : > { %7805 = vst.msk [vmem:[%s12870_s9 + $0xd8] sm:$0xff] %vm1056_vm9, %v7773_v58 }
 0x639   : > { %7803 = vst.msk [vmem:[%s12870_s9 + $0xc8] sm:$0xff] %vm1056_vm9, %v7771_v1  ;;  %v9740_v35 = vpop.f32.mrb[28].mxu1 }
 0x63a   : > { %v7744_v47 = vadd.f32 %v9740_v35, %v12860_v16  ;;  %v7660_v13 = vpop.f32.mrb[29].mxu1 }
 0x63b   : > { %v7742_v61 = vadd.f32 %v12860_v16, %v7660_v13  ;;  %v9741_v4 = vpop.f32.mrb[30].mxu1 }
 0x63c   : > { %v7776_v57 = vadd.f32 %v10432_v49, %v7744_v47  ;;  %v7745_v12 = vadd.f32 %v9741_v4, %v12860_v16  ;;  %v7663_v45 = vpop.f32.mrb[31].mxu1 }
 0x63d   : > { %v7774_v40 = vadd.f32 %v10433_v39, %v7742_v61  ;;  %v7743_v10 = vadd.f32 %v12860_v16, %v7663_v45 }
 0x63e   : > { %7808 = vst.msk [vmem:[%s12870_s9 + $0xf0] sm:$0xff] %vm1056_vm9, %v7776_v57  ;;  %v7777_v50 = vadd.f32 %v10434_v42, %v7745_v12 }
 0x63f   : > { %7806 = vst.msk [vmem:[%s12870_s9 + $0xe0] sm:$0xff] %vm1056_vm9, %v7774_v40  ;;  %v7775_v20 = vadd.f32 %v10435_v36, %v7743_v10 }
 0x640   : > { %7809 = vst.msk [vmem:[%s12870_s9 + $0xf8] sm:$0xff] %vm1056_vm9, %v7777_v50 }
 0x641   : > { %7807 = vst.msk [vmem:[%s12870_s9 + $0xe8] sm:$0xff] %vm1056_vm9, %v7775_v20 }
 0x642   : > { %10449 = shalt.err (!%p10446_p3)
}
 0x643   : > { %s10450_s15 = scalar_lea.hbm %s12992_s13, 4096  ;;  %s10454_s6 = scalar_lea.hbm %s13051_s5, 8192 }
 0x644   : > { %p10451_p4 = scmp.ne.s32.totalorder %s12992_s13, %s10450_s15  ;;  %p10455_p9 = scmp.lt.u32.totalorder %s12992_s13, %s13051_s5 }
 0x645   : > { %p10456_p10 = scmp.lt.u32.totalorder %s10454_s6, %s10450_s15  ;;  %p10458_p12 = scmp.lt.u32.totalorder %s10450_s15, %s12992_s13 }
 0x646   : > { %p10452_p7 = pnand %p10451_p4, %p10572_p5 }
 0x647   : > { %p10457_p11 = por %p10456_p10, %p10455_p9 }
 0x648   : > { %p10453_p8 = pneg %p10452_p7 }
 0x649   : > { %p10459_p13 = por %p10458_p12, %p10457_p11 }
 0x64b   : > { %p10460_p0 = pnand %p10459_p13, %p10453_p8 }
 0x64d   : > { %10463 = shalt.err (!%p10460_p0)
}
 0x64e   : > { %s10502_s9 = smov 128   ;;  %s10503_s10 = smov 8  }
 0x64f   : > { %10254 = dma.vmem_to_hbm [thread:$0]  (%p10572_p5), %s12994_s11, 4096, %s12992_s13, %s13005_s14, %s10502_s9, %s10502_s9, %s10503_s10  }
 0x650 PF: > { %p10260_p1 = scmp.ge.s32.totalorder %s10498_s21, 2  ;;  %s7839_s12 = sand.u32 1, %s10486_s18  }
 0x651   : > { %s7840_s22 = scalar_lea.sflag [#allocation5], %s7839_s12 }
 0x652   : > { %p10257_p2 = pnand %p10260_p1, %p10576_p6 }
 0x654   : > { %10481 = dma.done.wait (!%p10257_p2), %s7840_s22, 4096  }
 0x655   : > { %10483 = vsyncadd (!%p10257_p2), %s7840_s22, 4294963200  ;;  %p15_p3 = scmp.ge.s32.totalorder %s10559_s24, 4   ;;  %s13182_s18 = smov %s10490_s19 }
 0x656   : > { %s13183_s19 = smov %s10494_s20  ;;  %s13184_s20 = smov %s10570_s27 }
 0x657   : > { %s13185_s21 = smov %s10559_s24  ;;  %17 = sbr.rel (!%p15_p3) target bundleno = 3 (0x3), region = 95 }
 0x65e   :  { %7845 = vsyncpa [#allocation5], 1 }
 0x65f   :  { %7847 = vsyncpa [#allocation5 + $0x1], 1 }

</bundles_post_ra>
